<compile_context>
chip_gen: v6e
topology: v6e:2x2x1
jax: 0.10.0
libtpu: 0.0.40
codegen_flags: <defaults>
</compile_context>

<pallas_src>
import math
import functools

import numpy as np
import jax
import jax.numpy as jnp
from jax import lax
from jax.experimental import pallas as pl
from jax.experimental.pallas import tpu as pltpu


# ---------------------------------------------------------------------------
# Pallas kernels
# ---------------------------------------------------------------------------

def _conv1_kernel(p_ref, w_ref, b_ref, o_ref):
    """conv1 as a single im2col matmul (+bias+ReLU), lane-dense bf16 store.

    p_ref : (M, 100) bf16   two adjacent output pixels' 50 taps per row
    w_ref : (100, 128) bf16 block-diagonal per-pixel weights
    b_ref : (1, 128) f32
    o_ref : (M, 128) bf16
    """
    acc = jnp.dot(p_ref[...], w_ref[...], preferred_element_type=jnp.float32)
    acc = acc + b_ref[...]
    o_ref[...] = jnp.maximum(acc, 0.0).astype(o_ref.dtype)


def _conv2_pool_kernel(p_ref, w_ref, b_ref, pt_ref, o_ref, *, nb, eps):
    """conv2 matmul + per-image InstanceNorm + ReLU + adaptive-avg-pool matmul.

    p_ref  : (nb*Ho*Wo, 576) bf16  im2col patches (batch folded into M)
    w_ref  : (576, 128) bf16
    b_ref  : (1, 128) f32
    pt_ref : (nb*36, nb*Ho*Wo) f32 block-diagonal pooling matrix
    o_ref  : (nb*36, 128) f32      pooled features (j-major, channels on lanes)
    """
    a = jnp.dot(p_ref[...], w_ref[...], preferred_element_type=jnp.float32)
    a = a + b_ref[...]
    m, c = a.shape
    sp = m // nb
    a3 = a.reshape(nb, sp, c)                       # leading-dim split (safe)
    mean = jnp.mean(a3, axis=1, keepdims=True)
    var = jnp.mean((a3 - mean) ** 2, axis=1, keepdims=True)
    a3 = jnp.maximum((a3 - mean) * lax.rsqrt(var + eps), 0.0)
    a = a3.reshape(m, c)                            # leading-dim merge (safe)
    o_ref[...] = jnp.dot(pt_ref[...], a, preferred_element_type=jnp.float32)


def _head_kernel(x_ref, w1_ref, b1_ref, w2_ref, b2_ref, o_ref):
    """fc1 -> ReLU -> fc2 (fc2 padded to 128 output lanes), bf16 MXU dots."""
    h = jnp.dot(x_ref[...], w1_ref[...], preferred_element_type=jnp.float32)
    h = jnp.maximum(h + b1_ref[...], 0.0)
    o_ref[...] = jnp.dot(h.astype(jnp.bfloat16), w2_ref[...],
                         preferred_element_type=jnp.float32) + b2_ref[...]


def _apply_kernel(theta_ref, win_ref, h_ref, y_ref, o_ref, *, nrow):
    """Quadratic-basis affine transform of (S,V) + kornia hsv->rgb + residual.

    theta_ref : (B, 128) f32 in SMEM (only [0:92] used; 46x2 flattened)
    win_ref   : (1, 18, nrow, 128) f32   9 shifted windows x (S, V), flat spatial
    h_ref     : (1, nrow, 128) f32       hue of x in [0, 2*pi)
    y_ref     : (1, 3, nrow, 128) f32    residual RGB
    o_ref     : (1, 3, nrow, 128) f32
    """
    b = pl.program_id(0)
    s_acc = jnp.zeros((nrow, 128), jnp.float32)
    v_acc = jnp.zeros((nrow, 128), jnp.float32)
    # 9 shifted windows x 5 quadratic terms (S, V, S^2, V^2, SV) + constant,
    # window-major ordering == torch get_param's basis_stacked ordering.
    for w in range(9):
        sw = win_ref[0, 2 * w]
        vw = win_ref[0, 2 * w + 1]
        terms = (sw, vw, sw * sw, vw * vw, sw * vw)
        for t, term in enumerate(terms):
            i = w * 5 + t
            s_acc = s_acc + theta_ref[b, 2 * i] * term
            v_acc = v_acc + theta_ref[b, 2 * i + 1] * term
    s_out = s_acc + theta_ref[b, 90]                 # constant basis term
    v_out = v_acc + theta_ref[b, 91]

    # kornia.color.hsv_to_rgb, arithmetic form:
    #   f(n) = V - V*S*clamp(min(k, 4-k), 0, 1),  k = (n + 6h/2pi) mod 6
    h6 = h_ref[0] * (3.0 / math.pi)                  # in [0, 6)
    vs = v_out * s_out

    def _chan(n):
        k = n + h6
        k = jnp.where(k >= 6.0, k - 6.0, k)
        w_ = jnp.clip(jnp.minimum(k, 4.0 - k), 0.0, 1.0)
        return v_out - vs * w_

    o_ref[0, 0] = _chan(5.0) + y_ref[0, 0]
    o_ref[0, 1] = _chan(3.0) + y_ref[0, 1]
    o_ref[0, 2] = _chan(1.0) + y_ref[0, 2]


# ---------------------------------------------------------------------------
# pallas_call wrappers
# ---------------------------------------------------------------------------

def conv1_call(patches, wblk, bias):
    M, K = patches.shape
    N = wblk.shape[1]
    return pl.pallas_call(
        _conv1_kernel,
        out_shape=jax.ShapeDtypeStruct((M, N), jnp.bfloat16),
        grid=(1,),
        in_specs=[
            pl.BlockSpec((M, K), lambda i: (0, 0)),
            pl.BlockSpec((K, N), lambda i: (0, 0)),
            pl.BlockSpec((1, N), lambda i: (0, 0)),
        ],
        out_specs=pl.BlockSpec((M, N), lambda i: (0, 0)),
        compiler_params=pltpu.CompilerParams(dimension_semantics=("arbitrary",)),
    )(patches, wblk, bias)


def conv2_pool_call(patches, w, b, ptblk, *, nb):
    M, K = patches.shape
    N = w.shape[1]
    MP = ptblk.shape[0]
    return pl.pallas_call(
        functools.partial(_conv2_pool_kernel, nb=nb, eps=1e-5),
        out_shape=jax.ShapeDtypeStruct((MP, N), jnp.float32),
        grid=(1,),
        in_specs=[
            pl.BlockSpec((M, K), lambda i: (0, 0)),
            pl.BlockSpec((K, N), lambda i: (0, 0)),
            pl.BlockSpec((1, N), lambda i: (0, 0)),
            pl.BlockSpec((MP, M), lambda i: (0, 0)),
        ],
        out_specs=pl.BlockSpec((MP, N), lambda i: (0, 0)),
        compiler_params=pltpu.CompilerParams(dimension_semantics=("arbitrary",)),
    )(patches, w, b, ptblk)


def head_call(xflat, w1, b1, w2, b2):
    B, K = xflat.shape
    N1 = w1.shape[1]
    N2 = w2.shape[1]
    return pl.pallas_call(
        _head_kernel,
        out_shape=jax.ShapeDtypeStruct((B, N2), jnp.float32),
        grid=(1,),
        in_specs=[
            pl.BlockSpec((B, K), lambda i: (0, 0)),
            pl.BlockSpec((K, N1), lambda i: (0, 0)),
            pl.BlockSpec((1, N1), lambda i: (0, 0)),
            pl.BlockSpec((N1, N2), lambda i: (0, 0)),
            pl.BlockSpec((1, N2), lambda i: (0, 0)),
        ],
        out_specs=pl.BlockSpec((B, N2), lambda i: (0, 0)),
        compiler_params=pltpu.CompilerParams(dimension_semantics=("arbitrary",)),
    )(xflat, w1, b1, w2, b2)


def apply_call(theta, windows, hflat, yflat):
    B, _, nrow, _ = windows.shape
    return pl.pallas_call(
        functools.partial(_apply_kernel, nrow=nrow),
        out_shape=jax.ShapeDtypeStruct((B, 3, nrow, 128), jnp.float32),
        grid=(B,),
        in_specs=[
            pl.BlockSpec(memory_space=pltpu.MemorySpace.SMEM),        # theta
            pl.BlockSpec((1, 18, nrow, 128), lambda bi: (bi, 0, 0, 0)),
            pl.BlockSpec((1, nrow, 128), lambda bi: (bi, 0, 0)),
            pl.BlockSpec((1, 3, nrow, 128), lambda bi: (bi, 0, 0, 0)),
        ],
        out_specs=pl.BlockSpec((1, 3, nrow, 128), lambda bi: (bi, 0, 0, 0)),
        compiler_params=pltpu.CompilerParams(dimension_semantics=("parallel",)),
    )(theta, windows, hflat, yflat)


# ---------------------------------------------------------------------------
# Pure-JAX / numpy glue (color conversion, im2col, pooling matrix, weight prep)
# ---------------------------------------------------------------------------

def _rgb_to_sv(img, eps=1e-8):
    """S and V planes of kornia.rgb_to_hsv (hue not needed). img: (B,3,H,W)."""
    maxc = jnp.max(img, axis=1)
    minc = jnp.min(img, axis=1)
    return (maxc - minc) / (maxc + eps), maxc


def _rgb_to_hsv_planes(img, eps=1e-8):
    """H (radians, [0,2pi)), S, V planes; kornia semantics, no gather/argmax."""
    r, g, b = img[:, 0], img[:, 1], img[:, 2]
    maxc = jnp.maximum(jnp.maximum(r, g), b)
    minc = jnp.minimum(jnp.minimum(r, g), b)
    v = maxc
    delta = maxc - minc
    s = delta / (maxc + eps)
    dsafe = jnp.where(delta == 0.0, 1.0, delta)
    rc, gc, bc = maxc - r, maxc - g, maxc - b
    h = jnp.where(maxc == r, bc - gc,
                  jnp.where(maxc == g, (rc - bc) + 2.0 * dsafe,
                            (gc - rc) + 4.0 * dsafe))
    h = ((h / (6.0 * dsafe)) % 1.0) * (2.0 * math.pi)
    return h, s, v


def _im2col(x_nhwc, k, pad, stride=2):
    """(B,H,W,C) -> (B,Ho,Wo,k*k*C) stride-`stride` im2col patches."""
    B, H, W, C = x_nhwc.shape
    Ho = (H + 2 * pad - k) // stride + 1
    Wo = (W + 2 * pad - k) // stride + 1
    xp = jnp.pad(x_nhwc, ((0, 0), (pad, pad), (pad, pad), (0, 0)))
    span_h = stride * (Ho - 1) + 1
    span_w = stride * (Wo - 1) + 1
    cols = [xp[:, di:di + span_h:stride, dj:dj + span_w:stride, :]
            for di in range(k) for dj in range(k)]
    return jnp.concatenate(cols, axis=-1), Ho, Wo


def _adaptive_avg_pool_matrix(hin, win, hout, wout):
    """(hin*win, hout*wout) matrix matching torch.nn.AdaptiveAvgPool2d bins."""
    P = np.zeros((hin * win, hout * wout), np.float32)
    for oh in range(hout):
        h0 = (oh * hin) // hout
        h1 = -((-(oh + 1) * hin) // hout)
        for ow in range(wout):
            w0 = (ow * win) // wout
            w1 = -((-(ow + 1) * win) // wout)
            cnt = float((h1 - h0) * (w1 - w0))
            for ih in range(h0, h1):
                for iw in range(w0, w1):
                    P[ih * win + iw, oh * wout + ow] = 1.0 / cnt
    return P


def prepare_params(params):
    """One-time weight re-layout / folding / bf16 casts (call OUTSIDE jit)."""
    c1w = np.asarray(params["conv1_w"], np.float32)   # (64, 2, 5, 5)
    c1b = np.asarray(params["conv1_b"], np.float32)
    c2w = np.asarray(params["conv2_w"], np.float32)   # (128, 64, 3, 3)
    c2b = np.asarray(params["conv2_b"], np.float32)
    f1w = np.asarray(params["fc1_w"], np.float32)     # (128, 4608)
    f1b = np.asarray(params["fc1_b"], np.float32)
    f2w = np.asarray(params["fc2_w"], np.float32)     # (92, 128)
    f2b = np.asarray(params["fc2_b"], np.float32)

    cout1, cin1, k1, _ = c1w.shape
    assert 2 * cout1 == 128, "pixel-pairing assumes conv1 Cout == 64"
    kkc1 = k1 * k1 * cin1
    w1c = c1w.transpose(2, 3, 1, 0).reshape(kkc1, cout1)      # (kh,kw,Cin,Cout)
    wblk = np.zeros((2 * kkc1, 2 * cout1), np.float32)        # block-diag: 2 pixels
    wblk[:kkc1, :cout1] = w1c
    wblk[kkc1:, cout1:] = w1c
    bblk = np.tile(c1b, 2).reshape(1, 2 * cout1)

    cout2, cin2, k2, _ = c2w.shape
    w2c = c2w.transpose(2, 3, 1, 0).reshape(k2 * k2 * cin2, cout2)

    n1 = f1w.shape[0]
    # torch Flatten index = c*36 + j  ->  reorder to the kernel's (j, c) flatten.
    w1r = f1w.reshape(n1, cout2, 36).transpose(2, 1, 0).reshape(36 * cout2, n1)

    n2 = f2w.shape[0]
    n2p = 128
    w2p = np.zeros((n1, n2p), np.float32)
    w2p[:, :n2] = f2w.T
    b2p = np.zeros((1, n2p), np.float32)
    b2p[0, :n2] = f2b

    return {
        "conv1_w": jnp.asarray(wblk, jnp.bfloat16),
        "conv1_b": jnp.asarray(bblk, jnp.float32),
        "conv2_w": jnp.asarray(w2c, jnp.bfloat16),
        "conv2_b": jnp.asarray(c2b.reshape(1, cout2), jnp.float32),
        "fc1_w": jnp.asarray(w1r, jnp.bfloat16),
        "fc1_b": jnp.asarray(f1b.reshape(1, n1), jnp.float32),
        "fc2_w": jnp.asarray(w2p, jnp.bfloat16),
        "fc2_b": jnp.asarray(b2p, jnp.float32),
    }


def transformer_forward(pp, x, y):
    B, _, H, W = x.shape
    _, _, Hy, Wy = y.shape
    assert (Hy, Wy) == (H, W), "residual add requires matching spatial dims"
    assert (H * W) % 128 == 0
    # TODO(synk): tile the apply/conv kernels spatially (1-row halo) for large
    # images so blocks fit v7x's 64 MiB VMEM; not needed at demo sizes.

    # ---- feature extractor on (y_s, y_v) ----
    y_s, y_v = _rgb_to_sv(y)
    feat = jnp.stack([y_s, y_v], axis=-1).astype(jnp.bfloat16)     # (B, Hy, Wy, 2)
    p1, Ho1, Wo1 = _im2col(feat, k=5, pad=2)                       # (B,Ho1,Wo1,50)
    assert Wo1 % 2 == 0
    p1 = p1.reshape(B * Ho1 * Wo1 // 2, 2 * p1.shape[-1])          # (M/2, 100)
    a1 = conv1_call(p1, pp["conv1_w"], pp["conv1_b"])              # (M/2, 128) bf16
    a1 = a1.reshape(B, Ho1, Wo1, 64)                               # free reshape

    p2, Ho2, Wo2 = _im2col(a1, k=3, pad=1)                         # (B,Ho2,Wo2,576)
    C2 = pp["conv2_w"].shape[1]
    p2 = p2.reshape(B * Ho2 * Wo2, p2.shape[-1])
    Pm = _adaptive_avg_pool_matrix(Ho2, Wo2, 6, 6)                 # (Ho2*Wo2, 36)
    ptblk = jnp.asarray(np.kron(np.eye(B, dtype=np.float32), Pm.T))
    pooled = conv2_pool_call(p2, pp["conv2_w"], pp["conv2_b"], ptblk, nb=B)  # (B*36, C2)
    xflat = pooled.reshape(B, 36 * C2).astype(jnp.bfloat16)
    theta = head_call(xflat, pp["fc1_w"], pp["fc1_b"],
                      pp["fc2_w"], pp["fc2_b"])                    # (B, 128), [:92] used

    # ---- per-pixel quadratic HSV transform + hsv->rgb + residual (fused) ----
    x_h, x_s, x_v = _rgb_to_hsv_planes(x)
    sv = jnp.stack([x_s, x_v], axis=1)                             # (B,2,H,W)
    svp = jnp.pad(sv, ((0, 0), (0, 0), (1, 1), (1, 1)))
    wins = [svp[:, :, di:di + H, dj:dj + W]
            for di in range(3) for dj in range(3)]
    windows = jnp.concatenate(wins, axis=1)                        # (B,18,H,W)
    nrow = (H * W) // 128
    windows = windows.reshape(B, 18, nrow, 128)
    hflat = x_h.reshape(B, nrow, 128)
    yflat = y.reshape(B, 3, nrow, 128)
    out = apply_call(theta, windows, hflat, yflat)                 # (B,3,nrow,128)
    return out.reshape(B, 3, H, W)


def init_params(key, in_features=64, in_channels=2):
    ks = jax.random.split(key, 8)

    def w(k, shape, fan_in):
        return jax.random.normal(k, shape, jnp.float32) / math.sqrt(fan_in)

    return {
        "conv1_w": w(ks[0], (in_features, in_channels, 5, 5), in_channels * 25),
        "conv1_b": w(ks[1], (in_features,), 64),
        "conv2_w": w(ks[2], (in_features * 2, in_features, 3, 3), in_features * 9),
        "conv2_b": w(ks[3], (in_features * 2,), 64),
        "fc1_w": w(ks[4], (128, in_features * 2 * 6 * 6), in_features * 2 * 36),
        "fc1_b": w(ks[5], (128,), 64),
        "fc2_w": w(ks[6], (92, 128), 128),
        "fc2_b": w(ks[7], (92,), 64),
    }


if __name__ == "__main__":
    key = jax.random.PRNGKey(0)
    kx, ky, kp = jax.random.split(key, 3)
    B, H, W = 2, 32, 32
    # x: "blurred image", y: residual image (same spatial size so output_rgb + y is valid)
    x = jax.random.uniform(kx, (B, 3, H, W), jnp.float32)
    y = jax.random.uniform(ky, (B, 3, H, W), jnp.float32)
    params = init_params(kp)
    prepped = prepare_params(params)        # weight folding hoisted out of jit
    out = jax.jit(transformer_forward)(prepped, x, y)
    jax.block_until_ready(out)
    assert out.shape == (B, 3, H, W) and out.dtype == jnp.float32
    print("KERNEL_OK")
</pallas_src>

<mosaic_0001>
module attributes {stable_mosaic.version = 11 : i64} {
  func.func @_conv1_kernel(%arg0: i32, %arg1: memref<256x100xbf16, #tpu.memory_space<vmem>>, %arg2: memref<100x128xbf16, #tpu.memory_space<vmem>>, %arg3: memref<1x128xf32, #tpu.memory_space<vmem>>, %arg4: memref<256x128xbf16, #tpu.memory_space<vmem>>) attributes {dimension_semantics = [#tpu.dimension_semantics<arbitrary>], iteration_bounds = array<i64: 1>, scalar_prefetch = 0 : i64, scratch_operands = 0 : i64, tpu.core_type = #tpu.core_type<tc>, window_params = [{pipeline_mode = #tpu.pipeline_mode<synchronous>, transform_indices = @transform_0, window_bounds = array<i64: 256, 100>}, {pipeline_mode = #tpu.pipeline_mode<synchronous>, transform_indices = @transform_1, window_bounds = array<i64: 100, 128>}, {pipeline_mode = #tpu.pipeline_mode<synchronous>, transform_indices = @transform_2, window_bounds = array<i64: 1, 128>}, {pipeline_mode = #tpu.pipeline_mode<synchronous>, transform_indices = @transform_3, window_bounds = array<i64: 256, 128>}]} {
    %c0 = arith.constant 0 : index
    %c0_0 = arith.constant 0 : index
    %0 = vector.load %arg1[%c0, %c0_0] : memref<256x100xbf16, #tpu.memory_space<vmem>>, vector<256x100xbf16>
    %c0_1 = arith.constant 0 : index
    %c0_2 = arith.constant 0 : index
    %1 = vector.load %arg2[%c0_1, %c0_2] : memref<100x128xbf16, #tpu.memory_space<vmem>>, vector<100x128xbf16>
    %cst = arith.constant dense<0.000000e+00> : vector<256x128xf32>
    %2 = tpu.matmul %0, %1, %cst {dimension_numbers = #tpu.dot_dimension_numbers<[1], [0], [0], [1], [0, 0, 1, 1], [], []>} : vector<256x100xbf16>, vector<100x128xbf16>, vector<256x128xf32> -> vector<256x128xf32>
    %c0_3 = arith.constant 0 : index
    %c0_4 = arith.constant 0 : index
    %3 = vector.load %arg3[%c0_3, %c0_4] : memref<1x128xf32, #tpu.memory_space<vmem>>, vector<1x128xf32>
    %4 = vector.broadcast %3 : vector<1x128xf32> to vector<256x128xf32>
    %5 = arith.addf %2, %4 : vector<256x128xf32>
    %cst_5 = arith.constant 0.000000e+00 : f32
    %6 = vector.broadcast %cst_5 : f32 to vector<256x128xf32>
    %7 = arith.maximumf %5, %6 : vector<256x128xf32>
    %8 = arith.truncf %7 : vector<256x128xf32> to vector<256x128xbf16>
    %c0_6 = arith.constant 0 : index
    %c0_7 = arith.constant 0 : index
    %9 = vector.load %arg4[%c0_6, %c0_7] : memref<256x128xbf16, #tpu.memory_space<vmem>>, vector<256x128xbf16>
    tpu.vector_store %arg4[%c0_6, %c0_7], %8 {strides = array<i32>} : memref<256x128xbf16, #tpu.memory_space<vmem>>, vector<256x128xbf16>,
    return
  }
  func.func @transform_0(%arg0: i32) -> (i32, i32) {
    %c0_i32 = arith.constant 0 : i32
    %c0_i32_0 = arith.constant 0 : i32
    %c0_i32_1 = arith.constant 0 : i32
    return %c0_i32, %c0_i32_0 : i32, i32
  }
  func.func @transform_1(%arg0: i32) -> (i32, i32) {
    %c0_i32 = arith.constant 0 : i32
    %c0_i32_0 = arith.constant 0 : i32
    %c0_i32_1 = arith.constant 0 : i32
    return %c0_i32, %c0_i32_0 : i32, i32
  }
  func.func @transform_2(%arg0: i32) -> (i32, i32) {
    %c0_i32 = arith.constant 0 : i32
    %c0_i32_0 = arith.constant 0 : i32
    %c0_i32_1 = arith.constant 0 : i32
    return %c0_i32, %c0_i32_0 : i32, i32
  }
  func.func @transform_3(%arg0: i32) -> (i32, i32) {
    %c0_i32 = arith.constant 0 : i32
    %c0_i32_0 = arith.constant 0 : i32
    %c0_i32_1 = arith.constant 0 : i32
    return %c0_i32, %c0_i32_0 : i32, i32
  }
}

module attributes {stable_mosaic.version = 11 : i64} {
  func.func @_conv2_pool_kernel(%arg0: i32, %arg1: memref<128x576xbf16, #tpu.memory_space<vmem>>, %arg2: memref<576x128xbf16, #tpu.memory_space<vmem>>, %arg3: memref<1x128xf32, #tpu.memory_space<vmem>>, %arg4: memref<72x128xf32, #tpu.memory_space<vmem>>, %arg5: memref<72x128xf32, #tpu.memory_space<vmem>>) attributes {dimension_semantics = [#tpu.dimension_semantics<arbitrary>], iteration_bounds = array<i64: 1>, scalar_prefetch = 0 : i64, scratch_operands = 0 : i64, tpu.core_type = #tpu.core_type<tc>, window_params = [{pipeline_mode = #tpu.pipeline_mode<synchronous>, transform_indices = @transform_0, window_bounds = array<i64: 128, 576>}, {pipeline_mode = #tpu.pipeline_mode<synchronous>, transform_indices = @transform_1, window_bounds = array<i64: 576, 128>}, {pipeline_mode = #tpu.pipeline_mode<synchronous>, transform_indices = @transform_2, window_bounds = array<i64: 1, 128>}, {pipeline_mode = #tpu.pipeline_mode<synchronous>, transform_indices = @transform_3, window_bounds = array<i64: 72, 128>}, {pipeline_mode = #tpu.pipeline_mode<synchronous>, transform_indices = @transform_4, window_bounds = array<i64: 72, 128>}]} {
    %c0 = arith.constant 0 : index
    %c0_0 = arith.constant 0 : index
    %0 = vector.load %arg1[%c0, %c0_0] : memref<128x576xbf16, #tpu.memory_space<vmem>>, vector<128x576xbf16>
    %c0_1 = arith.constant 0 : index
    %c0_2 = arith.constant 0 : index
    %1 = vector.load %arg2[%c0_1, %c0_2] : memref<576x128xbf16, #tpu.memory_space<vmem>>, vector<576x128xbf16>
    %cst = arith.constant dense<0.000000e+00> : vector<128x128xf32>
    %2 = tpu.matmul %0, %1, %cst {dimension_numbers = #tpu.dot_dimension_numbers<[1], [0], [0], [1], [0, 0, 1, 1], [], []>} : vector<128x576xbf16>, vector<576x128xbf16>, vector<128x128xf32> -> vector<128x128xf32>
    %c0_3 = arith.constant 0 : index
    %c0_4 = arith.constant 0 : index
    %3 = vector.load %arg3[%c0_3, %c0_4] : memref<1x128xf32, #tpu.memory_space<vmem>>, vector<1x128xf32>
    %4 = vector.broadcast %3 : vector<1x128xf32> to vector<128x128xf32>
    %5 = arith.addf %2, %4 : vector<128x128xf32>
    %6 = vector.shape_cast %5 : vector<128x128xf32> to vector<2x64x128xf32>
    %cst_5 = arith.constant dense<0.000000e+00> : vector<2x128xf32>
    %7 = vector.multi_reduction <add>, %6, %cst_5 [1] : vector<2x64x128xf32> to vector<2x128xf32>
    %8 = vector.shape_cast %7 : vector<2x128xf32> to vector<2x1x128xf32>
    %cst_6 = arith.constant 6.400000e+01 : f32
    %9 = vector.broadcast %cst_6 : f32 to vector<2x1x128xf32>
    %10 = arith.divf %8, %9 : vector<2x1x128xf32>
    %11 = vector.broadcast %10 : vector<2x1x128xf32> to vector<2x64x128xf32>
    %12 = arith.subf %6, %11 : vector<2x64x128xf32>
    %13 = arith.mulf %12, %12 : vector<2x64x128xf32>
    %cst_7 = arith.constant dense<0.000000e+00> : vector<2x128xf32>
    %14 = vector.multi_reduction <add>, %13, %cst_7 [1] : vector<2x64x128xf32> to vector<2x128xf32>
    %15 = vector.shape_cast %14 : vector<2x128xf32> to vector<2x1x128xf32>
    %cst_8 = arith.constant 6.400000e+01 : f32
    %16 = vector.broadcast %cst_8 : f32 to vector<2x1x128xf32>
    %17 = arith.divf %15, %16 : vector<2x1x128xf32>
    %18 = vector.broadcast %10 : vector<2x1x128xf32> to vector<2x64x128xf32>
    %19 = arith.subf %6, %18 : vector<2x64x128xf32>
    %cst_9 = arith.constant 9.99999974E-6 : f32
    %20 = vector.broadcast %cst_9 : f32 to vector<2x1x128xf32>
    %21 = arith.addf %17, %20 : vector<2x1x128xf32>
    %22 = math.rsqrt %21 : vector<2x1x128xf32>
    %23 = vector.broadcast %22 : vector<2x1x128xf32> to vector<2x64x128xf32>
    %24 = arith.mulf %19, %23 : vector<2x64x128xf32>
    %cst_10 = arith.constant 0.000000e+00 : f32
    %25 = vector.broadcast %cst_10 : f32 to vector<2x64x128xf32>
    %26 = arith.maximumf %24, %25 : vector<2x64x128xf32>
    %27 = vector.shape_cast %26 : vector<2x64x128xf32> to vector<128x128xf32>
    %c0_11 = arith.constant 0 : index
    %c0_12 = arith.constant 0 : index
    %28 = vector.load %arg4[%c0_11, %c0_12] : memref<72x128xf32, #tpu.memory_space<vmem>>, vector<72x128xf32>
    %cst_13 = arith.constant dense<0.000000e+00> : vector<72x128xf32>
    %29 = tpu.matmul %28, %27, %cst_13 {dimension_numbers = #tpu.dot_dimension_numbers<[1], [0], [0], [1], [0, 0, 1, 1], [], []>} : vector<72x128xf32>, vector<128x128xf32>, vector<72x128xf32> -> vector<72x128xf32>
    %c0_14 = arith.constant 0 : index
    %c0_15 = arith.constant 0 : index
    %30 = vector.load %arg5[%c0_14, %c0_15] : memref<72x128xf32, #tpu.memory_space<vmem>>, vector<72x128xf32>
    tpu.vector_store %arg5[%c0_14, %c0_15], %29 {strides = array<i32>} : memref<72x128xf32, #tpu.memory_space<vmem>>, vector<72x128xf32>,
    return
  }
  func.func @transform_0(%arg0: i32) -> (i32, i32) {
    %c0_i32 = arith.constant 0 : i32
    %c0_i32_0 = arith.constant 0 : i32
    %c0_i32_1 = arith.constant 0 : i32
    return %c0_i32, %c0_i32_0 : i32, i32
  }
  func.func @transform_1(%arg0: i32) -> (i32, i32) {
    %c0_i32 = arith.constant 0 : i32
    %c0_i32_0 = arith.constant 0 : i32
    %c0_i32_1 = arith.constant 0 : i32
    return %c0_i32, %c0_i32_0 : i32, i32
  }
  func.func @transform_2(%arg0: i32) -> (i32, i32) {
    %c0_i32 = arith.constant 0 : i32
    %c0_i32_0 = arith.constant 0 : i32
    %c0_i32_1 = arith.constant 0 : i32
    return %c0_i32, %c0_i32_0 : i32, i32
  }
  func.func @transform_3(%arg0: i32) -> (i32, i32) {
    %c0_i32 = arith.constant 0 : i32
    %c0_i32_0 = arith.constant 0 : i32
    %c0_i32_1 = arith.constant 0 : i32
    return %c0_i32, %c0_i32_0 : i32, i32
  }
  func.func @transform_4(%arg0: i32) -> (i32, i32) {
    %c0_i32 = arith.constant 0 : i32
    %c0_i32_0 = arith.constant 0 : i32
    %c0_i32_1 = arith.constant 0 : i32
    return %c0_i32, %c0_i32_0 : i32, i32
  }
}

module attributes {stable_mosaic.version = 11 : i64} {
  func.func @_head_kernel(%arg0: i32, %arg1: memref<2x4608xbf16, #tpu.memory_space<vmem>>, %arg2: memref<4608x128xbf16, #tpu.memory_space<vmem>>, %arg3: memref<1x128xf32, #tpu.memory_space<vmem>>, %arg4: memref<128x128xbf16, #tpu.memory_space<vmem>>, %arg5: memref<1x128xf32, #tpu.memory_space<vmem>>, %arg6: memref<2x128xf32, #tpu.memory_space<vmem>>) attributes {dimension_semantics = [#tpu.dimension_semantics<arbitrary>], iteration_bounds = array<i64: 1>, scalar_prefetch = 0 : i64, scratch_operands = 0 : i64, tpu.core_type = #tpu.core_type<tc>, window_params = [{pipeline_mode = #tpu.pipeline_mode<synchronous>, transform_indices = @transform_0, window_bounds = array<i64: 2, 4608>}, {pipeline_mode = #tpu.pipeline_mode<synchronous>, transform_indices = @transform_1, window_bounds = array<i64: 4608, 128>}, {pipeline_mode = #tpu.pipeline_mode<synchronous>, transform_indices = @transform_2, window_bounds = array<i64: 1, 128>}, {pipeline_mode = #tpu.pipeline_mode<synchronous>, transform_indices = @transform_3, window_bounds = array<i64: 128, 128>}, {pipeline_mode = #tpu.pipeline_mode<synchronous>, transform_indices = @transform_4, window_bounds = array<i64: 1, 128>}, {pipeline_mode = #tpu.pipeline_mode<synchronous>, transform_indices = @transform_5, window_bounds = array<i64: 2, 128>}]} {
    %c0 = arith.constant 0 : index
    %c0_0 = arith.constant 0 : index
    %0 = vector.load %arg1[%c0, %c0_0] : memref<2x4608xbf16, #tpu.memory_space<vmem>>, vector<2x4608xbf16>
    %c0_1 = arith.constant 0 : index
    %c0_2 = arith.constant 0 : index
    %1 = vector.load %arg2[%c0_1, %c0_2] : memref<4608x128xbf16, #tpu.memory_space<vmem>>, vector<4608x128xbf16>
    %cst = arith.constant dense<0.000000e+00> : vector<2x128xf32>
    %2 = tpu.matmul %0, %1, %cst {dimension_numbers = #tpu.dot_dimension_numbers<[1], [0], [0], [1], [0, 0, 1, 1], [], []>} : vector<2x4608xbf16>, vector<4608x128xbf16>, vector<2x128xf32> -> vector<2x128xf32>
    %c0_3 = arith.constant 0 : index
    %c0_4 = arith.constant 0 : index
    %3 = vector.load %arg3[%c0_3, %c0_4] : memref<1x128xf32, #tpu.memory_space<vmem>>, vector<1x128xf32>
    %4 = vector.broadcast %3 : vector<1x128xf32> to vector<2x128xf32>
    %5 = arith.addf %2, %4 : vector<2x128xf32>
    %cst_5 = arith.constant 0.000000e+00 : f32
    %6 = vector.broadcast %cst_5 : f32 to vector<2x128xf32>
    %7 = arith.maximumf %5, %6 : vector<2x128xf32>
    %8 = arith.truncf %7 : vector<2x128xf32> to vector<2x128xbf16>
    %c0_6 = arith.constant 0 : index
    %c0_7 = arith.constant 0 : index
    %9 = vector.load %arg4[%c0_6, %c0_7] : memref<128x128xbf16, #tpu.memory_space<vmem>>, vector<128x128xbf16>
    %cst_8 = arith.constant dense<0.000000e+00> : vector<2x128xf32>
    %10 = tpu.matmul %8, %9, %cst_8 {dimension_numbers = #tpu.dot_dimension_numbers<[1], [0], [0], [1], [0, 0, 1, 1], [], []>} : vector<2x128xbf16>, vector<128x128xbf16>, vector<2x128xf32> -> vector<2x128xf32>
    %c0_9 = arith.constant 0 : index
    %c0_10 = arith.constant 0 : index
    %11 = vector.load %arg5[%c0_9, %c0_10] : memref<1x128xf32, #tpu.memory_space<vmem>>, vector<1x128xf32>
    %12 = vector.broadcast %11 : vector<1x128xf32> to vector<2x128xf32>
    %13 = arith.addf %10, %12 : vector<2x128xf32>
    %c0_11 = arith.constant 0 : index
    %c0_12 = arith.constant 0 : index
    %14 = vector.load %arg6[%c0_11, %c0_12] : memref<2x128xf32, #tpu.memory_space<vmem>>, vector<2x128xf32>
    tpu.vector_store %arg6[%c0_11, %c0_12], %13 {strides = array<i32>} : memref<2x128xf32, #tpu.memory_space<vmem>>, vector<2x128xf32>,
    return
  }
  func.func @transform_0(%arg0: i32) -> (i32, i32) {
    %c0_i32 = arith.constant 0 : i32
    %c0_i32_0 = arith.constant 0 : i32
    %c0_i32_1 = arith.constant 0 : i32
    return %c0_i32, %c0_i32_0 : i32, i32
  }
  func.func @transform_1(%arg0: i32) -> (i32, i32) {
    %c0_i32 = arith.constant 0 : i32
    %c0_i32_0 = arith.constant 0 : i32
    %c0_i32_1 = arith.constant 0 : i32
    return %c0_i32, %c0_i32_0 : i32, i32
  }
  func.func @transform_2(%arg0: i32) -> (i32, i32) {
    %c0_i32 = arith.constant 0 : i32
    %c0_i32_0 = arith.constant 0 : i32
    %c0_i32_1 = arith.constant 0 : i32
    return %c0_i32, %c0_i32_0 : i32, i32
  }
  func.func @transform_3(%arg0: i32) -> (i32, i32) {
    %c0_i32 = arith.constant 0 : i32
    %c0_i32_0 = arith.constant 0 : i32
    %c0_i32_1 = arith.constant 0 : i32
    return %c0_i32, %c0_i32_0 : i32, i32
  }
  func.func @transform_4(%arg0: i32) -> (i32, i32) {
    %c0_i32 = arith.constant 0 : i32
    %c0_i32_0 = arith.constant 0 : i32
    %c0_i32_1 = arith.constant 0 : i32
    return %c0_i32, %c0_i32_0 : i32, i32
  }
  func.func @transform_5(%arg0: i32) -> (i32, i32) {
    %c0_i32 = arith.constant 0 : i32
    %c0_i32_0 = arith.constant 0 : i32
    %c0_i32_1 = arith.constant 0 : i32
    return %c0_i32, %c0_i32_0 : i32, i32
  }
}

module attributes {stable_mosaic.version = 11 : i64} {
  func.func @_apply_kernel(%arg0: i32, %arg1: memref<2x128xf32, #tpu.memory_space<smem>>, %arg2: memref<1x18x8x128xf32, #tpu.memory_space<vmem>>, %arg3: memref<1x8x128xf32, #tpu.memory_space<vmem>>, %arg4: memref<1x3x8x128xf32, #tpu.memory_space<vmem>>, %arg5: memref<1x3x8x128xf32, #tpu.memory_space<vmem>>) attributes {dimension_semantics = [#tpu.dimension_semantics<parallel>], iteration_bounds = array<i64: 2>, scalar_prefetch = 0 : i64, scratch_operands = 0 : i64, tpu.core_type = #tpu.core_type<tc>, window_params = [{transform_indices = @transform_0, window_bounds = array<i64: 2, 128>}, {transform_indices = @transform_1, window_bounds = array<i64: 1, 18, 8, 128>}, {transform_indices = @transform_2, window_bounds = array<i64: 1, 8, 128>}, {transform_indices = @transform_3, window_bounds = array<i64: 1, 3, 8, 128>}, {transform_indices = @transform_4, window_bounds = array<i64: 1, 3, 8, 128>}]} {
    %cst = arith.constant 0.000000e+00 : f32
    %0 = vector.broadcast %cst : f32 to vector<8x128xf32>
    %cst_0 = arith.constant 0.000000e+00 : f32
    %1 = vector.broadcast %cst_0 : f32 to vector<8x128xf32>
    %c0 = arith.constant 0 : index
    %c0_1 = arith.constant 0 : index
    %c0_2 = arith.constant 0 : index
    %c0_3 = arith.constant 0 : index
    %2 = vector.load %arg2[%c0, %c0_1, %c0_2, %c0_3] : memref<1x18x8x128xf32, #tpu.memory_space<vmem>>, vector<1x1x8x128xf32>
    %3 = vector.shape_cast %2 : vector<1x1x8x128xf32> to vector<8x128xf32>
    %c0_4 = arith.constant 0 : index
    %c1 = arith.constant 1 : index
    %c0_5 = arith.constant 0 : index
    %c0_6 = arith.constant 0 : index
    %4 = vector.load %arg2[%c0_4, %c1, %c0_5, %c0_6] : memref<1x18x8x128xf32, #tpu.memory_space<vmem>>, vector<1x1x8x128xf32>
    %5 = vector.shape_cast %4 : vector<1x1x8x128xf32> to vector<8x128xf32>
    %6 = arith.mulf %3, %3 : vector<8x128xf32>
    %7 = arith.mulf %5, %5 : vector<8x128xf32>
    %8 = arith.mulf %3, %5 : vector<8x128xf32>
    %9 = arith.index_cast %arg0 : i32 to index
    %c0_7 = arith.constant 0 : index
    %10 = memref.load %arg1[%9, %c0_7] : memref<2x128xf32, #tpu.memory_space<smem>>
    %11 = vector.broadcast %10 : f32 to vector<8x128xf32>
    %12 = arith.mulf %11, %3 : vector<8x128xf32>
    %13 = arith.addf %0, %12 : vector<8x128xf32>
    %14 = arith.index_cast %arg0 : i32 to index
    %c1_8 = arith.constant 1 : index
    %15 = memref.load %arg1[%14, %c1_8] : memref<2x128xf32, #tpu.memory_space<smem>>
    %16 = vector.broadcast %15 : f32 to vector<8x128xf32>
    %17 = arith.mulf %16, %3 : vector<8x128xf32>
    %18 = arith.addf %1, %17 : vector<8x128xf32>
    %19 = arith.index_cast %arg0 : i32 to index
    %c2 = arith.constant 2 : index
    %20 = memref.load %arg1[%19, %c2] : memref<2x128xf32, #tpu.memory_space<smem>>
    %21 = vector.broadcast %20 : f32 to vector<8x128xf32>
    %22 = arith.mulf %21, %5 : vector<8x128xf32>
    %23 = arith.addf %13, %22 : vector<8x128xf32>
    %24 = arith.index_cast %arg0 : i32 to index
    %c3 = arith.constant 3 : index
    %25 = memref.load %arg1[%24, %c3] : memref<2x128xf32, #tpu.memory_space<smem>>
    %26 = vector.broadcast %25 : f32 to vector<8x128xf32>
    %27 = arith.mulf %26, %5 : vector<8x128xf32>
    %28 = arith.addf %18, %27 : vector<8x128xf32>
    %29 = arith.index_cast %arg0 : i32 to index
    %c4 = arith.constant 4 : index
    %30 = memref.load %arg1[%29, %c4] : memref<2x128xf32, #tpu.memory_space<smem>>
    %31 = vector.broadcast %30 : f32 to vector<8x128xf32>
    %32 = arith.mulf %31, %6 : vector<8x128xf32>
    %33 = arith.addf %23, %32 : vector<8x128xf32>
    %34 = arith.index_cast %arg0 : i32 to index
    %c5 = arith.constant 5 : index
    %35 = memref.load %arg1[%34, %c5] : memref<2x128xf32, #tpu.memory_space<smem>>
    %36 = vector.broadcast %35 : f32 to vector<8x128xf32>
    %37 = arith.mulf %36, %6 : vector<8x128xf32>
    %38 = arith.addf %28, %37 : vector<8x128xf32>
    %39 = arith.index_cast %arg0 : i32 to index
    %c6 = arith.constant 6 : index
    %40 = memref.load %arg1[%39, %c6] : memref<2x128xf32, #tpu.memory_space<smem>>
    %41 = vector.broadcast %40 : f32 to vector<8x128xf32>
    %42 = arith.mulf %41, %7 : vector<8x128xf32>
    %43 = arith.addf %33, %42 : vector<8x128xf32>
    %44 = arith.index_cast %arg0 : i32 to index
    %c7 = arith.constant 7 : index
    %45 = memref.load %arg1[%44, %c7] : memref<2x128xf32, #tpu.memory_space<smem>>
    %46 = vector.broadcast %45 : f32 to vector<8x128xf32>
    %47 = arith.mulf %46, %7 : vector<8x128xf32>
    %48 = arith.addf %38, %47 : vector<8x128xf32>
    %49 = arith.index_cast %arg0 : i32 to index
    %c8 = arith.constant 8 : index
    %50 = memref.load %arg1[%49, %c8] : memref<2x128xf32, #tpu.memory_space<smem>>
    %51 = vector.broadcast %50 : f32 to vector<8x128xf32>
    %52 = arith.mulf %51, %8 : vector<8x128xf32>
    %53 = arith.addf %43, %52 : vector<8x128xf32>
    %54 = arith.index_cast %arg0 : i32 to index
    %c9 = arith.constant 9 : index
    %55 = memref.load %arg1[%54, %c9] : memref<2x128xf32, #tpu.memory_space<smem>>
    %56 = vector.broadcast %55 : f32 to vector<8x128xf32>
    %57 = arith.mulf %56, %8 : vector<8x128xf32>
    %58 = arith.addf %48, %57 : vector<8x128xf32>
    %c0_9 = arith.constant 0 : index
    %c2_10 = arith.constant 2 : index
    %c0_11 = arith.constant 0 : index
    %c0_12 = arith.constant 0 : index
    %59 = vector.load %arg2[%c0_9, %c2_10, %c0_11, %c0_12] : memref<1x18x8x128xf32, #tpu.memory_space<vmem>>, vector<1x1x8x128xf32>
    %60 = vector.shape_cast %59 : vector<1x1x8x128xf32> to vector<8x128xf32>
    %c0_13 = arith.constant 0 : index
    %c3_14 = arith.constant 3 : index
    %c0_15 = arith.constant 0 : index
    %c0_16 = arith.constant 0 : index
    %61 = vector.load %arg2[%c0_13, %c3_14, %c0_15, %c0_16] : memref<1x18x8x128xf32, #tpu.memory_space<vmem>>, vector<1x1x8x128xf32>
    %62 = vector.shape_cast %61 : vector<1x1x8x128xf32> to vector<8x128xf32>
    %63 = arith.mulf %60, %60 : vector<8x128xf32>
    %64 = arith.mulf %62, %62 : vector<8x128xf32>
    %65 = arith.mulf %60, %62 : vector<8x128xf32>
    %66 = arith.index_cast %arg0 : i32 to index
    %c10 = arith.constant 10 : index
    %67 = memref.load %arg1[%66, %c10] : memref<2x128xf32, #tpu.memory_space<smem>>
    %68 = vector.broadcast %67 : f32 to vector<8x128xf32>
    %69 = arith.mulf %68, %60 : vector<8x128xf32>
    %70 = arith.addf %53, %69 : vector<8x128xf32>
    %71 = arith.index_cast %arg0 : i32 to index
    %c11 = arith.constant 11 : index
    %72 = memref.load %arg1[%71, %c11] : memref<2x128xf32, #tpu.memory_space<smem>>
    %73 = vector.broadcast %72 : f32 to vector<8x128xf32>
    %74 = arith.mulf %73, %60 : vector<8x128xf32>
    %75 = arith.addf %58, %74 : vector<8x128xf32>
    %76 = arith.index_cast %arg0 : i32 to index
    %c12 = arith.constant 12 : index
    %77 = memref.load %arg1[%76, %c12] : memref<2x128xf32, #tpu.memory_space<smem>>
    %78 = vector.broadcast %77 : f32 to vector<8x128xf32>
    %79 = arith.mulf %78, %62 : vector<8x128xf32>
    %80 = arith.addf %70, %79 : vector<8x128xf32>
    %81 = arith.index_cast %arg0 : i32 to index
    %c13 = arith.constant 13 : index
    %82 = memref.load %arg1[%81, %c13] : memref<2x128xf32, #tpu.memory_space<smem>>
    %83 = vector.broadcast %82 : f32 to vector<8x128xf32>
    %84 = arith.mulf %83, %62 : vector<8x128xf32>
    %85 = arith.addf %75, %84 : vector<8x128xf32>
    %86 = arith.index_cast %arg0 : i32 to index
    %c14 = arith.constant 14 : index
    %87 = memref.load %arg1[%86, %c14] : memref<2x128xf32, #tpu.memory_space<smem>>
    %88 = vector.broadcast %87 : f32 to vector<8x128xf32>
    %89 = arith.mulf %88, %63 : vector<8x128xf32>
    %90 = arith.addf %80, %89 : vector<8x128xf32>
    %91 = arith.index_cast %arg0 : i32 to index
    %c15 = arith.constant 15 : index
    %92 = memref.load %arg1[%91, %c15] : memref<2x128xf32, #tpu.memory_space<smem>>
    %93 = vector.broadcast %92 : f32 to vector<8x128xf32>
    %94 = arith.mulf %93, %63 : vector<8x128xf32>
    %95 = arith.addf %85, %94 : vector<8x128xf32>
    %96 = arith.index_cast %arg0 : i32 to index
    %c16 = arith.constant 16 : index
    %97 = memref.load %arg1[%96, %c16] : memref<2x128xf32, #tpu.memory_space<smem>>
    %98 = vector.broadcast %97 : f32 to vector<8x128xf32>
    %99 = arith.mulf %98, %64 : vector<8x128xf32>
    %100 = arith.addf %90, %99 : vector<8x128xf32>
    %101 = arith.index_cast %arg0 : i32 to index
    %c17 = arith.constant 17 : index
    %102 = memref.load %arg1[%101, %c17] : memref<2x128xf32, #tpu.memory_space<smem>>
    %103 = vector.broadcast %102 : f32 to vector<8x128xf32>
    %104 = arith.mulf %103, %64 : vector<8x128xf32>
    %105 = arith.addf %95, %104 : vector<8x128xf32>
    %106 = arith.index_cast %arg0 : i32 to index
    %c18 = arith.constant 18 : index
    %107 = memref.load %arg1[%106, %c18] : memref<2x128xf32, #tpu.memory_space<smem>>
    %108 = vector.broadcast %107 : f32 to vector<8x128xf32>
    %109 = arith.mulf %108, %65 : vector<8x128xf32>
    %110 = arith.addf %100, %109 : vector<8x128xf32>
    %111 = arith.index_cast %arg0 : i32 to index
    %c19 = arith.constant 19 : index
    %112 = memref.load %arg1[%111, %c19] : memref<2x128xf32, #tpu.memory_space<smem>>
    %113 = vector.broadcast %112 : f32 to vector<8x128xf32>
    %114 = arith.mulf %113, %65 : vector<8x128xf32>
    %115 = arith.addf %105, %114 : vector<8x128xf32>
    %c0_17 = arith.constant 0 : index
    %c4_18 = arith.constant 4 : index
    %c0_19 = arith.constant 0 : index
    %c0_20 = arith.constant 0 : index
    %116 = vector.load %arg2[%c0_17, %c4_18, %c0_19, %c0_20] : memref<1x18x8x128xf32, #tpu.memory_space<vmem>>, vector<1x1x8x128xf32>
    %117 = vector.shape_cast %116 : vector<1x1x8x128xf32> to vector<8x128xf32>
    %c0_21 = arith.constant 0 : index
    %c5_22 = arith.constant 5 : index
    %c0_23 = arith.constant 0 : index
    %c0_24 = arith.constant 0 : index
    %118 = vector.load %arg2[%c0_21, %c5_22, %c0_23, %c0_24] : memref<1x18x8x128xf32, #tpu.memory_space<vmem>>, vector<1x1x8x128xf32>
    %119 = vector.shape_cast %118 : vector<1x1x8x128xf32> to vector<8x128xf32>
    %120 = arith.mulf %117, %117 : vector<8x128xf32>
    %121 = arith.mulf %119, %119 : vector<8x128xf32>
    %122 = arith.mulf %117, %119 : vector<8x128xf32>
    %123 = arith.index_cast %arg0 : i32 to index
    %c20 = arith.constant 20 : index
    %124 = memref.load %arg1[%123, %c20] : memref<2x128xf32, #tpu.memory_space<smem>>
    %125 = vector.broadcast %124 : f32 to vector<8x128xf32>
    %126 = arith.mulf %125, %117 : vector<8x128xf32>
    %127 = arith.addf %110, %126 : vector<8x128xf32>
    %128 = arith.index_cast %arg0 : i32 to index
    %c21 = arith.constant 21 : index
    %129 = memref.load %arg1[%128, %c21] : memref<2x128xf32, #tpu.memory_space<smem>>
    %130 = vector.broadcast %129 : f32 to vector<8x128xf32>
    %131 = arith.mulf %130, %117 : vector<8x128xf32>
    %132 = arith.addf %115, %131 : vector<8x128xf32>
    %133 = arith.index_cast %arg0 : i32 to index
    %c22 = arith.constant 22 : index
    %134 = memref.load %arg1[%133, %c22] : memref<2x128xf32, #tpu.memory_space<smem>>
    %135 = vector.broadcast %134 : f32 to vector<8x128xf32>
    %136 = arith.mulf %135, %119 : vector<8x128xf32>
    %137 = arith.addf %127, %136 : vector<8x128xf32>
    %138 = arith.index_cast %arg0 : i32 to index
    %c23 = arith.constant 23 : index
    %139 = memref.load %arg1[%138, %c23] : memref<2x128xf32, #tpu.memory_space<smem>>
    %140 = vector.broadcast %139 : f32 to vector<8x128xf32>
    %141 = arith.mulf %140, %119 : vector<8x128xf32>
    %142 = arith.addf %132, %141 : vector<8x128xf32>
    %143 = arith.index_cast %arg0 : i32 to index
    %c24 = arith.constant 24 : index
    %144 = memref.load %arg1[%143, %c24] : memref<2x128xf32, #tpu.memory_space<smem>>
    %145 = vector.broadcast %144 : f32 to vector<8x128xf32>
    %146 = arith.mulf %145, %120 : vector<8x128xf32>
    %147 = arith.addf %137, %146 : vector<8x128xf32>
    %148 = arith.index_cast %arg0 : i32 to index
    %c25 = arith.constant 25 : index
    %149 = memref.load %arg1[%148, %c25] : memref<2x128xf32, #tpu.memory_space<smem>>
    %150 = vector.broadcast %149 : f32 to vector<8x128xf32>
    %151 = arith.mulf %150, %120 : vector<8x128xf32>
    %152 = arith.addf %142, %151 : vector<8x128xf32>
    %153 = arith.index_cast %arg0 : i32 to index
    %c26 = arith.constant 26 : index
    %154 = memref.load %arg1[%153, %c26] : memref<2x128xf32, #tpu.memory_space<smem>>
    %155 = vector.broadcast %154 : f32 to vector<8x128xf32>
    %156 = arith.mulf %155, %121 : vector<8x128xf32>
    %157 = arith.addf %147, %156 : vector<8x128xf32>
    %158 = arith.index_cast %arg0 : i32 to index
    %c27 = arith.constant 27 : index
    %159 = memref.load %arg1[%158, %c27] : memref<2x128xf32, #tpu.memory_space<smem>>
    %160 = vector.broadcast %159 : f32 to vector<8x128xf32>
    %161 = arith.mulf %160, %121 : vector<8x128xf32>
    %162 = arith.addf %152, %161 : vector<8x128xf32>
    %163 = arith.index_cast %arg0 : i32 to index
    %c28 = arith.constant 28 : index
    %164 = memref.load %arg1[%163, %c28] : memref<2x128xf32, #tpu.memory_space<smem>>
    %165 = vector.broadcast %164 : f32 to vector<8x128xf32>
    %166 = arith.mulf %165, %122 : vector<8x128xf32>
    %167 = arith.addf %157, %166 : vector<8x128xf32>
    %168 = arith.index_cast %arg0 : i32 to index
    %c29 = arith.constant 29 : index
    %169 = memref.load %arg1[%168, %c29] : memref<2x128xf32, #tpu.memory_space<smem>>
    %170 = vector.broadcast %169 : f32 to vector<8x128xf32>
    %171 = arith.mulf %170, %122 : vector<8x128xf32>
    %172 = arith.addf %162, %171 : vector<8x128xf32>
    %c0_25 = arith.constant 0 : index
    %c6_26 = arith.constant 6 : index
    %c0_27 = arith.constant 0 : index
    %c0_28 = arith.constant 0 : index
    %173 = vector.load %arg2[%c0_25, %c6_26, %c0_27, %c0_28] : memref<1x18x8x128xf32, #tpu.memory_space<vmem>>, vector<1x1x8x128xf32>
    %174 = vector.shape_cast %173 : vector<1x1x8x128xf32> to vector<8x128xf32>
    %c0_29 = arith.constant 0 : index
    %c7_30 = arith.constant 7 : index
    %c0_31 = arith.constant 0 : index
    %c0_32 = arith.constant 0 : index
    %175 = vector.load %arg2[%c0_29, %c7_30, %c0_31, %c0_32] : memref<1x18x8x128xf32, #tpu.memory_space<vmem>>, vector<1x1x8x128xf32>
    %176 = vector.shape_cast %175 : vector<1x1x8x128xf32> to vector<8x128xf32>
    %177 = arith.mulf %174, %174 : vector<8x128xf32>
    %178 = arith.mulf %176, %176 : vector<8x128xf32>
    %179 = arith.mulf %174, %176 : vector<8x128xf32>
    %180 = arith.index_cast %arg0 : i32 to index
    %c30 = arith.constant 30 : index
    %181 = memref.load %arg1[%180, %c30] : memref<2x128xf32, #tpu.memory_space<smem>>
    %182 = vector.broadcast %181 : f32 to vector<8x128xf32>
    %183 = arith.mulf %182, %174 : vector<8x128xf32>
    %184 = arith.addf %167, %183 : vector<8x128xf32>
    %185 = arith.index_cast %arg0 : i32 to index
    %c31 = arith.constant 31 : index
    %186 = memref.load %arg1[%185, %c31] : memref<2x128xf32, #tpu.memory_space<smem>>
    %187 = vector.broadcast %186 : f32 to vector<8x128xf32>
    %188 = arith.mulf %187, %174 : vector<8x128xf32>
    %189 = arith.addf %172, %188 : vector<8x128xf32>
    %190 = arith.index_cast %arg0 : i32 to index
    %c32 = arith.constant 32 : index
    %191 = memref.load %arg1[%190, %c32] : memref<2x128xf32, #tpu.memory_space<smem>>
    %192 = vector.broadcast %191 : f32 to vector<8x128xf32>
    %193 = arith.mulf %192, %176 : vector<8x128xf32>
    %194 = arith.addf %184, %193 : vector<8x128xf32>
    %195 = arith.index_cast %arg0 : i32 to index
    %c33 = arith.constant 33 : index
    %196 = memref.load %arg1[%195, %c33] : memref<2x128xf32, #tpu.memory_space<smem>>
    %197 = vector.broadcast %196 : f32 to vector<8x128xf32>
    %198 = arith.mulf %197, %176 : vector<8x128xf32>
    %199 = arith.addf %189, %198 : vector<8x128xf32>
    %200 = arith.index_cast %arg0 : i32 to index
    %c34 = arith.constant 34 : index
    %201 = memref.load %arg1[%200, %c34] : memref<2x128xf32, #tpu.memory_space<smem>>
    %202 = vector.broadcast %201 : f32 to vector<8x128xf32>
    %203 = arith.mulf %202, %177 : vector<8x128xf32>
    %204 = arith.addf %194, %203 : vector<8x128xf32>
    %205 = arith.index_cast %arg0 : i32 to index
    %c35 = arith.constant 35 : index
    %206 = memref.load %arg1[%205, %c35] : memref<2x128xf32, #tpu.memory_space<smem>>
    %207 = vector.broadcast %206 : f32 to vector<8x128xf32>
    %208 = arith.mulf %207, %177 : vector<8x128xf32>
    %209 = arith.addf %199, %208 : vector<8x128xf32>
    %210 = arith.index_cast %arg0 : i32 to index
    %c36 = arith.constant 36 : index
    %211 = memref.load %arg1[%210, %c36] : memref<2x128xf32, #tpu.memory_space<smem>>
    %212 = vector.broadcast %211 : f32 to vector<8x128xf32>
    %213 = arith.mulf %212, %178 : vector<8x128xf32>
    %214 = arith.addf %204, %213 : vector<8x128xf32>
    %215 = arith.index_cast %arg0 : i32 to index
    %c37 = arith.constant 37 : index
    %216 = memref.load %arg1[%215, %c37] : memref<2x128xf32, #tpu.memory_space<smem>>
    %217 = vector.broadcast %216 : f32 to vector<8x128xf32>
    %218 = arith.mulf %217, %178 : vector<8x128xf32>
    %219 = arith.addf %209, %218 : vector<8x128xf32>
    %220 = arith.index_cast %arg0 : i32 to index
    %c38 = arith.constant 38 : index
    %221 = memref.load %arg1[%220, %c38] : memref<2x128xf32, #tpu.memory_space<smem>>
    %222 = vector.broadcast %221 : f32 to vector<8x128xf32>
    %223 = arith.mulf %222, %179 : vector<8x128xf32>
    %224 = arith.addf %214, %223 : vector<8x128xf32>
    %225 = arith.index_cast %arg0 : i32 to index
    %c39 = arith.constant 39 : index
    %226 = memref.load %arg1[%225, %c39] : memref<2x128xf32, #tpu.memory_space<smem>>
    %227 = vector.broadcast %226 : f32 to vector<8x128xf32>
    %228 = arith.mulf %227, %179 : vector<8x128xf32>
    %229 = arith.addf %219, %228 : vector<8x128xf32>
    %c0_33 = arith.constant 0 : index
    %c8_34 = arith.constant 8 : index
    %c0_35 = arith.constant 0 : index
    %c0_36 = arith.constant 0 : index
    %230 = vector.load %arg2[%c0_33, %c8_34, %c0_35, %c0_36] : memref<1x18x8x128xf32, #tpu.memory_space<vmem>>, vector<1x1x8x128xf32>
    %231 = vector.shape_cast %230 : vector<1x1x8x128xf32> to vector<8x128xf32>
    %c0_37 = arith.constant 0 : index
    %c9_38 = arith.constant 9 : index
    %c0_39 = arith.constant 0 : index
    %c0_40 = arith.constant 0 : index
    %232 = vector.load %arg2[%c0_37, %c9_38, %c0_39, %c0_40] : memref<1x18x8x128xf32, #tpu.memory_space<vmem>>, vector<1x1x8x128xf32>
    %233 = vector.shape_cast %232 : vector<1x1x8x128xf32> to vector<8x128xf32>
    %234 = arith.mulf %231, %231 : vector<8x128xf32>
    %235 = arith.mulf %233, %233 : vector<8x128xf32>
    %236 = arith.mulf %231, %233 : vector<8x128xf32>
    %237 = arith.index_cast %arg0 : i32 to index
    %c40 = arith.constant 40 : index
    %238 = memref.load %arg1[%237, %c40] : memref<2x128xf32, #tpu.memory_space<smem>>
    %239 = vector.broadcast %238 : f32 to vector<8x128xf32>
    %240 = arith.mulf %239, %231 : vector<8x128xf32>
    %241 = arith.addf %224, %240 : vector<8x128xf32>
    %242 = arith.index_cast %arg0 : i32 to index
    %c41 = arith.constant 41 : index
    %243 = memref.load %arg1[%242, %c41] : memref<2x128xf32, #tpu.memory_space<smem>>
    %244 = vector.broadcast %243 : f32 to vector<8x128xf32>
    %245 = arith.mulf %244, %231 : vector<8x128xf32>
    %246 = arith.addf %229, %245 : vector<8x128xf32>
    %247 = arith.index_cast %arg0 : i32 to index
    %c42 = arith.constant 42 : index
    %248 = memref.load %arg1[%247, %c42] : memref<2x128xf32, #tpu.memory_space<smem>>
    %249 = vector.broadcast %248 : f32 to vector<8x128xf32>
    %250 = arith.mulf %249, %233 : vector<8x128xf32>
    %251 = arith.addf %241, %250 : vector<8x128xf32>
    %252 = arith.index_cast %arg0 : i32 to index
    %c43 = arith.constant 43 : index
    %253 = memref.load %arg1[%252, %c43] : memref<2x128xf32, #tpu.memory_space<smem>>
    %254 = vector.broadcast %253 : f32 to vector<8x128xf32>
    %255 = arith.mulf %254, %233 : vector<8x128xf32>
    %256 = arith.addf %246, %255 : vector<8x128xf32>
    %257 = arith.index_cast %arg0 : i32 to index
    %c44 = arith.constant 44 : index
    %258 = memref.load %arg1[%257, %c44] : memref<2x128xf32, #tpu.memory_space<smem>>
    %259 = vector.broadcast %258 : f32 to vector<8x128xf32>
    %260 = arith.mulf %259, %234 : vector<8x128xf32>
    %261 = arith.addf %251, %260 : vector<8x128xf32>
    %262 = arith.index_cast %arg0 : i32 to index
    %c45 = arith.constant 45 : index
    %263 = memref.load %arg1[%262, %c45] : memref<2x128xf32, #tpu.memory_space<smem>>
    %264 = vector.broadcast %263 : f32 to vector<8x128xf32>
    %265 = arith.mulf %264, %234 : vector<8x128xf32>
    %266 = arith.addf %256, %265 : vector<8x128xf32>
    %267 = arith.index_cast %arg0 : i32 to index
    %c46 = arith.constant 46 : index
    %268 = memref.load %arg1[%267, %c46] : memref<2x128xf32, #tpu.memory_space<smem>>
    %269 = vector.broadcast %268 : f32 to vector<8x128xf32>
    %270 = arith.mulf %269, %235 : vector<8x128xf32>
    %271 = arith.addf %261, %270 : vector<8x128xf32>
    %272 = arith.index_cast %arg0 : i32 to index
    %c47 = arith.constant 47 : index
    %273 = memref.load %arg1[%272, %c47] : memref<2x128xf32, #tpu.memory_space<smem>>
    %274 = vector.broadcast %273 : f32 to vector<8x128xf32>
    %275 = arith.mulf %274, %235 : vector<8x128xf32>
    %276 = arith.addf %266, %275 : vector<8x128xf32>
    %277 = arith.index_cast %arg0 : i32 to index
    %c48 = arith.constant 48 : index
    %278 = memref.load %arg1[%277, %c48] : memref<2x128xf32, #tpu.memory_space<smem>>
    %279 = vector.broadcast %278 : f32 to vector<8x128xf32>
    %280 = arith.mulf %279, %236 : vector<8x128xf32>
    %281 = arith.addf %271, %280 : vector<8x128xf32>
    %282 = arith.index_cast %arg0 : i32 to index
    %c49 = arith.constant 49 : index
    %283 = memref.load %arg1[%282, %c49] : memref<2x128xf32, #tpu.memory_space<smem>>
    %284 = vector.broadcast %283 : f32 to vector<8x128xf32>
    %285 = arith.mulf %284, %236 : vector<8x128xf32>
    %286 = arith.addf %276, %285 : vector<8x128xf32>
    %c0_41 = arith.constant 0 : index
    %c10_42 = arith.constant 10 : index
    %c0_43 = arith.constant 0 : index
    %c0_44 = arith.constant 0 : index
    %287 = vector.load %arg2[%c0_41, %c10_42, %c0_43, %c0_44] : memref<1x18x8x128xf32, #tpu.memory_space<vmem>>, vector<1x1x8x128xf32>
    %288 = vector.shape_cast %287 : vector<1x1x8x128xf32> to vector<8x128xf32>
    %c0_45 = arith.constant 0 : index
    %c11_46 = arith.constant 11 : index
    %c0_47 = arith.constant 0 : index
    %c0_48 = arith.constant 0 : index
    %289 = vector.load %arg2[%c0_45, %c11_46, %c0_47, %c0_48] : memref<1x18x8x128xf32, #tpu.memory_space<vmem>>, vector<1x1x8x128xf32>
    %290 = vector.shape_cast %289 : vector<1x1x8x128xf32> to vector<8x128xf32>
    %291 = arith.mulf %288, %288 : vector<8x128xf32>
    %292 = arith.mulf %290, %290 : vector<8x128xf32>
    %293 = arith.mulf %288, %290 : vector<8x128xf32>
    %294 = arith.index_cast %arg0 : i32 to index
    %c50 = arith.constant 50 : index
    %295 = memref.load %arg1[%294, %c50] : memref<2x128xf32, #tpu.memory_space<smem>>
    %296 = vector.broadcast %295 : f32 to vector<8x128xf32>
    %297 = arith.mulf %296, %288 : vector<8x128xf32>
    %298 = arith.addf %281, %297 : vector<8x128xf32>
    %299 = arith.index_cast %arg0 : i32 to index
    %c51 = arith.constant 51 : index
    %300 = memref.load %arg1[%299, %c51] : memref<2x128xf32, #tpu.memory_space<smem>>
    %301 = vector.broadcast %300 : f32 to vector<8x128xf32>
    %302 = arith.mulf %301, %288 : vector<8x128xf32>
    %303 = arith.addf %286, %302 : vector<8x128xf32>
    %304 = arith.index_cast %arg0 : i32 to index
    %c52 = arith.constant 52 : index
    %305 = memref.load %arg1[%304, %c52] : memref<2x128xf32, #tpu.memory_space<smem>>
    %306 = vector.broadcast %305 : f32 to vector<8x128xf32>
    %307 = arith.mulf %306, %290 : vector<8x128xf32>
    %308 = arith.addf %298, %307 : vector<8x128xf32>
    %309 = arith.index_cast %arg0 : i32 to index
    %c53 = arith.constant 53 : index
    %310 = memref.load %arg1[%309, %c53] : memref<2x128xf32, #tpu.memory_space<smem>>
    %311 = vector.broadcast %310 : f32 to vector<8x128xf32>
    %312 = arith.mulf %311, %290 : vector<8x128xf32>
    %313 = arith.addf %303, %312 : vector<8x128xf32>
    %314 = arith.index_cast %arg0 : i32 to index
    %c54 = arith.constant 54 : index
    %315 = memref.load %arg1[%314, %c54] : memref<2x128xf32, #tpu.memory_space<smem>>
    %316 = vector.broadcast %315 : f32 to vector<8x128xf32>
    %317 = arith.mulf %316, %291 : vector<8x128xf32>
    %318 = arith.addf %308, %317 : vector<8x128xf32>
    %319 = arith.index_cast %arg0 : i32 to index
    %c55 = arith.constant 55 : index
    %320 = memref.load %arg1[%319, %c55] : memref<2x128xf32, #tpu.memory_space<smem>>
    %321 = vector.broadcast %320 : f32 to vector<8x128xf32>
    %322 = arith.mulf %321, %291 : vector<8x128xf32>
    %323 = arith.addf %313, %322 : vector<8x128xf32>
    %324 = arith.index_cast %arg0 : i32 to index
    %c56 = arith.constant 56 : index
    %325 = memref.load %arg1[%324, %c56] : memref<2x128xf32, #tpu.memory_space<smem>>
    %326 = vector.broadcast %325 : f32 to vector<8x128xf32>
    %327 = arith.mulf %326, %292 : vector<8x128xf32>
    %328 = arith.addf %318, %327 : vector<8x128xf32>
    %329 = arith.index_cast %arg0 : i32 to index
    %c57 = arith.constant 57 : index
    %330 = memref.load %arg1[%329, %c57] : memref<2x128xf32, #tpu.memory_space<smem>>
    %331 = vector.broadcast %330 : f32 to vector<8x128xf32>
    %332 = arith.mulf %331, %292 : vector<8x128xf32>
    %333 = arith.addf %323, %332 : vector<8x128xf32>
    %334 = arith.index_cast %arg0 : i32 to index
    %c58 = arith.constant 58 : index
    %335 = memref.load %arg1[%334, %c58] : memref<2x128xf32, #tpu.memory_space<smem>>
    %336 = vector.broadcast %335 : f32 to vector<8x128xf32>
    %337 = arith.mulf %336, %293 : vector<8x128xf32>
    %338 = arith.addf %328, %337 : vector<8x128xf32>
    %339 = arith.index_cast %arg0 : i32 to index
    %c59 = arith.constant 59 : index
    %340 = memref.load %arg1[%339, %c59] : memref<2x128xf32, #tpu.memory_space<smem>>
    %341 = vector.broadcast %340 : f32 to vector<8x128xf32>
    %342 = arith.mulf %341, %293 : vector<8x128xf32>
    %343 = arith.addf %333, %342 : vector<8x128xf32>
    %c0_49 = arith.constant 0 : index
    %c12_50 = arith.constant 12 : index
    %c0_51 = arith.constant 0 : index
    %c0_52 = arith.constant 0 : index
    %344 = vector.load %arg2[%c0_49, %c12_50, %c0_51, %c0_52] : memref<1x18x8x128xf32, #tpu.memory_space<vmem>>, vector<1x1x8x128xf32>
    %345 = vector.shape_cast %344 : vector<1x1x8x128xf32> to vector<8x128xf32>
    %c0_53 = arith.constant 0 : index
    %c13_54 = arith.constant 13 : index
    %c0_55 = arith.constant 0 : index
    %c0_56 = arith.constant 0 : index
    %346 = vector.load %arg2[%c0_53, %c13_54, %c0_55, %c0_56] : memref<1x18x8x128xf32, #tpu.memory_space<vmem>>, vector<1x1x8x128xf32>
    %347 = vector.shape_cast %346 : vector<1x1x8x128xf32> to vector<8x128xf32>
    %348 = arith.mulf %345, %345 : vector<8x128xf32>
    %349 = arith.mulf %347, %347 : vector<8x128xf32>
    %350 = arith.mulf %345, %347 : vector<8x128xf32>
    %351 = arith.index_cast %arg0 : i32 to index
    %c60 = arith.constant 60 : index
    %352 = memref.load %arg1[%351, %c60] : memref<2x128xf32, #tpu.memory_space<smem>>
    %353 = vector.broadcast %352 : f32 to vector<8x128xf32>
    %354 = arith.mulf %353, %345 : vector<8x128xf32>
    %355 = arith.addf %338, %354 : vector<8x128xf32>
    %356 = arith.index_cast %arg0 : i32 to index
    %c61 = arith.constant 61 : index
    %357 = memref.load %arg1[%356, %c61] : memref<2x128xf32, #tpu.memory_space<smem>>
    %358 = vector.broadcast %357 : f32 to vector<8x128xf32>
    %359 = arith.mulf %358, %345 : vector<8x128xf32>
    %360 = arith.addf %343, %359 : vector<8x128xf32>
    %361 = arith.index_cast %arg0 : i32 to index
    %c62 = arith.constant 62 : index
    %362 = memref.load %arg1[%361, %c62] : memref<2x128xf32, #tpu.memory_space<smem>>
    %363 = vector.broadcast %362 : f32 to vector<8x128xf32>
    %364 = arith.mulf %363, %347 : vector<8x128xf32>
    %365 = arith.addf %355, %364 : vector<8x128xf32>
    %366 = arith.index_cast %arg0 : i32 to index
    %c63 = arith.constant 63 : index
    %367 = memref.load %arg1[%366, %c63] : memref<2x128xf32, #tpu.memory_space<smem>>
    %368 = vector.broadcast %367 : f32 to vector<8x128xf32>
    %369 = arith.mulf %368, %347 : vector<8x128xf32>
    %370 = arith.addf %360, %369 : vector<8x128xf32>
    %371 = arith.index_cast %arg0 : i32 to index
    %c64 = arith.constant 64 : index
    %372 = memref.load %arg1[%371, %c64] : memref<2x128xf32, #tpu.memory_space<smem>>
    %373 = vector.broadcast %372 : f32 to vector<8x128xf32>
    %374 = arith.mulf %373, %348 : vector<8x128xf32>
    %375 = arith.addf %365, %374 : vector<8x128xf32>
    %376 = arith.index_cast %arg0 : i32 to index
    %c65 = arith.constant 65 : index
    %377 = memref.load %arg1[%376, %c65] : memref<2x128xf32, #tpu.memory_space<smem>>
    %378 = vector.broadcast %377 : f32 to vector<8x128xf32>
    %379 = arith.mulf %378, %348 : vector<8x128xf32>
    %380 = arith.addf %370, %379 : vector<8x128xf32>
    %381 = arith.index_cast %arg0 : i32 to index
    %c66 = arith.constant 66 : index
    %382 = memref.load %arg1[%381, %c66] : memref<2x128xf32, #tpu.memory_space<smem>>
    %383 = vector.broadcast %382 : f32 to vector<8x128xf32>
    %384 = arith.mulf %383, %349 : vector<8x128xf32>
    %385 = arith.addf %375, %384 : vector<8x128xf32>
    %386 = arith.index_cast %arg0 : i32 to index
    %c67 = arith.constant 67 : index
    %387 = memref.load %arg1[%386, %c67] : memref<2x128xf32, #tpu.memory_space<smem>>
    %388 = vector.broadcast %387 : f32 to vector<8x128xf32>
    %389 = arith.mulf %388, %349 : vector<8x128xf32>
    %390 = arith.addf %380, %389 : vector<8x128xf32>
    %391 = arith.index_cast %arg0 : i32 to index
    %c68 = arith.constant 68 : index
    %392 = memref.load %arg1[%391, %c68] : memref<2x128xf32, #tpu.memory_space<smem>>
    %393 = vector.broadcast %392 : f32 to vector<8x128xf32>
    %394 = arith.mulf %393, %350 : vector<8x128xf32>
    %395 = arith.addf %385, %394 : vector<8x128xf32>
    %396 = arith.index_cast %arg0 : i32 to index
    %c69 = arith.constant 69 : index
    %397 = memref.load %arg1[%396, %c69] : memref<2x128xf32, #tpu.memory_space<smem>>
    %398 = vector.broadcast %397 : f32 to vector<8x128xf32>
    %399 = arith.mulf %398, %350 : vector<8x128xf32>
    %400 = arith.addf %390, %399 : vector<8x128xf32>
    %c0_57 = arith.constant 0 : index
    %c14_58 = arith.constant 14 : index
    %c0_59 = arith.constant 0 : index
    %c0_60 = arith.constant 0 : index
    %401 = vector.load %arg2[%c0_57, %c14_58, %c0_59, %c0_60] : memref<1x18x8x128xf32, #tpu.memory_space<vmem>>, vector<1x1x8x128xf32>
    %402 = vector.shape_cast %401 : vector<1x1x8x128xf32> to vector<8x128xf32>
    %c0_61 = arith.constant 0 : index
    %c15_62 = arith.constant 15 : index
    %c0_63 = arith.constant 0 : index
    %c0_64 = arith.constant 0 : index
    %403 = vector.load %arg2[%c0_61, %c15_62, %c0_63, %c0_64] : memref<1x18x8x128xf32, #tpu.memory_space<vmem>>, vector<1x1x8x128xf32>
    %404 = vector.shape_cast %403 : vector<1x1x8x128xf32> to vector<8x128xf32>
    %405 = arith.mulf %402, %402 : vector<8x128xf32>
    %406 = arith.mulf %404, %404 : vector<8x128xf32>
    %407 = arith.mulf %402, %404 : vector<8x128xf32>
    %408 = arith.index_cast %arg0 : i32 to index
    %c70 = arith.constant 70 : index
    %409 = memref.load %arg1[%408, %c70] : memref<2x128xf32, #tpu.memory_space<smem>>
    %410 = vector.broadcast %409 : f32 to vector<8x128xf32>
    %411 = arith.mulf %410, %402 : vector<8x128xf32>
    %412 = arith.addf %395, %411 : vector<8x128xf32>
    %413 = arith.index_cast %arg0 : i32 to index
    %c71 = arith.constant 71 : index
    %414 = memref.load %arg1[%413, %c71] : memref<2x128xf32, #tpu.memory_space<smem>>
    %415 = vector.broadcast %414 : f32 to vector<8x128xf32>
    %416 = arith.mulf %415, %402 : vector<8x128xf32>
    %417 = arith.addf %400, %416 : vector<8x128xf32>
    %418 = arith.index_cast %arg0 : i32 to index
    %c72 = arith.constant 72 : index
    %419 = memref.load %arg1[%418, %c72] : memref<2x128xf32, #tpu.memory_space<smem>>
    %420 = vector.broadcast %419 : f32 to vector<8x128xf32>
    %421 = arith.mulf %420, %404 : vector<8x128xf32>
    %422 = arith.addf %412, %421 : vector<8x128xf32>
    %423 = arith.index_cast %arg0 : i32 to index
    %c73 = arith.constant 73 : index
    %424 = memref.load %arg1[%423, %c73] : memref<2x128xf32, #tpu.memory_space<smem>>
    %425 = vector.broadcast %424 : f32 to vector<8x128xf32>
    %426 = arith.mulf %425, %404 : vector<8x128xf32>
    %427 = arith.addf %417, %426 : vector<8x128xf32>
    %428 = arith.index_cast %arg0 : i32 to index
    %c74 = arith.constant 74 : index
    %429 = memref.load %arg1[%428, %c74] : memref<2x128xf32, #tpu.memory_space<smem>>
    %430 = vector.broadcast %429 : f32 to vector<8x128xf32>
    %431 = arith.mulf %430, %405 : vector<8x128xf32>
    %432 = arith.addf %422, %431 : vector<8x128xf32>
    %433 = arith.index_cast %arg0 : i32 to index
    %c75 = arith.constant 75 : index
    %434 = memref.load %arg1[%433, %c75] : memref<2x128xf32, #tpu.memory_space<smem>>
    %435 = vector.broadcast %434 : f32 to vector<8x128xf32>
    %436 = arith.mulf %435, %405 : vector<8x128xf32>
    %437 = arith.addf %427, %436 : vector<8x128xf32>
    %438 = arith.index_cast %arg0 : i32 to index
    %c76 = arith.constant 76 : index
    %439 = memref.load %arg1[%438, %c76] : memref<2x128xf32, #tpu.memory_space<smem>>
    %440 = vector.broadcast %439 : f32 to vector<8x128xf32>
    %441 = arith.mulf %440, %406 : vector<8x128xf32>
    %442 = arith.addf %432, %441 : vector<8x128xf32>
    %443 = arith.index_cast %arg0 : i32 to index
    %c77 = arith.constant 77 : index
    %444 = memref.load %arg1[%443, %c77] : memref<2x128xf32, #tpu.memory_space<smem>>
    %445 = vector.broadcast %444 : f32 to vector<8x128xf32>
    %446 = arith.mulf %445, %406 : vector<8x128xf32>
    %447 = arith.addf %437, %446 : vector<8x128xf32>
    %448 = arith.index_cast %arg0 : i32 to index
    %c78 = arith.constant 78 : index
    %449 = memref.load %arg1[%448, %c78] : memref<2x128xf32, #tpu.memory_space<smem>>
    %450 = vector.broadcast %449 : f32 to vector<8x128xf32>
    %451 = arith.mulf %450, %407 : vector<8x128xf32>
    %452 = arith.addf %442, %451 : vector<8x128xf32>
    %453 = arith.index_cast %arg0 : i32 to index
    %c79 = arith.constant 79 : index
    %454 = memref.load %arg1[%453, %c79] : memref<2x128xf32, #tpu.memory_space<smem>>
    %455 = vector.broadcast %454 : f32 to vector<8x128xf32>
    %456 = arith.mulf %455, %407 : vector<8x128xf32>
    %457 = arith.addf %447, %456 : vector<8x128xf32>
    %c0_65 = arith.constant 0 : index
    %c16_66 = arith.constant 16 : index
    %c0_67 = arith.constant 0 : index
    %c0_68 = arith.constant 0 : index
    %458 = vector.load %arg2[%c0_65, %c16_66, %c0_67, %c0_68] : memref<1x18x8x128xf32, #tpu.memory_space<vmem>>, vector<1x1x8x128xf32>
    %459 = vector.shape_cast %458 : vector<1x1x8x128xf32> to vector<8x128xf32>
    %c0_69 = arith.constant 0 : index
    %c17_70 = arith.constant 17 : index
    %c0_71 = arith.constant 0 : index
    %c0_72 = arith.constant 0 : index
    %460 = vector.load %arg2[%c0_69, %c17_70, %c0_71, %c0_72] : memref<1x18x8x128xf32, #tpu.memory_space<vmem>>, vector<1x1x8x128xf32>
    %461 = vector.shape_cast %460 : vector<1x1x8x128xf32> to vector<8x128xf32>
    %462 = arith.mulf %459, %459 : vector<8x128xf32>
    %463 = arith.mulf %461, %461 : vector<8x128xf32>
    %464 = arith.mulf %459, %461 : vector<8x128xf32>
    %465 = arith.index_cast %arg0 : i32 to index
    %c80 = arith.constant 80 : index
    %466 = memref.load %arg1[%465, %c80] : memref<2x128xf32, #tpu.memory_space<smem>>
    %467 = vector.broadcast %466 : f32 to vector<8x128xf32>
    %468 = arith.mulf %467, %459 : vector<8x128xf32>
    %469 = arith.addf %452, %468 : vector<8x128xf32>
    %470 = arith.index_cast %arg0 : i32 to index
    %c81 = arith.constant 81 : index
    %471 = memref.load %arg1[%470, %c81] : memref<2x128xf32, #tpu.memory_space<smem>>
    %472 = vector.broadcast %471 : f32 to vector<8x128xf32>
    %473 = arith.mulf %472, %459 : vector<8x128xf32>
    %474 = arith.addf %457, %473 : vector<8x128xf32>
    %475 = arith.index_cast %arg0 : i32 to index
    %c82 = arith.constant 82 : index
    %476 = memref.load %arg1[%475, %c82] : memref<2x128xf32, #tpu.memory_space<smem>>
    %477 = vector.broadcast %476 : f32 to vector<8x128xf32>
    %478 = arith.mulf %477, %461 : vector<8x128xf32>
    %479 = arith.addf %469, %478 : vector<8x128xf32>
    %480 = arith.index_cast %arg0 : i32 to index
    %c83 = arith.constant 83 : index
    %481 = memref.load %arg1[%480, %c83] : memref<2x128xf32, #tpu.memory_space<smem>>
    %482 = vector.broadcast %481 : f32 to vector<8x128xf32>
    %483 = arith.mulf %482, %461 : vector<8x128xf32>
    %484 = arith.addf %474, %483 : vector<8x128xf32>
    %485 = arith.index_cast %arg0 : i32 to index
    %c84 = arith.constant 84 : index
    %486 = memref.load %arg1[%485, %c84] : memref<2x128xf32, #tpu.memory_space<smem>>
    %487 = vector.broadcast %486 : f32 to vector<8x128xf32>
    %488 = arith.mulf %487, %462 : vector<8x128xf32>
    %489 = arith.addf %479, %488 : vector<8x128xf32>
    %490 = arith.index_cast %arg0 : i32 to index
    %c85 = arith.constant 85 : index
    %491 = memref.load %arg1[%490, %c85] : memref<2x128xf32, #tpu.memory_space<smem>>
    %492 = vector.broadcast %491 : f32 to vector<8x128xf32>
    %493 = arith.mulf %492, %462 : vector<8x128xf32>
    %494 = arith.addf %484, %493 : vector<8x128xf32>
    %495 = arith.index_cast %arg0 : i32 to index
    %c86 = arith.constant 86 : index
    %496 = memref.load %arg1[%495, %c86] : memref<2x128xf32, #tpu.memory_space<smem>>
    %497 = vector.broadcast %496 : f32 to vector<8x128xf32>
    %498 = arith.mulf %497, %463 : vector<8x128xf32>
    %499 = arith.addf %489, %498 : vector<8x128xf32>
    %500 = arith.index_cast %arg0 : i32 to index
    %c87 = arith.constant 87 : index
    %501 = memref.load %arg1[%500, %c87] : memref<2x128xf32, #tpu.memory_space<smem>>
    %502 = vector.broadcast %501 : f32 to vector<8x128xf32>
    %503 = arith.mulf %502, %463 : vector<8x128xf32>
    %504 = arith.addf %494, %503 : vector<8x128xf32>
    %505 = arith.index_cast %arg0 : i32 to index
    %c88 = arith.constant 88 : index
    %506 = memref.load %arg1[%505, %c88] : memref<2x128xf32, #tpu.memory_space<smem>>
    %507 = vector.broadcast %506 : f32 to vector<8x128xf32>
    %508 = arith.mulf %507, %464 : vector<8x128xf32>
    %509 = arith.addf %499, %508 : vector<8x128xf32>
    %510 = arith.index_cast %arg0 : i32 to index
    %c89 = arith.constant 89 : index
    %511 = memref.load %arg1[%510, %c89] : memref<2x128xf32, #tpu.memory_space<smem>>
    %512 = vector.broadcast %511 : f32 to vector<8x128xf32>
    %513 = arith.mulf %512, %464 : vector<8x128xf32>
    %514 = arith.addf %504, %513 : vector<8x128xf32>
    %515 = arith.index_cast %arg0 : i32 to index
    %c90 = arith.constant 90 : index
    %516 = memref.load %arg1[%515, %c90] : memref<2x128xf32, #tpu.memory_space<smem>>
    %517 = vector.broadcast %516 : f32 to vector<8x128xf32>
    %518 = arith.addf %509, %517 : vector<8x128xf32>
    %519 = arith.index_cast %arg0 : i32 to index
    %c91 = arith.constant 91 : index
    %520 = memref.load %arg1[%519, %c91] : memref<2x128xf32, #tpu.memory_space<smem>>
    %521 = vector.broadcast %520 : f32 to vector<8x128xf32>
    %522 = arith.addf %514, %521 : vector<8x128xf32>
    %c0_73 = arith.constant 0 : index
    %c0_74 = arith.constant 0 : index
    %c0_75 = arith.constant 0 : index
    %523 = vector.load %arg3[%c0_73, %c0_74, %c0_75] : memref<1x8x128xf32, #tpu.memory_space<vmem>>, vector<1x8x128xf32>
    %524 = vector.shape_cast %523 : vector<1x8x128xf32> to vector<8x128xf32>
    %cst_76 = arith.constant 0.954929649 : f32
    %525 = vector.broadcast %cst_76 : f32 to vector<8x128xf32>
    %526 = arith.mulf %524, %525 : vector<8x128xf32>
    %527 = arith.mulf %522, %518 : vector<8x128xf32>
    %cst_77 = arith.constant 5.000000e+00 : f32
    %528 = vector.broadcast %cst_77 : f32 to vector<8x128xf32>
    %529 = arith.addf %528, %526 : vector<8x128xf32>
    %cst_78 = arith.constant 6.000000e+00 : f32
    %530 = vector.broadcast %cst_78 : f32 to vector<8x128xf32>
    %531 = arith.cmpf oge, %529, %530 : vector<8x128xf32>
    %cst_79 = arith.constant 6.000000e+00 : f32
    %532 = vector.broadcast %cst_79 : f32 to vector<8x128xf32>
    %533 = arith.subf %529, %532 : vector<8x128xf32>
    %534 = arith.select %531, %533, %529 : vector<8x128xi1>, vector<8x128xf32>
    %cst_80 = arith.constant 4.000000e+00 : f32
    %535 = vector.broadcast %cst_80 : f32 to vector<8x128xf32>
    %536 = arith.subf %535, %534 : vector<8x128xf32>
    %537 = arith.minimumf %534, %536 : vector<8x128xf32>
    %cst_81 = arith.constant 0.000000e+00 : f32
    %cst_82 = arith.constant 1.000000e+00 : f32
    %538 = vector.broadcast %cst_81 : f32 to vector<8x128xf32>
    %539 = arith.maximumf %538, %537 : vector<8x128xf32>
    %540 = vector.broadcast %cst_82 : f32 to vector<8x128xf32>
    %541 = arith.minimumf %540, %539 : vector<8x128xf32>
    %542 = arith.mulf %527, %541 : vector<8x128xf32>
    %543 = arith.subf %522, %542 : vector<8x128xf32>
    %c0_83 = arith.constant 0 : index
    %c0_84 = arith.constant 0 : index
    %c0_85 = arith.constant 0 : index
    %c0_86 = arith.constant 0 : index
    %544 = vector.load %arg4[%c0_83, %c0_84, %c0_85, %c0_86] : memref<1x3x8x128xf32, #tpu.memory_space<vmem>>, vector<1x1x8x128xf32>
    %545 = vector.shape_cast %544 : vector<1x1x8x128xf32> to vector<8x128xf32>
    %546 = arith.addf %543, %545 : vector<8x128xf32>
    %c0_87 = arith.constant 0 : index
    %c0_88 = arith.constant 0 : index
    %c0_89 = arith.constant 0 : index
    %c0_90 = arith.constant 0 : index
    %547 = vector.load %arg5[%c0_87, %c0_88, %c0_89, %c0_90] : memref<1x3x8x128xf32, #tpu.memory_space<vmem>>, vector<1x1x8x128xf32>
    %548 = vector.shape_cast %547 : vector<1x1x8x128xf32> to vector<8x128xf32>
    %549 = vector.shape_cast %546 : vector<8x128xf32> to vector<1x1x8x128xf32>
    tpu.vector_store %arg5[%c0_87, %c0_88, %c0_89, %c0_90], %549 {strides = array<i32>} : memref<1x3x8x128xf32, #tpu.memory_space<vmem>>, vector<1x1x8x128xf32>,
    %cst_91 = arith.constant 3.000000e+00 : f32
    %550 = vector.broadcast %cst_91 : f32 to vector<8x128xf32>
    %551 = arith.addf %550, %526 : vector<8x128xf32>
    %cst_92 = arith.constant 6.000000e+00 : f32
    %552 = vector.broadcast %cst_92 : f32 to vector<8x128xf32>
    %553 = arith.cmpf oge, %551, %552 : vector<8x128xf32>
    %cst_93 = arith.constant 6.000000e+00 : f32
    %554 = vector.broadcast %cst_93 : f32 to vector<8x128xf32>
    %555 = arith.subf %551, %554 : vector<8x128xf32>
    %556 = arith.select %553, %555, %551 : vector<8x128xi1>, vector<8x128xf32>
    %cst_94 = arith.constant 4.000000e+00 : f32
    %557 = vector.broadcast %cst_94 : f32 to vector<8x128xf32>
    %558 = arith.subf %557, %556 : vector<8x128xf32>
    %559 = arith.minimumf %556, %558 : vector<8x128xf32>
    %cst_95 = arith.constant 0.000000e+00 : f32
    %cst_96 = arith.constant 1.000000e+00 : f32
    %560 = vector.broadcast %cst_95 : f32 to vector<8x128xf32>
    %561 = arith.maximumf %560, %559 : vector<8x128xf32>
    %562 = vector.broadcast %cst_96 : f32 to vector<8x128xf32>
    %563 = arith.minimumf %562, %561 : vector<8x128xf32>
    %564 = arith.mulf %527, %563 : vector<8x128xf32>
    %565 = arith.subf %522, %564 : vector<8x128xf32>
    %c0_97 = arith.constant 0 : index
    %c1_98 = arith.constant 1 : index
    %c0_99 = arith.constant 0 : index
    %c0_100 = arith.constant 0 : index
    %566 = vector.load %arg4[%c0_97, %c1_98, %c0_99, %c0_100] : memref<1x3x8x128xf32, #tpu.memory_space<vmem>>, vector<1x1x8x128xf32>
    %567 = vector.shape_cast %566 : vector<1x1x8x128xf32> to vector<8x128xf32>
    %568 = arith.addf %565, %567 : vector<8x128xf32>
    %c0_101 = arith.constant 0 : index
    %c1_102 = arith.constant 1 : index
    %c0_103 = arith.constant 0 : index
    %c0_104 = arith.constant 0 : index
    %569 = vector.load %arg5[%c0_101, %c1_102, %c0_103, %c0_104] : memref<1x3x8x128xf32, #tpu.memory_space<vmem>>, vector<1x1x8x128xf32>
    %570 = vector.shape_cast %569 : vector<1x1x8x128xf32> to vector<8x128xf32>
    %571 = vector.shape_cast %568 : vector<8x128xf32> to vector<1x1x8x128xf32>
    tpu.vector_store %arg5[%c0_101, %c1_102, %c0_103, %c0_104], %571 {strides = array<i32>} : memref<1x3x8x128xf32, #tpu.memory_space<vmem>>, vector<1x1x8x128xf32>,
    %cst_105 = arith.constant 1.000000e+00 : f32
    %572 = vector.broadcast %cst_105 : f32 to vector<8x128xf32>
    %573 = arith.addf %572, %526 : vector<8x128xf32>
    %cst_106 = arith.constant 6.000000e+00 : f32
    %574 = vector.broadcast %cst_106 : f32 to vector<8x128xf32>
    %575 = arith.cmpf oge, %573, %574 : vector<8x128xf32>
    %cst_107 = arith.constant 6.000000e+00 : f32
    %576 = vector.broadcast %cst_107 : f32 to vector<8x128xf32>
    %577 = arith.subf %573, %576 : vector<8x128xf32>
    %578 = arith.select %575, %577, %573 : vector<8x128xi1>, vector<8x128xf32>
    %cst_108 = arith.constant 4.000000e+00 : f32
    %579 = vector.broadcast %cst_108 : f32 to vector<8x128xf32>
    %580 = arith.subf %579, %578 : vector<8x128xf32>
    %581 = arith.minimumf %578, %580 : vector<8x128xf32>
    %cst_109 = arith.constant 0.000000e+00 : f32
    %cst_110 = arith.constant 1.000000e+00 : f32
    %582 = vector.broadcast %cst_109 : f32 to vector<8x128xf32>
    %583 = arith.maximumf %582, %581 : vector<8x128xf32>
    %584 = vector.broadcast %cst_110 : f32 to vector<8x128xf32>
    %585 = arith.minimumf %584, %583 : vector<8x128xf32>
    %586 = arith.mulf %527, %585 : vector<8x128xf32>
    %587 = arith.subf %522, %586 : vector<8x128xf32>
    %c0_111 = arith.constant 0 : index
    %c2_112 = arith.constant 2 : index
    %c0_113 = arith.constant 0 : index
    %c0_114 = arith.constant 0 : index
    %588 = vector.load %arg4[%c0_111, %c2_112, %c0_113, %c0_114] : memref<1x3x8x128xf32, #tpu.memory_space<vmem>>, vector<1x1x8x128xf32>
    %589 = vector.shape_cast %588 : vector<1x1x8x128xf32> to vector<8x128xf32>
    %590 = arith.addf %587, %589 : vector<8x128xf32>
    %c0_115 = arith.constant 0 : index
    %c2_116 = arith.constant 2 : index
    %c0_117 = arith.constant 0 : index
    %c0_118 = arith.constant 0 : index
    %591 = vector.load %arg5[%c0_115, %c2_116, %c0_117, %c0_118] : memref<1x3x8x128xf32, #tpu.memory_space<vmem>>, vector<1x1x8x128xf32>
    %592 = vector.shape_cast %591 : vector<1x1x8x128xf32> to vector<8x128xf32>
    %593 = vector.shape_cast %590 : vector<8x128xf32> to vector<1x1x8x128xf32>
    tpu.vector_store %arg5[%c0_115, %c2_116, %c0_117, %c0_118], %593 {strides = array<i32>} : memref<1x3x8x128xf32, #tpu.memory_space<vmem>>, vector<1x1x8x128xf32>,
    return
  }
  func.func @transform_0(%arg0: i32) -> (i32, i32) {
    %c0_i32 = arith.constant 0 : i32
    %c0_i32_0 = arith.constant 0 : i32
    %c0_i32_1 = arith.constant 0 : i32
    return %c0_i32, %c0_i32_0 : i32, i32
  }
  func.func @transform_1(%arg0: i32) -> (i32, i32, i32, i32) {
    %c0_i32 = arith.constant 0 : i32
    %c0_i32_0 = arith.constant 0 : i32
    %c0_i32_1 = arith.constant 0 : i32
    %c0_i32_2 = arith.constant 0 : i32
    return %arg0, %c0_i32, %c0_i32_0, %c0_i32_1 : i32, i32, i32, i32
  }
  func.func @transform_2(%arg0: i32) -> (i32, i32, i32) {
    %c0_i32 = arith.constant 0 : i32
    %c0_i32_0 = arith.constant 0 : i32
    %c0_i32_1 = arith.constant 0 : i32
    return %arg0, %c0_i32, %c0_i32_0 : i32, i32, i32
  }
  func.func @transform_3(%arg0: i32) -> (i32, i32, i32, i32) {
    %c0_i32 = arith.constant 0 : i32
    %c0_i32_0 = arith.constant 0 : i32
    %c0_i32_1 = arith.constant 0 : i32
    %c0_i32_2 = arith.constant 0 : i32
    return %arg0, %c0_i32, %c0_i32_0, %c0_i32_1 : i32, i32, i32, i32
  }
  func.func @transform_4(%arg0: i32) -> (i32, i32, i32, i32) {
    %c0_i32 = arith.constant 0 : i32
    %c0_i32_0 = arith.constant 0 : i32
    %c0_i32_1 = arith.constant 0 : i32
    %c0_i32_2 = arith.constant 0 : i32
    return %arg0, %c0_i32, %c0_i32_0, %c0_i32_1 : i32, i32, i32, i32
  }
}

</mosaic_0001>

<bundles_post_ra>
// kernel: transformer_forward.4
= control target key start
LH: loop header
LB: loop body
LE: loop exit
PB: predicated region body
PF: predicated region fallthrough
CT: control target
= control target key end

     0   :  { %vm235_vm0 = vcmask 1041408   ;;  %vm186_vm1 = vcmask 818176   ;;  %s1093_s1 = inlined_call_operand.vmem [shape: bf16[100,128], index: 1, kind: input, shape index: {}]   ;;  %s1094_s0 = inlined_call_operand.vmem [shape: bf16[256,100], index: 0, kind: input, shape index: {}]   ;;  %s1095_s2 = inlined_call_operand.vmem [shape: f32[1,128], index: 2, kind: input, shape index: {}]   ;;  %s1096_s3 = inlined_call_operand.vmem [shape: bf16[256,128], index: 3, kind: output, shape index: {}]  }
   0x1   :  { %v880_v0 = vld [vmem:[%s1093_s1 + $0x30] ss:$0 sps:$4 sm:$0x33]   ;;  %v881_v1 = vld [vmem:[%s1093_s1 + $0x28] sm:$0xff]   ;;  %v882_v3 = vld [vmem:[%s1093_s1 + $0x20] sm:$0xff]  }
   0x2   :  { %878 = vmatprep.subr.msk.bf16.mxu0 %vm235_vm0, %v880_v0  ;;  %879 = vmatprep.subr.msk.bf16.mxu1 %vm235_vm0, %v880_v0  ;;  %v237_v2 = vsel %vm235_vm0, %v880_v0, 0  ;;  %v883_v4 = vld [vmem:[%s1093_s1 + $0x18] sm:$0xff]   ;;  %v887_v5 = vld [vmem:[%s1094_s0] sm:$0xff]   ;;  %v884_v7 = vld [vmem:[%s1093_s1 + $0x10] sm:$0xff]  }
   0x3   :  { %819 = vmatpush3.bf16.msra.mxu0 %v237_v2  ;;  %871 = vmatpush3.bf16.msra.mxu1 %v237_v2  ;;  %v888_v6 = vld [vmem:[%s1094_s0 + $0x40] sm:$0xff]   ;;  %v885_v8 = vld [vmem:[%s1093_s1 + $0x8] sm:$0xff]   ;;  %v891_v12 = vld [vmem:[%s1094_s0 + $0x10] sm:$0xff]  }
   0x4   :  { %820 = vmatprep.subr.bf16.mxu0 %v881_v1  ;;  %865 = vmatprep.subr.bf16.mxu1 %v881_v1  ;;  %v886_v9 = vld [vmem:[%s1093_s1] sm:$0xff]   ;;  %v889_v10 = vld [vmem:[%s1094_s0 + $0x8] sm:$0xff]   ;;  %v892_v13 = vld [vmem:[%s1094_s0 + $0x50] sm:$0xff]  }
   0x5   :  { %832 = vmatprep.mubr.msk.bf16.mxu0 %vm186_vm1, %v887_v5  ;;  %848 = vmatprep.mubr.msk.bf16.mxu1 %vm186_vm1, %v888_v6  ;;  %v890_v11 = vld [vmem:[%s1094_s0 + $0x48] sm:$0xff]   ;;  %v893_v14 = vld [vmem:[%s1094_s0 + $0x18] sm:$0xff]   ;;  %v895_v16 = vld [vmem:[%s1094_s0 + $0x20] sm:$0xff]  }
   0x6   :  { %v894_v15 = vld [vmem:[%s1094_s0 + $0x58] sm:$0xff]   ;;  %v896_v17 = vld [vmem:[%s1094_s0 + $0x60] sm:$0xff]   ;;  %v897_v18 = vld [vmem:[%s1094_s0 + $0x28] sm:$0xff]  }
   0x7   :  { %821 = vmatpush3.bf16.msra.mxu0 %v881_v1  ;;  %872 = vmatpush3.bf16.msra.mxu1 %v881_v1  ;;  %v898_v19 = vld [vmem:[%s1094_s0 + $0x68] sm:$0xff]   ;;  %v899_v20 = vld [vmem:[%s1094_s0 + $0x30] sm:$0xff]   ;;  %v901_v22 = vld [vmem:[%s1094_s0 + $0x38] sm:$0xff]  }
   0x8   :  { %822 = vmatprep.subr.bf16.mxu0 %v882_v3  ;;  %866 = vmatprep.subr.bf16.mxu1 %v882_v3  ;;  %v900_v21 = vld [vmem:[%s1094_s0 + $0x70] sm:$0xff]   ;;  %v902_v23 = vld [vmem:[%s1094_s0 + $0x78] sm:$0xff]   ;;  %v1011_v24 = vld [vmem:[%s1095_s2] ss:$0 sm:$0xff] }
   0xb   :  { %823 = vmatpush3.bf16.msra.mxu0 %v882_v3  ;;  %873 = vmatpush3.bf16.msra.mxu1 %v882_v3 }
   0xc   :  { %824 = vmatprep.subr.bf16.mxu0 %v883_v4  ;;  %867 = vmatprep.subr.bf16.mxu1 %v883_v4 }
   0xf   :  { %825 = vmatpush3.bf16.msra.mxu0 %v883_v4  ;;  %874 = vmatpush3.bf16.msra.mxu1 %v883_v4 }
  0x10   :  { %826 = vmatprep.subr.bf16.mxu0 %v884_v7  ;;  %868 = vmatprep.subr.bf16.mxu1 %v884_v7 }
  0x13   :  { %827 = vmatpush3.bf16.msra.mxu0 %v884_v7  ;;  %875 = vmatpush3.bf16.msra.mxu1 %v884_v7 }
  0x14   :  { %828 = vmatprep.subr.bf16.mxu0 %v885_v8  ;;  %869 = vmatprep.subr.bf16.mxu1 %v885_v8 }
  0x17   :  { %829 = vmatpush3.bf16.msra.mxu0 %v885_v8  ;;  %876 = vmatpush3.bf16.msra.mxu1 %v885_v8 }
  0x18   :  { %830 = vmatprep.subr.bf16.mxu0 %v886_v9  ;;  %870 = vmatprep.subr.bf16.mxu1 %v886_v9 }
  0x1b   :  { %831 = vmatpush3.bf16.msra.mxu0 %v886_v9  ;;  %877 = vmatpush3.bf16.msra.mxu1 %v886_v9 }
  0x1e   :  { %833 = vmatmul.mubr.msk.bf16.vlgmr.msra.gmra.mxu0 %vm186_vm1, %v889_v10  ;;  %849 = vmatmul.mubr.msk.bf16.vlgmr.msra.gmra.mxu1 %vm186_vm1, %v890_v11 }
  0x1f   :  { %836 = vmatprep.mubr.msk.bf16.mxu0 %vm186_vm1, %v891_v12  ;;  %852 = vmatprep.mubr.msk.bf16.mxu1 %vm186_vm1, %v892_v13 }
  0x26   :  { %837 = vmatmul.mubr.msk.bf16.gmra.mxu0 %vm186_vm1, %v893_v14  ;;  %853 = vmatmul.mubr.msk.bf16.gmra.mxu1 %vm186_vm1, %v894_v15 }
  0x27   :  { %840 = vmatprep.mubr.msk.bf16.mxu0 %vm186_vm1, %v895_v16  ;;  %856 = vmatprep.mubr.msk.bf16.mxu1 %vm186_vm1, %v896_v17 }
  0x2e   :  { %841 = vmatmul.mubr.msk.bf16.gmra.mxu0 %vm186_vm1, %v897_v18  ;;  %857 = vmatmul.mubr.msk.bf16.gmra.mxu1 %vm186_vm1, %v898_v19 }
  0x2f   :  { %844 = vmatprep.mubr.msk.bf16.mxu0 %vm186_vm1, %v899_v20  ;;  %860 = vmatprep.mubr.msk.bf16.mxu1 %vm186_vm1, %v900_v21 }
  0x36   :  { %845 = vmatmul.mubr.msk.bf16.gmra.mxu0 %vm186_vm1, %v901_v22  ;;  %861 = vmatmul.mubr.msk.bf16.gmra.mxu1 %vm186_vm1, %v902_v23 }
  0xde   :  { %v834_v25 = vpop.f32.mrf.mxu0  ;;  %v850_v26 = vpop.f32.mrf.mxu1 }
  0xdf   :  { %v282_v27 = vadd.f32 %v834_v25, %v1011_v24  ;;  %v346_v28 = vadd.f32 %v850_v26, %v1011_v24 }
  0xe0   :  { %v273_v29 = vpop.f32.mrf.mxu0  ;;  %v337_v30 = vpop.f32.mrf.mxu1 }
  0xe1   :  { %v274_v31 = vadd.f32 %v1011_v24, %v273_v29  ;;  %v338_v32 = vadd.f32 %v1011_v24, %v337_v30  ;;  %v402_v37 = vmax.f32 %v282_v27, 0.0  ;;  %v418_v38 = vmax.f32 %v346_v28, 0.0 }
  0xe2   :  { %v835_v33 = vpop.f32.mrf.mxu0  ;;  %v851_v34 = vpop.f32.mrf.mxu1 }
  0xe3   :  { %v285_v35 = vadd.f32 %v835_v33, %v1011_v24  ;;  %v349_v36 = vadd.f32 %v851_v34, %v1011_v24  ;;  %v400_v45 = vmax.f32 %v274_v31, 0.0  ;;  %v416_v46 = vmax.f32 %v338_v32, 0.0 }
  0xe4   :  { %v276_v39 = vpop.f32.mrf.mxu0  ;;  %v340_v40 = vpop.f32.mrf.mxu1 }
  0xe5   :  { %v403_v41 = vmax.f32 %v285_v35, 0.0  ;;  %v419_v42 = vmax.f32 %v349_v36, 0.0  ;;  %v277_v43 = vadd.f32 %v1011_v24, %v276_v39  ;;  %v341_v44 = vadd.f32 %v1011_v24, %v340_v40 }
  0xe6   :  { %v838_v47 = vpop.f32.mrf.mxu0  ;;  %v854_v48 = vpop.f32.mrf.mxu1 }
  0xe7   :  { %v708_v49 = vpack.c.bf16 %v403_v41, %v402_v37  ;;  %v748_v50 = vpack.c.bf16 %v419_v42, %v418_v38  ;;  %v401_v51 = vmax.f32 %v277_v43, 0.0  ;;  %v417_v52 = vmax.f32 %v341_v44, 0.0 }
  0xe8   :  { %v298_v53 = vadd.f32 %v838_v47, %v1011_v24  ;;  %v362_v54 = vadd.f32 %v854_v48, %v1011_v24  ;;  %v289_v55 = vpop.f32.mrf.mxu0  ;;  %v353_v56 = vpop.f32.mrf.mxu1 }
  0xe9   :  { %780 = vst [vmem:[%s1096_s3 + $0x8] sm:$0xff] %v708_v49   ;;  %788 = vst [vmem:[%s1096_s3 + $0x48] sm:$0xff] %v748_v50   ;;  %v703_v57 = vpack.c.bf16 %v401_v51, %v400_v45  ;;  %v743_v58 = vpack.c.bf16 %v417_v52, %v416_v46  ;;  %v290_v59 = vadd.f32 %v1011_v24, %v289_v55 }
  0xea   :  { %v354_v60 = vadd.f32 %v1011_v24, %v353_v56  ;;  %v839_v61 = vpop.f32.mrf.mxu0  ;;  %v855_v62 = vpop.f32.mrf.mxu1  ;;  %v406_v1 = vmax.f32 %v298_v53, 0.0  ;;  %v422_v2 = vmax.f32 %v362_v54, 0.0 }
  0xeb   :  { %704 = vst [vmem:[%s1096_s3] sm:$0xff] %v703_v57   ;;  %787 = vst [vmem:[%s1096_s3 + $0x40] sm:$0xff] %v743_v58   ;;  %v301_v63 = vadd.f32 %v839_v61, %v1011_v24  ;;  %v365_v0 = vadd.f32 %v855_v62, %v1011_v24  ;;  %v404_v9 = vmax.f32 %v290_v59, 0.0 }
  0xec   :  { %v292_v3 = vpop.f32.mrf.mxu0  ;;  %v356_v4 = vpop.f32.mrf.mxu1  ;;  %v420_v10 = vmax.f32 %v354_v60, 0.0 }
  0xed   :  { %v407_v5 = vmax.f32 %v301_v63, 0.0  ;;  %v423_v6 = vmax.f32 %v365_v0, 0.0  ;;  %v293_v7 = vadd.f32 %v1011_v24, %v292_v3  ;;  %v357_v8 = vadd.f32 %v1011_v24, %v356_v4 }
  0xee   :  { %v842_v11 = vpop.f32.mrf.mxu0  ;;  %v858_v12 = vpop.f32.mrf.mxu1 }
  0xef   :  { %v718_v13 = vpack.c.bf16 %v407_v5, %v406_v1  ;;  %v758_v14 = vpack.c.bf16 %v423_v6, %v422_v2  ;;  %v405_v15 = vmax.f32 %v293_v7, 0.0  ;;  %v421_v16 = vmax.f32 %v357_v8, 0.0 }
  0xf0   :  { %v314_v17 = vadd.f32 %v842_v11, %v1011_v24  ;;  %v378_v18 = vadd.f32 %v858_v12, %v1011_v24  ;;  %v305_v19 = vpop.f32.mrf.mxu0  ;;  %v369_v20 = vpop.f32.mrf.mxu1 }
  0xf1   :  { %782 = vst [vmem:[%s1096_s3 + $0x18] sm:$0xff] %v718_v13   ;;  %790 = vst [vmem:[%s1096_s3 + $0x58] sm:$0xff] %v758_v14   ;;  %v713_v21 = vpack.c.bf16 %v405_v15, %v404_v9  ;;  %v753_v22 = vpack.c.bf16 %v421_v16, %v420_v10  ;;  %v306_v23 = vadd.f32 %v1011_v24, %v305_v19 }
  0xf2   :  { %v370_v25 = vadd.f32 %v1011_v24, %v369_v20  ;;  %v843_v26 = vpop.f32.mrf.mxu0  ;;  %v859_v27 = vpop.f32.mrf.mxu1  ;;  %v410_v30 = vmax.f32 %v314_v17, 0.0  ;;  %v426_v31 = vmax.f32 %v378_v18, 0.0 }
  0xf3   :  { %781 = vst [vmem:[%s1096_s3 + $0x10] sm:$0xff] %v713_v21   ;;  %789 = vst [vmem:[%s1096_s3 + $0x50] sm:$0xff] %v753_v22   ;;  %v317_v28 = vadd.f32 %v843_v26, %v1011_v24  ;;  %v381_v29 = vadd.f32 %v859_v27, %v1011_v24  ;;  %v408_v38 = vmax.f32 %v306_v23, 0.0 }
  0xf4   :  { %v308_v32 = vpop.f32.mrf.mxu0  ;;  %v372_v33 = vpop.f32.mrf.mxu1  ;;  %v424_v39 = vmax.f32 %v370_v25, 0.0 }
  0xf5   :  { %v411_v34 = vmax.f32 %v317_v28, 0.0  ;;  %v427_v35 = vmax.f32 %v381_v29, 0.0  ;;  %v309_v36 = vadd.f32 %v1011_v24, %v308_v32  ;;  %v373_v37 = vadd.f32 %v1011_v24, %v372_v33 }
  0xf6   :  { %v846_v40 = vpop.f32.mrf.mxu0  ;;  %v862_v41 = vpop.f32.mrf.mxu1 }
  0xf7   :  { %v728_v42 = vpack.c.bf16 %v411_v34, %v410_v30  ;;  %v768_v43 = vpack.c.bf16 %v427_v35, %v426_v31  ;;  %v409_v44 = vmax.f32 %v309_v36, 0.0  ;;  %v425_v45 = vmax.f32 %v373_v37, 0.0 }
  0xf8   :  { %v330_v46 = vadd.f32 %v846_v40, %v1011_v24  ;;  %v394_v47 = vadd.f32 %v862_v41, %v1011_v24  ;;  %v321_v48 = vpop.f32.mrf.mxu0  ;;  %v385_v49 = vpop.f32.mrf.mxu1 }
  0xf9   :  { %784 = vst [vmem:[%s1096_s3 + $0x28] sm:$0xff] %v728_v42   ;;  %792 = vst [vmem:[%s1096_s3 + $0x68] sm:$0xff] %v768_v43   ;;  %v723_v50 = vpack.c.bf16 %v409_v44, %v408_v38  ;;  %v763_v51 = vpack.c.bf16 %v425_v45, %v424_v39  ;;  %v322_v52 = vadd.f32 %v1011_v24, %v321_v48 }
  0xfa   :  { %v386_v53 = vadd.f32 %v1011_v24, %v385_v49  ;;  %v847_v54 = vpop.f32.mrf.mxu0  ;;  %v863_v55 = vpop.f32.mrf.mxu1  ;;  %v414_v58 = vmax.f32 %v330_v46, 0.0  ;;  %v430_v59 = vmax.f32 %v394_v47, 0.0 }
  0xfb   :  { %783 = vst [vmem:[%s1096_s3 + $0x20] sm:$0xff] %v723_v50   ;;  %791 = vst [vmem:[%s1096_s3 + $0x60] sm:$0xff] %v763_v51   ;;  %v333_v56 = vadd.f32 %v847_v54, %v1011_v24  ;;  %v397_v57 = vadd.f32 %v863_v55, %v1011_v24  ;;  %v412_v2 = vmax.f32 %v322_v52, 0.0 }
  0xfc   :  { %v324_v60 = vpop.f32.mrf.mxu0  ;;  %v388_v61 = vpop.f32.mrf.mxu1  ;;  %v428_v3 = vmax.f32 %v386_v53, 0.0 }
  0xfd   :  { %v415_v62 = vmax.f32 %v333_v56, 0.0  ;;  %v431_v63 = vmax.f32 %v397_v57, 0.0  ;;  %v325_v0 = vadd.f32 %v1011_v24, %v324_v60  ;;  %v389_v1 = vadd.f32 %v1011_v24, %v388_v61 }
  0xff   :  { %v738_v4 = vpack.c.bf16 %v415_v62, %v414_v58  ;;  %v778_v5 = vpack.c.bf16 %v431_v63, %v430_v59  ;;  %v413_v6 = vmax.f32 %v325_v0, 0.0  ;;  %v429_v7 = vmax.f32 %v389_v1, 0.0 }
 0x101   :  { %786 = vst [vmem:[%s1096_s3 + $0x38] sm:$0xff] %v738_v4   ;;  %794 = vst [vmem:[%s1096_s3 + $0x78] sm:$0xff] %v778_v5   ;;  %v733_v8 = vpack.c.bf16 %v413_v6, %v412_v2  ;;  %v773_v9 = vpack.c.bf16 %v429_v7, %v428_v3 }
 0x103   :  { %785 = vst [vmem:[%s1096_s3 + $0x30] sm:$0xff] %v733_v8   ;;  %793 = vst [vmem:[%s1096_s3 + $0x70] sm:$0xff] %v773_v9  }

// kernel: transformer_forward.5
= control target key start
LH: loop header
LB: loop body
LE: loop exit
PB: predicated region body
PF: predicated region fallthrough
CT: control target
= control target key end

     0   :  { %vm561_vm0 = vcmask 523264   ;;  %vm1566_vm1 = vmmov 0   ;;  %s2091_s1 = inlined_call_operand.vmem [shape: bf16[576,128], index: 1, kind: input, shape index: {}]   ;;  %s2092_s0 = inlined_call_operand.vmem [shape: bf16[128,576], index: 0, kind: input, shape index: {}]   ;;  %s2093_s2 = inlined_call_operand.vmem [shape: f32[1,128], index: 2, kind: input, shape index: {}]   ;;  %s2094_s3 = inlined_call_operand.vmem [shape: f32[72,128], index: 3, kind: input, shape index: {}]   ;;  %s2095_s4 = inlined_call_operand.vmem [shape: f32[72,128], index: 4, kind: output, shape index: {}]  }
   0x1   :  { %v1469_v0 = vld [vmem:[%s2091_s1 + $0x78] sm:$0xff]   ;;  %v1473_v4 = vld [vmem:[%s2091_s1 + $0x70] sm:$0xff]   ;;  %v1477_v8 = vld [vmem:[%s2091_s1 + $0x68] sm:$0xff]  }
   0x2   :  { %v1470_v1 = vld [vmem:[%s2091_s1 + $0x38] sm:$0xff]   ;;  %1219 = vmatprep.subr.bf16.mxu0 %v1469_v0  ;;  %v1474_v5 = vld [vmem:[%s2091_s1 + $0x30] sm:$0xff]   ;;  %v1478_v9 = vld [vmem:[%s2091_s1 + $0x28] sm:$0xff]  }
   0x3   :  { %v1471_v2 = vld [vmem:[%s2091_s1 + $0xf8] sm:$0xff]   ;;  %1220 = vmatpush3.bf16.msra.mxu0 %v1470_v1  ;;  %v1475_v6 = vld [vmem:[%s2091_s1 + $0xf0] sm:$0xff]   ;;  %v1479_v10 = vld [vmem:[%s2091_s1 + $0xe8] sm:$0xff]  }
   0x4   :  { %v1472_v3 = vld [vmem:[%s2091_s1 + $0xb8] sm:$0xff]   ;;  %1283 = vmatprep.subr.bf16.mxu1 %v1471_v2  ;;  %1221 = vmatprep.subr.bf16.mxu0 %v1473_v4  ;;  %v1476_v7 = vld [vmem:[%s2091_s1 + $0xb0] sm:$0xff]   ;;  %v1480_v11 = vld [vmem:[%s2091_s1 + $0xa8] sm:$0xff]  }
   0x5   :  { %1284 = vmatpush3.bf16.msra.mxu1 %v1472_v3  ;;  %v1481_v12 = vld [vmem:[%s2091_s1 + $0x60] sm:$0xff]   ;;  %v1485_v16 = vld [vmem:[%s2091_s1 + $0x58] sm:$0xff]   ;;  %v1489_v20 = vld [vmem:[%s2091_s1 + $0x50] sm:$0xff]  }
   0x6   :  { %1285 = vmatprep.subr.bf16.mxu1 %v1475_v6  ;;  %v1482_v13 = vld [vmem:[%s2091_s1 + $0x20] sm:$0xff]   ;;  %v1486_v17 = vld [vmem:[%s2091_s1 + $0x18] sm:$0xff]   ;;  %v1490_v21 = vld [vmem:[%s2091_s1 + $0x10] sm:$0xff]  }
   0x7   :  { %1222 = vmatpush3.bf16.msra.mxu0 %v1474_v5  ;;  %v1483_v14 = vld [vmem:[%s2091_s1 + $0xe0] sm:$0xff]   ;;  %v1487_v18 = vld [vmem:[%s2091_s1 + $0xd8] sm:$0xff]   ;;  %v1491_v22 = vld [vmem:[%s2091_s1 + $0xd0] sm:$0xff]  }
   0x8   :  { %1223 = vmatprep.subr.bf16.mxu0 %v1477_v8  ;;  %v1484_v15 = vld [vmem:[%s2091_s1 + $0xa0] sm:$0xff]   ;;  %v1488_v19 = vld [vmem:[%s2091_s1 + $0x98] sm:$0xff]   ;;  %v1492_v23 = vld [vmem:[%s2091_s1 + $0x90] sm:$0xff]  }
   0x9   :  { %1286 = vmatpush3.bf16.msra.mxu1 %v1476_v7  ;;  %v1493_v24 = vld [vmem:[%s2091_s1 + $0x48] sm:$0xff]   ;;  %v1497_v28 = vld [vmem:[%s2091_s1 + $0x40] sm:$0xff]   ;;  %v1516_v41 = vld [vmem:[%s2092_s0 + $0x5c] ss:$20 sps:$4 sm:$0xff]  }
   0xa   :  { %1287 = vmatprep.subr.bf16.mxu1 %v1479_v10  ;;  %v1494_v25 = vld [vmem:[%s2091_s1 + $0x8] sm:$0xff]   ;;  %v1498_v29 = vld [vmem:[%s2091_s1] sm:$0xff]   ;;  %v1528_v42 = vld [vmem:[%s2091_s1 + $0x118] sm:$0xff]  }
   0xb   :  { %1224 = vmatpush3.bf16.msra.mxu0 %v1478_v9  ;;  %v1495_v26 = vld [vmem:[%s2091_s1 + $0xc8] sm:$0xff]   ;;  %v1499_v30 = vld [vmem:[%s2091_s1 + $0xc0] sm:$0xff]   ;;  %v1519_v44 = vld [vmem:[%s2092_s0 + $0x7c] ss:$20 sps:$4 sm:$0xff]  }
   0xc   :  { %1225 = vmatprep.subr.bf16.mxu0 %v1481_v12  ;;  %v1496_v27 = vld [vmem:[%s2091_s1 + $0x88] sm:$0xff]   ;;  %v1500_v31 = vld [vmem:[%s2092_s0] ss:$20 sps:$4 sm:$0xff]   ;;  %v1502_v32 = vld [vmem:[%s2092_s0 + $0x4] ss:$20 sps:$4 sm:$0xff]  }
   0xd   :  { %1288 = vmatpush3.bf16.msra.mxu1 %v1480_v11  ;;  %v1503_v33 = vld [vmem:[%s2091_s1 + $0x80] sm:$0xff]   ;;  %618 = vmatprep.mubr.bf16.mxu0 %v1502_v32  ;;  %v1504_v34 = vld [vmem:[%s2092_s0 + $0x8] ss:$20 sps:$4 sm:$0xff]   ;;  %v1518_v45 = vld [vmem:[%s2092_s0 + $0x58] ss:$20 sps:$4 sm:$0xff]  }
   0xe   :  { %1289 = vmatprep.subr.bf16.mxu1 %v1483_v14  ;;  %v1506_v35 = vld [vmem:[%s2092_s0 + $0xc] ss:$20 sps:$4 sm:$0xff]   ;;  %v1510_v37 = vld [vmem:[%s2092_s0 + $0x34] ss:$20 sps:$4 sm:$0xff]   ;;  %v1512_v40 = vld [vmem:[%s2092_s0 + $0x30] ss:$20 sps:$4 sm:$0xff]  }
   0xf   :  { %1226 = vmatpush3.bf16.msra.mxu0 %v1482_v13  ;;  %v1507_v36 = vld [vmem:[%s2092_s0 + $0x2c] ss:$20 sps:$4 sm:$0xff]   ;;  %715 = vmatprep.mubr.bf16.mxu1 %v1506_v35  ;;  %v1509_v38 = vld [vmem:[%s2092_s0 + $0x28] ss:$20 sps:$4 sm:$0xff]   ;;  %v1515_v43 = vld [vmem:[%s2092_s0 + $0x50] ss:$20 sps:$4 sm:$0xff]  }
  0x10   :  { %1227 = vmatprep.subr.bf16.mxu0 %v1485_v16  ;;  %v1513_v39 = vld [vmem:[%s2092_s0 + $0x54] ss:$20 sps:$4 sm:$0xff]   ;;  %v1522_v46 = vld [vmem:[%s2092_s0 + $0x84] ss:$20 sps:$4 sm:$0xff]   ;;  %v1529_v53 = vld [vmem:[%s2092_s0 + $0xac] ss:$20 sps:$4 sm:$0xff]  }
  0x11   :  { %1290 = vmatpush3.bf16.msra.mxu1 %v1484_v15  ;;  %v1541_v47 = vld [vmem:[%s2091_s1 + $0x110] sm:$0xff]   ;;  %v1548_v48 = vld [vmem:[%s2091_s1 + $0x108] sm:$0xff]   ;;  %v1525_v50 = vld [vmem:[%s2092_s0 + $0xa4] ss:$20 sps:$4 sm:$0xff]  }
  0x12   :  { %1291 = vmatprep.subr.bf16.mxu1 %v1487_v18  ;;  %v1521_v49 = vld [vmem:[%s2092_s0 + $0x78] ss:$20 sps:$4 sm:$0xff]   ;;  %v1552_v51 = vld [vmem:[%s2091_s1 + $0x100] sm:$0xff]   ;;  %v1531_v56 = vld [vmem:[%s2092_s0 + $0xa8] ss:$20 sps:$4 sm:$0xff]  }
  0x13   :  { %1228 = vmatpush3.bf16.msra.mxu0 %v1486_v17  ;;  %v1524_v52 = vld [vmem:[%s2092_s0 + $0x80] ss:$20 sps:$4 sm:$0xff]   ;;  %v1534_v58 = vld [vmem:[%s2092_s0 + $0xc8] ss:$20 sps:$4 sm:$0xff]   ;;  %v1537_v60 = vld [vmem:[%s2092_s0 + $0xd0] ss:$20 sps:$4 sm:$0xff]  }
  0x14   :  { %1229 = vmatprep.subr.bf16.mxu0 %v1489_v20  ;;  %v1527_v54 = vld [vmem:[%s2092_s0 + $0xa0] ss:$20 sps:$4 sm:$0xff]   ;;  %v1542_v61 = vld [vmem:[%s2092_s0 + $0xfc] ss:$20 sps:$4 sm:$0xff]   ;;  %v1544_v0 = vld [vmem:[%s2092_s0 + $0xf8] ss:$20 sps:$4 sm:$0xff]  }
  0x15   :  { %1292 = vmatpush3.bf16.msra.mxu1 %v1488_v19  ;;  %v1532_v55 = vld [vmem:[%s2092_s0 + $0xcc] ss:$20 sps:$4 sm:$0xff]   ;;  %v1535_v57 = vld [vmem:[%s2092_s0 + $0xd4] ss:$20 sps:$4 sm:$0xff]   ;;  %v1540_v62 = vld [vmem:[%s2092_s0 + $0xf0] ss:$20 sps:$4 sm:$0xff]  }
  0x16   :  { %1293 = vmatprep.subr.bf16.mxu1 %v1491_v22  ;;  %v1538_v59 = vld [vmem:[%s2092_s0 + $0xf4] ss:$20 sps:$4 sm:$0xff]   ;;  %v1545_v63 = vld [vmem:[%s2092_s0 + $0x11c] ss:$20 sps:$4 sm:$0xff]   ;;  %v1549_v1 = vld [vmem:[%s2092_s0 + $0x124] ss:$20 sps:$4 sm:$0xff]  }
  0x17   :  { %1230 = vmatpush3.bf16.msra.mxu0 %v1490_v21  ;;  %v1547_v2 = vld [vmem:[%s2092_s0 + $0x118] ss:$20 sps:$4 sm:$0xff]   ;;  %v1553_v3 = vld [vmem:[%s2092_s0 + $0x10] ss:$20 sps:$4 sm:$0xff]   ;;  %v1551_v4 = vld [vmem:[%s2092_s0 + $0x120] ss:$20 sps:$4 sm:$0xff]  }
  0x18   :  { %1231 = vmatprep.subr.bf16.mxu0 %v1493_v24  ;;  %v1554_v5 = vld [vmem:[%s2092_s0 + $0x38] ss:$20 sps:$4 sm:$0xff]   ;;  %v1555_v6 = vld [vmem:[%s2092_s0 + $0x60] ss:$20 sps:$4 sm:$0xff]   ;;  %v1556_v7 = vld [vmem:[%s2092_s0 + $0x88] ss:$20 sps:$4 sm:$0xff]  }
  0x19   :  { %1294 = vmatpush3.bf16.msra.mxu1 %v1492_v23  ;;  %v1557_v8 = vld [vmem:[%s2092_s0 + $0xb0] ss:$20 sps:$4 sm:$0xff]   ;;  %v1558_v9 = vld [vmem:[%s2092_s0 + $0xd8] ss:$20 sps:$4 sm:$0xff]   ;;  %v1559_v10 = vld [vmem:[%s2092_s0 + $0x100] ss:$20 sps:$4 sm:$0xff]  }
  0x1a   :  { %1295 = vmatprep.subr.bf16.mxu1 %v1495_v26  ;;  %v1560_v11 = vld [vmem:[%s2092_s0 + $0x128] ss:$20 sps:$4 sm:$0xff]   ;;  %v1831_v13 = vld [vmem:[%s2093_s2] ss:$0 sm:$0xff] }
  0x1b   :  { %1232 = vmatpush3.bf16.msra.mxu0 %v1494_v25 }
  0x1c   :  { %1233 = vmatprep.subr.bf16.mxu0 %v1497_v28 }
  0x1d   :  { %1296 = vmatpush3.bf16.msra.mxu1 %v1496_v27 }
  0x1e   :  { %1297 = vmatprep.subr.bf16.mxu1 %v1499_v30 }
  0x1f   :  { %1234 = vmatpush3.bf16.msra.mxu0 %v1498_v29 }
  0x20   :  { %1384 = vmatprep.subr.bf16.mxu0 %v1528_v42 }
  0x21   :  { %1298 = vmatpush3.bf16.msra.mxu1 %v1503_v33 }
  0x22   :  { %619 = vmatmul.mubr.bf16.vlgmr.msra.gmra.mxu0 %v1500_v31 }
  0x23   :  { %626 = vmatprep.mubr.bf16.mxu0 %v1507_v36  ;;  %1385 = vmatpush3.bf16.msra.mxu0 %v1528_v42 }
  0x24   :  { %716 = vmatmul.mubr.bf16.vlgmr.msra.gmra.mxu1 %v1504_v34  ;;  %1386 = vmatprep.subr.bf16.mxu0 %v1541_v47 }
  0x25   :  { %723 = vmatprep.mubr.bf16.mxu1 %v1510_v37 }
  0x27   :  { %1387 = vmatpush3.bf16.msra.mxu0 %v1541_v47 }
  0x28   :  { %1388 = vmatprep.subr.bf16.mxu0 %v1548_v48 }
  0x2a   :  { %627 = vmatmul.mubr.bf16.gmra.mxu0 %v1509_v38 }
  0x2b   :  { %634 = vmatprep.mubr.bf16.mxu0 %v1513_v39  ;;  %1389 = vmatpush3.bf16.msra.mxu0 %v1548_v48 }
  0x2c   :  { %724 = vmatmul.mubr.bf16.gmra.mxu1 %v1512_v40  ;;  %1390 = vmatprep.subr.bf16.mxu0 %v1552_v51 }
  0x2d   :  { %731 = vmatprep.mubr.bf16.mxu1 %v1516_v41 }
  0x2f   :  { %1391 = vmatpush3.bf16.msra.mxu0 %v1552_v51 }
  0x32   :  { %635 = vmatmul.mubr.bf16.gmra.mxu0 %v1515_v43 }
  0x33   :  { %642 = vmatprep.mubr.bf16.mxu0 %v1519_v44 }
  0x34   :  { %732 = vmatmul.mubr.bf16.gmra.mxu1 %v1518_v45 }
  0x35   :  { %739 = vmatprep.mubr.bf16.mxu1 %v1522_v46 }
  0x3a   :  { %643 = vmatmul.mubr.bf16.gmra.mxu0 %v1521_v49 }
  0x3b   :  { %650 = vmatprep.mubr.bf16.mxu0 %v1525_v50 }
  0x3c   :  { %740 = vmatmul.mubr.bf16.gmra.mxu1 %v1524_v52 }
  0x3d   :  { %747 = vmatprep.mubr.bf16.mxu1 %v1529_v53 }
  0x42   :  { %651 = vmatmul.mubr.bf16.gmra.mxu0 %v1527_v54 }
  0x43   :  { %658 = vmatprep.mubr.bf16.mxu0 %v1532_v55 }
  0x44   :  { %748 = vmatmul.mubr.bf16.gmra.mxu1 %v1531_v56 }
  0x45   :  { %755 = vmatprep.mubr.bf16.mxu1 %v1535_v57 }
  0x4a   :  { %659 = vmatmul.mubr.bf16.gmra.mxu0 %v1534_v58 }
  0x4b   :  { %666 = vmatprep.mubr.bf16.mxu0 %v1538_v59 }
  0x4c   :  { %756 = vmatmul.mubr.bf16.gmra.mxu1 %v1537_v60 }
  0x4d   :  { %763 = vmatprep.mubr.bf16.mxu1 %v1542_v61 }
  0x52   :  { %667 = vmatmul.mubr.bf16.gmra.mxu0 %v1540_v62 }
  0x53   :  { %674 = vmatprep.mubr.bf16.mxu0 %v1545_v63 }
  0x54   :  { %764 = vmatmul.mubr.bf16.gmra.mxu1 %v1544_v0 }
  0x55   :  { %771 = vmatprep.mubr.bf16.mxu1 %v1549_v1 }
  0x5a   :  { %675 = vmatmul.mubr.bf16.gmra.mxu0 %v1547_v2  ;;  %v1565_v2 = vmov 0.0  }
  0x5b   :  { %1392 = vmatprep.mubr.msk.bf16.mxu0 %vm561_vm0, %v1553_v3  ;;  %1408 = vmatprep.subr.mxu1 %v1565_v2 }
  0x5c   :  { %772 = vmatmul.mubr.bf16.gmra.mxu1 %v1551_v4 }
  0x5d   :  { %1440 = vmatprep.mubr.msk.f32.mxu1 %vm1566_vm1, %v1565_v2 }
  0x62   :  { %1393 = vmatmul.mubr.msk.bf16.vlgmr.msra.gmra.mxu0 %vm561_vm0, %v1554_v5 }
  0x63   :  { %1396 = vmatprep.mubr.msk.bf16.mxu0 %vm561_vm0, %v1555_v6 }
  0x6a   :  { %1397 = vmatmul.mubr.msk.bf16.gmra.mxu0 %vm561_vm0, %v1556_v7 }
  0x6b   :  { %1400 = vmatprep.mubr.msk.bf16.mxu0 %vm561_vm0, %v1557_v8 }
  0x72   :  { %1401 = vmatmul.mubr.msk.bf16.gmra.mxu0 %vm561_vm0, %v1558_v9 }
  0x73   :  { %1404 = vmatprep.mubr.msk.bf16.mxu0 %vm561_vm0, %v1559_v10 }
  0x7a   :  { %1405 = vmatmul.mubr.msk.bf16.gmra.mxu0 %vm561_vm0, %v1560_v11 }
  0xe2   :  { %v1235_v12 = vpop.f32.mrf.mxu0 }
  0xe4   :  { %v1236_v14 = vpop.f32.mrf.mxu0  ;;  %v1299_v16 = vpop.f32.mrf.mxu1 }
  0xe5   :  { %v1237_v15 = vadd.f32 %v1236_v14, %v1235_v12 }
  0xe6   :  { %v1238_v17 = vpop.f32.mrf.mxu0  ;;  %v1300_v19 = vpop.f32.mrf.mxu1 }
  0xe7   :  { %v621_v18 = vadd.f32 %v1237_v15, %v1831_v13  ;;  %v1301_v20 = vadd.f32 %v1300_v19, %v1299_v16 }
  0xe8   :  { %v1239_v21 = vpop.f32.mrf.mxu0  ;;  %v1302_v23 = vpop.f32.mrf.mxu1 }
  0xe9   :  { %v1240_v22 = vadd.f32 %v1239_v21, %v1238_v17  ;;  %v1834_v25 = vadd.f32 %v1301_v20, %v621_v18 }
  0xea   :  { %v1241_v24 = vpop.f32.mrf.mxu0  ;;  %v1303_v26 = vpop.f32.mrf.mxu1 }
  0xeb   :  { %v624_v19 = vadd.f32 %v1240_v22, %v1831_v13  ;;  %v1304_v20 = vadd.f32 %v1303_v26, %v1302_v23 }
  0xec   :  { %v1242_v27 = vpop.f32.mrf.mxu0  ;;  %v1305_v29 = vpop.f32.mrf.mxu1 }
  0xed   :  { %v1243_v28 = vadd.f32 %v1242_v27, %v1241_v24 }
  0xee   :  { %v1244_v30 = vpop.f32.mrf.mxu0  ;;  %v1306_v31 = vpop.f32.mrf.mxu1 }
  0xef   :  { %v629_v27 = vadd.f32 %v1243_v28, %v1831_v13 }
  0xf0   :  { %v1245_v32 = vpop.f32.mrf.mxu0  ;;  %v1308_v34 = vpop.f32.mrf.mxu1 }
  0xf1   :  { %v1246_v33 = vadd.f32 %v1245_v32, %v1244_v30  ;;  %v1307_v30 = vadd.f32 %v1306_v31, %v1305_v29 }
  0xf2   :  { %v1247_v35 = vpop.f32.mrf.mxu0  ;;  %v1309_v36 = vpop.f32.mrf.mxu1 }
  0xf3   :  { %v632_v32 = vadd.f32 %v1246_v33, %v1831_v13 }
  0xf4   :  { %v1248_v37 = vpop.f32.mrf.mxu0  ;;  %v1311_v39 = vpop.f32.mrf.mxu1 }
  0xf5   :  { %v1249_v38 = vadd.f32 %v1248_v37, %v1247_v35  ;;  %v1310_v35 = vadd.f32 %v1309_v36, %v1308_v34 }
  0xf6   :  { %v1250_v40 = vpop.f32.mrf.mxu0  ;;  %v1312_v41 = vpop.f32.mrf.mxu1 }
  0xf7   :  { %v729_v26 = vadd.f32 %v1310_v35, %v632_v32 }
  0xf8   :  { %v1251_v42 = vpop.f32.mrf.mxu0  ;;  %v1314_v44 = vpop.f32.mrf.mxu1 }
  0xf9   :  { %v1252_v43 = vadd.f32 %v1251_v42, %v1250_v40  ;;  %v721_v42 = vadd.f32 %v1304_v20, %v624_v19 }
  0xfa   :  { %v1253_v45 = vpop.f32.mrf.mxu0  ;;  %v1315_v46 = vpop.f32.mrf.mxu1 }
  0xfb   :  { %v640_v29 = vadd.f32 %v1252_v43, %v1831_v13  ;;  %v1316_v31 = vadd.f32 %v1315_v46, %v1314_v44 }
  0xfc   :  { %v1254_v47 = vpop.f32.mrf.mxu0  ;;  %v1317_v49 = vpop.f32.mrf.mxu1 }
  0xfd   :  { %v1255_v48 = vadd.f32 %v1254_v47, %v1253_v45  ;;  %v637_v45 = vadd.f32 %v1249_v38, %v1831_v13  ;;  %v1313_v47 = vadd.f32 %v1312_v41, %v1311_v39 }
  0xfe   :  { %v1256_v50 = vpop.f32.mrf.mxu0  ;;  %v1318_v51 = vpop.f32.mrf.mxu1 }
  0xff   :  { %v645_v38 = vadd.f32 %v1255_v48, %v1831_v13  ;;  %v734_v39 = vadd.f32 %v1313_v47, %v637_v45  ;;  %v1319_v19 = vadd.f32 %v1318_v51, %v1317_v49  ;;  %v737_v49 = vadd.f32 %v1316_v31, %v640_v29 }
 0x100   :  { %v1257_v52 = vpop.f32.mrf.mxu0  ;;  %v1320_v54 = vpop.f32.mrf.mxu1 }
 0x101   :  { %v1258_v53 = vadd.f32 %v1257_v52, %v1256_v50  ;;  %v726_v52 = vadd.f32 %v1307_v30, %v629_v27  ;;  %v742_v35 = vadd.f32 %v1319_v19, %v645_v38 }
 0x102   :  { %v1259_v55 = vpop.f32.mrf.mxu0  ;;  %v1321_v56 = vpop.f32.mrf.mxu1 }
 0x103   :  { %v1322_v27 = vadd.f32 %v1321_v56, %v1320_v54 }
 0x104   :  { %v1260_v57 = vpop.f32.mrf.mxu0  ;;  %v1836_v58 = vpop.f32.mrf.mxu1 }
 0x105   :  { %v1261_v43 = vadd.f32 %v1260_v57, %v1259_v55 }
 0x106   :  { %v1262_v59 = vpop.f32.mrf.mxu0  ;;  %v1838_v60 = vpop.f32.mrf.mxu1 }
 0x107   :  { %v653_v54 = vadd.f32 %v1261_v43, %v1831_v13  ;;  %v1325_v55 = vadd.f32 %v1838_v60, %v1836_v58 }
 0x108   :  { %v1263_v61 = vpop.f32.mrf.mxu0  ;;  %v1840_v63 = vpop.f32.mrf.mxu1 }
 0x109   :  { %v1264_v46 = vadd.f32 %v1263_v61, %v1262_v59  ;;  %v750_v31 = vadd.f32 %v1325_v55, %v653_v54 }
 0x10a   :  { %v1265_v62 = vpop.f32.mrf.mxu0  ;;  %v1845_v3 = vpop.f32.mrf.mxu1 }
 0x10b   :  { %v656_v61 = vadd.f32 %v1264_v46, %v1831_v13 }
 0x10c   :  { %v1266_v0 = vpop.f32.mrf.mxu0  ;;  %v1849_v6 = vpop.f32.mrf.mxu1 }
 0x10d   :  { %v1267_v51 = vadd.f32 %v1266_v0, %v1265_v62  ;;  %v1328_v62 = vadd.f32 %v1845_v3, %v1840_v63 }
 0x10e   :  { %v1842_v1 = vpop.f32.mrf.mxu0  ;;  %v1855_v9 = vpop.f32.mrf.mxu1 }
 0x10f   :  { %v661_v47 = vadd.f32 %v1267_v51, %v1831_v13 }
 0x110   :  { %v1269_v4 = vpop.f32.mrf.mxu0  ;;  %v1861_v12 = vpop.f32.mrf.mxu1 }
 0x111   :  { %v1270_v56 = vadd.f32 %v1269_v4, %v1842_v1 }
 0x112   :  { %v1847_v5 = vpop.f32.mrf.mxu0  ;;  %v1867_v16 = vpop.f32.mrf.mxu1 }
 0x113   :  { %v1334_v63 = vadd.f32 %v1867_v16, %v1861_v12 }
 0x114   :  { %v1851_v7 = vpop.f32.mrf.mxu0  ;;  %v1872_v21 = vpop.f32.mrf.mxu1 }
 0x115   :  { %v1273_v58 = vadd.f32 %v1851_v7, %v1847_v5 }
 0x116   :  { %v1853_v8 = vpop.f32.mrf.mxu0  ;;  %v1876_v40 = vpop.f32.mrf.mxu1 }
 0x118   :  { %v1857_v10 = vpop.f32.mrf.mxu0  ;;  %v1338_v33 = vpop.f32.mrf.mxu1 }
 0x119   :  { %v1276_v3 = vadd.f32 %v1857_v10, %v1853_v8 }
 0x11a   :  { %v1859_v11 = vpop.f32.mrf.mxu0 }
 0x11b   :  { %v672_v12 = vadd.f32 %v1276_v3, %v1831_v13 }
 0x11c   :  { %v1863_v14 = vpop.f32.mrf.mxu0 }
 0x11d   :  { %v1279_v8 = vadd.f32 %v1863_v14, %v1859_v11 }
 0x11e   :  { %v1865_v15 = vpop.f32.mrf.mxu0 }
 0x120   :  { %v1869_v17 = vpop.f32.mrf.mxu0 }
 0x121   :  { %v1282_v14 = vadd.f32 %v1869_v17, %v1865_v15 }
 0x122   :  { %v1394_v18 = vpop.f32.mrf.mxu0 }
 0x123   :  { %v1885_v34 = vadd.f32 %v1394_v18, %v726_v52  ;;  %v1339_v18 = vpop.f32.mrf.mxu1  ;;  %v664_v52 = vadd.f32 %v1270_v56, %v1831_v13 }
 0x124   :  { %v814_v24 = vpop.f32.mrf.mxu0  ;;  %v1340_v19 = vadd.f32 %v1339_v18, %v1338_v33 }
 0x125   :  { %v1880_v22 = vadd.f32 %v814_v24, %v1834_v25  ;;  %v648_v24 = vadd.f32 %v1258_v53, %v1831_v13  ;;  %v1341_v0 = vpop.f32.mrf.mxu1  ;;  %v761_v10 = vadd.f32 %v1334_v63, %v664_v52 }
 0x126   :  { %v1395_v37 = vpop.f32.mrf.mxu0 }
 0x127   :  { %v1890_v25 = vadd.f32 %v1395_v37, %v729_v26  ;;  %v745_v57 = vadd.f32 %v1322_v27, %v648_v24 }
 0x128   :  { %v817_v50 = vpop.f32.mrf.mxu0 }
 0x129   :  { %v1882_v23 = vadd.f32 %v817_v50, %v721_v42  ;;  %v1331_v50 = vadd.f32 %v1855_v9, %v1849_v6  ;;  %v753_v6 = vadd.f32 %v1328_v62, %v656_v61  ;;  %v669_v9 = vadd.f32 %v1273_v58, %v1831_v13 }
 0x12a   :  { %v1398_v28 = vpop.f32.mrf.mxu0 }
 0x12b   :  { %v877_v36 = vadd.f32 %v1882_v23, %v1880_v22  ;;  %v1909_v42 = vadd.f32 %v1398_v28, %v742_v35  ;;  %v1342_v28 = vpop.f32.mrf.mxu1  ;;  %v758_v5 = vadd.f32 %v1331_v50, %v661_v47 }
 0x12c   :  { %v830_v41 = vpop.f32.mrf.mxu0  ;;  %v1343_v11 = vadd.f32 %v1342_v28, %v1341_v0 }
 0x12d   :  { %v878_v20 = vadd.f32 %v877_v36, %v1885_v34  ;;  %v1896_v30 = vadd.f32 %v830_v41, %v734_v39  ;;  %v1337_v36 = vadd.f32 %v1876_v40, %v1872_v21 }
 0x12e   :  { %v1399_v44 = vpop.f32.mrf.mxu0 }
 0x12f   :  { %v879_v48 = vadd.f32 %v878_v20, %v1890_v25  ;;  %v842_v1 = vadd.f32 %v1399_v44, %v745_v57  ;;  %v1344_v20 = vpop.f32.mrf.mxu1 }
 0x130   :  { %v833_v32 = vpop.f32.mrf.mxu0 }
 0x131   :  { %v880_v37 = vadd.f32 %v879_v48, %v1896_v30  ;;  %v1900_v53 = vadd.f32 %v833_v32, %v737_v49  ;;  %v766_v48 = vadd.f32 %v1337_v36, %v669_v9  ;;  %v677_v49 = vadd.f32 %v1279_v8, %v1831_v13  ;;  %v1345_v18 = vpop.f32.mrf.mxu1 }
 0x132   :  { %v1402_v59 = vpop.f32.mrf.mxu0  ;;  %v1346_v61 = vadd.f32 %v1345_v18, %v1344_v20 }
 0x133   :  { %v881_v45 = vadd.f32 %v880_v37, %v1900_v53  ;;  %v1933_v27 = vadd.f32 %v1402_v59, %v758_v5  ;;  %v769_v37 = vadd.f32 %v1340_v19, %v672_v12  ;;  %v680_v59 = vadd.f32 %v1282_v14, %v1831_v13 }
 0x134   :  { %v846_v60 = vpop.f32.mrf.mxu0  ;;  %v774_v62 = vadd.f32 %v1343_v11, %v677_v49 }
 0x135   :  { %v882_v4 = vadd.f32 %v881_v45, %v1909_v42  ;;  %v1926_v39 = vadd.f32 %v846_v60, %v750_v31  ;;  %v777_v15 = vadd.f32 %v1346_v61, %v680_v59 }
 0x136   :  { %v1403_v26 = vpop.f32.mrf.mxu0 }
 0x137   :  { %v883_v29 = vadd.f32 %v882_v4, %v842_v1  ;;  %v1937_v44 = vadd.f32 %v1403_v26, %v761_v10 }
 0x138   :  { %v849_v7 = vpop.f32.mrf.mxu0 }
 0x139   :  { %v884_v38 = vrot.slane %v883_v29, 4  ;;  %v1928_v41 = vadd.f32 %v849_v7, %v753_v6 }
 0x13a   :  { %v1406_v16 = vpop.f32.mrf.mxu0 }
 0x13b   :  { %v885_v24 = vadd.f32 %v884_v38, %v883_v29  ;;  %v890_v21 = vadd.f32 %v1928_v41, %v1926_v39  ;;  %v871_v47 = vadd.f32 %v1406_v16, %v774_v62 }
 0x13c   :  { %v862_v40 = vpop.f32.mrf.mxu0 }
 0x13d   :  { %v886_v43 = vrot.slane %v885_v24, 2  ;;  %v891_v46 = vadd.f32 %v890_v21, %v1933_v27  ;;  %v863_v32 = vadd.f32 %v862_v40, %v766_v48 }
 0x13e   :  { %v1407_v33 = vpop.f32.mrf.mxu0 }
 0x13f   :  { %v887_v51 = vadd.f32 %v886_v43, %v885_v24  ;;  %v892_v35 = vadd.f32 %v891_v46, %v1937_v44  ;;  %v874_v26 = vadd.f32 %v1407_v33, %v777_v15 }
 0x140   :  { %v865_v54 = vpop.f32.mrf.mxu0 }
 0x141   :  { %v888_v55 = vrot.slane %v887_v51, 1  ;;  %v893_v56 = vadd.f32 %v892_v35, %v863_v32  ;;  %v866_v57 = vadd.f32 %v865_v54, %v769_v37 }
 0x143   :  { %v889_v45 = vadd.f32 %v888_v55, %v887_v51  ;;  %v894_v0 = vadd.f32 %v893_v56, %v866_v57 }
 0x145   :  { %v904_v50 = vmul.f32 0.015625, %v889_v45  ;;  %v895_v17 = vadd.f32 %v894_v0, %v871_v47 }
 0x147   :  { %v1946_v58 = vsub.f32 %v1880_v22, %v904_v50  ;;  %v1949_v60 = vsub.f32 %v1882_v23, %v904_v50  ;;  %v1952_v4 = vsub.f32 %v1885_v34, %v904_v50  ;;  %v1955_v52 = vsub.f32 %v1890_v25, %v904_v50 }
 0x148   :  { %v1958_v13 = vsub.f32 %v1896_v30, %v904_v50  ;;  %v1961_v63 = vsub.f32 %v1900_v53, %v904_v50  ;;  %v1964_v3 = vsub.f32 %v1909_v42, %v904_v50  ;;  %v1966_v22 = vsub.f32 %v842_v1, %v904_v50 }
 0x149   :  { %v922_v23 = vmul.f32 %v1946_v58, %v1946_v58  ;;  %v923_v34 = vmul.f32 %v1949_v60, %v1949_v60  ;;  %v924_v25 = vmul.f32 %v1952_v4, %v1952_v4  ;;  %v896_v28 = vadd.f32 %v895_v17, %v874_v26 }
 0x14a   :  { %v925_v53 = vmul.f32 %v1955_v52, %v1955_v52  ;;  %v926_v1 = vmul.f32 %v1958_v13, %v1958_v13  ;;  %v927_v9 = vmul.f32 %v1961_v63, %v1961_v63  ;;  %v928_v36 = vmul.f32 %v1964_v3, %v1964_v3 }
 0x14b   :  { %v938_v30 = vadd.f32 %v923_v34, %v922_v23  ;;  %v897_v42 = vrot.slane %v896_v28, 4  ;;  %v929_v8 = vmul.f32 %v1966_v22, %v1966_v22 }
 0x14d   :  { %v939_v29 = vadd.f32 %v938_v30, %v924_v25  ;;  %v898_v6 = vadd.f32 %v897_v42, %v896_v28 }
 0x14f   :  { %v940_v31 = vadd.f32 %v939_v29, %v925_v53  ;;  %v899_v7 = vrot.slane %v898_v6, 2 }
 0x151   :  { %v941_v5 = vadd.f32 %v940_v31, %v926_v1  ;;  %v900_v12 = vadd.f32 %v899_v7, %v898_v6 }
 0x153   :  { %v942_v38 = vadd.f32 %v941_v5, %v927_v9  ;;  %v901_v16 = vrot.slane %v900_v12, 1 }
 0x155   :  { %v943_v10 = vadd.f32 %v942_v38, %v928_v36  ;;  %v902_v20 = vadd.f32 %v901_v16, %v900_v12 }
 0x157   :  { %v944_v19 = vadd.f32 %v943_v10, %v929_v8  ;;  %v905_v21 = vmul.f32 0.015625, %v902_v20 }
 0x159   :  { %v945_v24 = vrot.slane %v944_v19, 4  ;;  %v1985_v43 = vsub.f32 %v1926_v39, %v905_v21  ;;  %v1988_v46 = vsub.f32 %v1928_v41, %v905_v21  ;;  %v916_v48 = vsub.f32 %v1933_v27, %v905_v21 }
 0x15a   :  { %v917_v11 = vsub.f32 %v1937_v44, %v905_v21  ;;  %v918_v51 = vsub.f32 %v863_v32, %v905_v21  ;;  %v919_v54 = vsub.f32 %v866_v57, %v905_v21  ;;  %v920_v59 = vsub.f32 %v871_v47, %v905_v21 }
 0x15b   :  { %v946_v40 = vadd.f32 %v945_v24, %v944_v19  ;;  %v930_v14 = vmul.f32 %v1985_v43, %v1985_v43  ;;  %v931_v33 = vmul.f32 %v1988_v46, %v1988_v46  ;;  %v932_v35 = vmul.f32 %v916_v48, %v916_v48 }
 0x15c   :  { %v933_v55 = vmul.f32 %v917_v11, %v917_v11  ;;  %v934_v27 = vmul.f32 %v918_v51, %v918_v51  ;;  %v921_v44 = vsub.f32 %v874_v26, %v905_v21  ;;  %v935_v45 = vmul.f32 %v919_v54, %v919_v54 }
 0x15d   :  { %v947_v49 = vrot.slane %v946_v40, 2  ;;  %v951_v37 = vadd.f32 %v931_v33, %v930_v14  ;;  %v936_v15 = vmul.f32 %v920_v59, %v920_v59 }
 0x15e   :  { %v937_v23 = vmul.f32 %v921_v44, %v921_v44 }
 0x15f   :  { %v948_v18 = vadd.f32 %v947_v49, %v946_v40  ;;  %v952_v41 = vadd.f32 %v951_v37, %v932_v35  ;;  %v1003_v35 = vld [vmem:[%s2094_s3 + $0x8] sm:$0xff]  ;;  %v1004_v37 = vld [vmem:[%s2094_s3 + $0x10] sm:$0xff] }
 0x161   :  { %v949_v39 = vrot.slane %v948_v18, 1  ;;  %v953_v61 = vadd.f32 %v952_v41, %v933_v55  ;;  %v1007_v55 = vld [vmem:[%s2094_s3 + $0x28] sm:$0xff]  ;;  %v1008_v41 = vld [vmem:[%s2094_s3 + $0x30] sm:$0xff] }
 0x163   :  { %v950_v56 = vadd.f32 %v949_v39, %v948_v18  ;;  %v954_v0 = vadd.f32 %v953_v61, %v934_v27  ;;  %v1005_v39 = vld [vmem:[%s2094_s3 + $0x18] sm:$0xff] }
 0x165   :  { %v964_v62 = vmul.f32 0.015625, %v950_v56  ;;  %v955_v17 = vadd.f32 %v954_v0, %v935_v45  ;;  %v1009_v56 = vld [vmem:[%s2094_s3 + $0x38] sm:$0xff] }
 0x167   :  { %v966_v50 = vadd.f32 1e-05, %v964_v62  ;;  %v956_v32 = vadd.f32 %v955_v17, %v936_v15 }
 0x169   :  { %1561 = vrsqrt.f32 %v966_v50  ;;  %v957_v34 = vadd.f32 %v956_v32, %v937_v23 }
 0x16b   :  { %v958_v25 = vrot.slane %v957_v34, 4 }
 0x16d   :  { %v959_v30 = vadd.f32 %v958_v25, %v957_v34 }
 0x16f   :  { %v960_v57 = vrot.slane %v959_v30, 2 }
 0x171   :  { %v961_v28 = vadd.f32 %v960_v57, %v959_v30 }
 0x173   :  { %v962_v53 = vrot.slane %v961_v28, 1 }
 0x175   :  { %v963_v42 = vadd.f32 %v962_v53, %v961_v28 }
 0x176   :  { %v1562_v29 = vpop.eup %1561 }
 0x177   :  { %v975_v47 = vmul.f32 %v1562_v29, %v1961_v63  ;;  %v977_v26 = vmul.f32 %v1562_v29, %v1966_v22  ;;  %v976_v1 = vmul.f32 %v1562_v29, %v1964_v3  ;;  %v974_v31 = vmul.f32 %v1562_v29, %v1958_v13 }
 0x178   :  { %v973_v6 = vmul.f32 %v1562_v29, %v1955_v52  ;;  %v972_v9 = vmul.f32 %v1562_v29, %v1952_v4  ;;  %v971_v5 = vmul.f32 %v1562_v29, %v1949_v60  ;;  %v965_v7 = vmul.f32 0.015625, %v963_v42 }
 0x179   :  { %v970_v38 = vmul.f32 %v1562_v29, %v1946_v58  ;;  %v991_v49 = vmax.f32 %v975_v47, 0.0 }
 0x17a   :  { %v967_v36 = vadd.f32 1e-05, %v965_v7  ;;  %v988_v14 = vmax.f32 %v972_v9, 0.0  ;;  %v987_v33 = vmax.f32 %v971_v5, 0.0 }
 0x17b   :  { %v986_v18 = vmax.f32 %v970_v38, 0.0 }
 0x17c   :  { %1563 = vrsqrt.f32 %v967_v36 }
 0x189   :  { %v1564_v12 = vpop.eup %1563 }
 0x18a   :  { %v985_v63 = vmul.f32 %v1564_v12, %v921_v44  ;;  %v984_v8 = vmul.f32 %v1564_v12, %v920_v59  ;;  %v983_v10 = vmul.f32 %v1564_v12, %v919_v54  ;;  %v982_v16 = vmul.f32 %v1564_v12, %v918_v51  ;;  %v1002_v51 = vld [vmem:[%s2094_s3] sm:$0xff] }
 0x18b   :  { %v981_v4 = vmul.f32 %v1564_v12, %v917_v11  ;;  %v980_v13 = vmul.f32 %v1564_v12, %v916_v48  ;;  %v979_v19 = vmul.f32 %v1564_v12, %v1988_v46  ;;  %v978_v24 = vmul.f32 %v1564_v12, %v1985_v43  ;;  %v1006_v54 = vld [vmem:[%s2094_s3 + $0x20] sm:$0xff] }
 0x18c   :  { %v1001_v22 = vmax.f32 %v985_v63, 0.0  ;;  %v1000_v3 = vmax.f32 %v984_v8, 0.0  ;;  %v999_v52 = vmax.f32 %v983_v10, 0.0  ;;  %v998_v60 = vmax.f32 %v982_v16, 0.0  ;;  %v1010_v59 = vld [vmem:[%s2094_s3 + $0x40] sm:$0xff] }
 0x18d   :  { %v997_v58 = vmax.f32 %v981_v4, 0.0  ;;  %v996_v20 = vmax.f32 %v980_v13, 0.0  ;;  %v995_v21 = vmax.f32 %v979_v19, 0.0  ;;  %v994_v40 = vmax.f32 %v978_v24, 0.0 }
 0x18e   :  { %1409 = vmatpush3.msra.mxu1 %v1001_v22  ;;  %v993_v48 = vmax.f32 %v977_v26, 0.0  ;;  %v992_v46 = vmax.f32 %v976_v1, 0.0  ;;  %v990_v43 = vmax.f32 %v974_v31, 0.0  ;;  %v989_v11 = vmax.f32 %v973_v6, 0.0 }
 0x18f   :  { %1410 = vmatprep.subr.mxu1 %v1565_v2 }
 0x190   :  { %1411 = vmatpush3.msra.mxu1 %v1000_v3 }
 0x191   :  { %1412 = vmatprep.subr.mxu1 %v1565_v2 }
 0x192   :  { %1413 = vmatpush3.msra.mxu1 %v999_v52 }
 0x193   :  { %1414 = vmatprep.subr.mxu1 %v1565_v2 }
 0x194   :  { %1415 = vmatpush3.msra.mxu1 %v998_v60 }
 0x195   :  { %1416 = vmatprep.subr.mxu1 %v1565_v2 }
 0x196   :  { %1417 = vmatpush3.msra.mxu1 %v997_v58 }
 0x197   :  { %1418 = vmatprep.subr.mxu1 %v1565_v2 }
 0x198   :  { %1419 = vmatpush3.msra.mxu1 %v996_v20 }
 0x199   :  { %1420 = vmatprep.subr.mxu1 %v1565_v2 }
 0x19a   :  { %1421 = vmatpush3.msra.mxu1 %v995_v21 }
 0x19b   :  { %1422 = vmatprep.subr.mxu1 %v1565_v2 }
 0x19c   :  { %1423 = vmatpush3.msra.mxu1 %v994_v40 }
 0x19d   :  { %1424 = vmatprep.subr.mxu1 %v1565_v2 }
 0x19e   :  { %1425 = vmatpush3.msra.mxu1 %v993_v48 }
 0x19f   :  { %1426 = vmatprep.subr.mxu1 %v1565_v2 }
 0x1a0   :  { %1427 = vmatpush3.msra.mxu1 %v992_v46 }
 0x1a1   :  { %1428 = vmatprep.subr.mxu1 %v1565_v2 }
 0x1a2   :  { %1429 = vmatpush3.msra.mxu1 %v991_v49 }
 0x1a3   :  { %1430 = vmatprep.subr.mxu1 %v1565_v2 }
 0x1a4   :  { %1431 = vmatpush3.msra.mxu1 %v990_v43 }
 0x1a5   :  { %1432 = vmatprep.subr.mxu1 %v1565_v2 }
 0x1a6   :  { %1433 = vmatpush3.msra.mxu1 %v989_v11 }
 0x1a7   :  { %1434 = vmatprep.subr.mxu1 %v1565_v2 }
 0x1a8   :  { %1435 = vmatpush3.msra.mxu1 %v988_v14 }
 0x1a9   :  { %1436 = vmatprep.subr.mxu1 %v1565_v2 }
 0x1aa   :  { %1437 = vmatpush3.msra.mxu1 %v987_v33 }
 0x1ab   :  { %1438 = vmatprep.subr.mxu1 %v1565_v2 }
 0x1ac   :  { %1439 = vmatpush3.msra.mxu1 %v986_v18 }
 0x1ad   :  { %1441 = vmatmul.mubr.f32.vlgmr.msra.gmra.mxu1 %v1002_v51 }
 0x1ae   :  { %1443 = vmatprep.mubr.msk.f32.mxu1 %vm1566_vm1, %v1565_v2 }
 0x1b1   :  { %1444 = vmatmul.mubr.f32.gmra.mxu1 %v1003_v35 }
 0x1b2   :  { %1446 = vmatprep.mubr.msk.f32.mxu1 %vm1566_vm1, %v1565_v2 }
 0x1b5   :  { %1447 = vmatmul.mubr.f32.gmra.mxu1 %v1004_v37 }
 0x1b6   :  { %1449 = vmatprep.mubr.msk.f32.mxu1 %vm1566_vm1, %v1565_v2 }
 0x1b9   :  { %1450 = vmatmul.mubr.f32.gmra.mxu1 %v1005_v39 }
 0x1ba   :  { %1452 = vmatprep.mubr.msk.f32.mxu1 %vm1566_vm1, %v1565_v2 }
 0x1bd   :  { %1453 = vmatmul.mubr.f32.gmra.mxu1 %v1006_v54 }
 0x1be   :  { %1455 = vmatprep.mubr.msk.f32.mxu1 %vm1566_vm1, %v1565_v2 }
 0x1c1   :  { %1456 = vmatmul.mubr.f32.gmra.mxu1 %v1007_v55 }
 0x1c2   :  { %1458 = vmatprep.mubr.msk.f32.mxu1 %vm1566_vm1, %v1565_v2 }
 0x1c5   :  { %1459 = vmatmul.mubr.f32.gmra.mxu1 %v1008_v41 }
 0x1c6   :  { %1461 = vmatprep.mubr.msk.f32.mxu1 %vm1566_vm1, %v1565_v2 }
 0x1c9   :  { %1462 = vmatmul.mubr.f32.gmra.mxu1 %v1009_v56 }
 0x1ca   :  { %1464 = vmatprep.mubr.msk.f32.mxu1 %vm1566_vm1, %v1565_v2 }
 0x1cd   :  { %1465 = vmatmul.mubr.f32.gmra.mxu1 %v1010_v59 }
 0x26d   :  { %v1077_v27 = vpop.f32.mrf.mxu1 }
 0x26e   :  { %1121 = vst [vmem:[%s2095_s4] sm:$0xff] %v1077_v27 }
 0x26f   :  { %v1442_v61 = vpop.f32.mrf.mxu1 }
 0x271   :  { %v1082_v62 = vpop.f32.mrf.mxu1 }
 0x272   :  { %1122 = vst [vmem:[%s2095_s4 + $0x8] sm:$0xff] %v1082_v62 }
 0x273   :  { %v1445_v44 = vpop.f32.mrf.mxu1 }
 0x275   :  { %v1087_v45 = vpop.f32.mrf.mxu1 }
 0x276   :  { %1123 = vst [vmem:[%s2095_s4 + $0x10] sm:$0xff] %v1087_v45 }
 0x277   :  { %v1448_v2 = vpop.f32.mrf.mxu1 }
 0x279   :  { %v1092_v0 = vpop.f32.mrf.mxu1 }
 0x27a   :  { %1124 = vst [vmem:[%s2095_s4 + $0x18] sm:$0xff] %v1092_v0 }
 0x27b   :  { %v1451_v50 = vpop.f32.mrf.mxu1 }
 0x27d   :  { %v1097_v15 = vpop.f32.mrf.mxu1 }
 0x27e   :  { %1125 = vst [vmem:[%s2095_s4 + $0x20] sm:$0xff] %v1097_v15 }
 0x27f   :  { %v1454_v17 = vpop.f32.mrf.mxu1 }
 0x281   :  { %v1102_v23 = vpop.f32.mrf.mxu1 }
 0x282   :  { %1126 = vst [vmem:[%s2095_s4 + $0x28] sm:$0xff] %v1102_v23 }
 0x283   :  { %v1457_v32 = vpop.f32.mrf.mxu1 }
 0x285   :  { %v1107_v34 = vpop.f32.mrf.mxu1 }
 0x286   :  { %1127 = vst [vmem:[%s2095_s4 + $0x30] sm:$0xff] %v1107_v34 }
 0x287   :  { %v1460_v25 = vpop.f32.mrf.mxu1 }
 0x289   :  { %v1112_v30 = vpop.f32.mrf.mxu1 }
 0x28a   :  { %1128 = vst [vmem:[%s2095_s4 + $0x38] sm:$0xff] %v1112_v30 }
 0x28b   :  { %v1463_v57 = vpop.f32.mrf.mxu1 }
 0x28d   :  { %v1117_v28 = vpop.f32.mrf.mxu1 }
 0x28e   :  { %1129 = vst [vmem:[%s2095_s4 + $0x40] sm:$0xff] %v1117_v28 }
 0x28f   :  { %v1466_v53 = vpop.f32.mrf.mxu1 }

// kernel: transformer_forward.6
= control target key start
LH: loop header
LB: loop body
LE: loop exit
PB: predicated region body
PF: predicated region fallthrough
CT: control target
= control target key end

     0   :  { %v4463_v22 = vmov 1966171168   ;;  %v618_v24 = vlaneseq  ;;  %vm4465_vm0 = vmmov 0   ;;  %s5462_s1 = inlined_call_operand.vmem [shape: bf16[4608,128], index: 1, kind: input, shape index: {}]   ;;  %s5463_s0 = inlined_call_operand.vmem [shape: bf16[2,4608], index: 0, kind: input, shape index: {}]   ;;  %s5464_s2 = inlined_call_operand.vmem [shape: f32[1,128], index: 2, kind: input, shape index: {}]   ;;  %s5465_s3 = inlined_call_operand.vmem [shape: bf16[128,128], index: 3, kind: input, shape index: {}]   ;;  %s5466_s4 = inlined_call_operand.vmem [shape: f32[1,128], index: 4, kind: input, shape index: {}]   ;;  %s5467_s5 = inlined_call_operand.vmem [shape: f32[2,128], index: 5, kind: output, shape index: {}]  }
   0x1   :  { %v4163_v0 = vld [vmem:[%s5462_s1 + $0x78] sm:$0xff]   ;;  %v4167_v4 = vld [vmem:[%s5462_s1 + $0x70] sm:$0xff]   ;;  %v4171_v8 = vld [vmem:[%s5462_s1 + $0x68] sm:$0xff]   ;;  %v616_v23 = vunpack.c.l.s4 %v4463_v22 }
   0x2   :  { %v4164_v1 = vld [vmem:[%s5462_s1 + $0xf8] sm:$0xff]   ;;  %3735 = vmatprep.subr.bf16.mxu0 %v4163_v0  ;;  %v4168_v5 = vld [vmem:[%s5462_s1 + $0xf0] sm:$0xff]   ;;  %v4172_v9 = vld [vmem:[%s5462_s1 + $0xe8] sm:$0xff]   ;;  %v619_v30 = vshrl.u32 %v618_v24, 7 }
   0x3   :  { %v4165_v2 = vld [vmem:[%s5462_s1 + $0x38] sm:$0xff]   ;;  %3757 = vmatprep.subr.bf16.mxu1 %v4164_v1  ;;  %v4169_v6 = vld [vmem:[%s5462_s1 + $0x30] sm:$0xff]   ;;  %v4173_v10 = vld [vmem:[%s5462_s1 + $0x28] sm:$0xff]   ;;  %v617_v29 = vunpack.c.0.s8 %v616_v23 }
   0x4   :  { %v4166_v3 = vld [vmem:[%s5462_s1 + $0xb8] sm:$0xff]   ;;  %3736 = vmatpush3.bf16.msra.mxu0 %v4165_v2  ;;  %v4170_v7 = vld [vmem:[%s5462_s1 + $0xb0] sm:$0xff]   ;;  %v4174_v11 = vld [vmem:[%s5462_s1 + $0xa8] sm:$0xff]  }
   0x5   :  { %3758 = vmatpush3.bf16.msra.mxu1 %v4166_v3  ;;  %3737 = vmatprep.subr.bf16.mxu0 %v4167_v4  ;;  %v4175_v12 = vld [vmem:[%s5462_s1 + $0x60] sm:$0xff]   ;;  %v4179_v16 = vld [vmem:[%s5462_s1 + $0x58] sm:$0xff]   ;;  %v4183_v20 = vld [vmem:[%s5462_s1 + $0x50] sm:$0xff]   ;;  %v4586_v35 = vsub.s32 %v617_v29, %v619_v30 }
   0x6   :  { %3759 = vmatprep.subr.bf16.mxu1 %v4168_v5  ;;  %v4176_v13 = vld [vmem:[%s5462_s1 + $0xe0] sm:$0xff]   ;;  %v4180_v17 = vld [vmem:[%s5462_s1 + $0xd8] sm:$0xff]   ;;  %v4184_v21 = vld [vmem:[%s5462_s1 + $0xd0] sm:$0xff]  }
   0x7   :  { %v4177_v14 = vld [vmem:[%s5462_s1 + $0x20] sm:$0xff]   ;;  %v4181_v18 = vld [vmem:[%s5462_s1 + $0x18] sm:$0xff]   ;;  %v4185_v25 = vld [vmem:[%s5462_s1 + $0x10] sm:$0xff]  }
   0x8   :  { %3738 = vmatpush3.bf16.msra.mxu0 %v4169_v6  ;;  %v4178_v15 = vld [vmem:[%s5462_s1 + $0xa0] sm:$0xff]   ;;  %v4182_v19 = vld [vmem:[%s5462_s1 + $0x98] sm:$0xff]   ;;  %v4186_v26 = vld [vmem:[%s5462_s1 + $0x90] sm:$0xff]  }
   0x9   :  { %3760 = vmatpush3.bf16.msra.mxu1 %v4170_v7  ;;  %3739 = vmatprep.subr.bf16.mxu0 %v4171_v8  ;;  %v4187_v27 = vld [vmem:[%s5462_s1 + $0x48] sm:$0xff]   ;;  %v4191_v33 = vld [vmem:[%s5462_s1 + $0x40] sm:$0xff]   ;;  %v4196_v41 = vld [vmem:[%s5462_s1 + $0x178] sm:$0xff]  }
   0xa   :  { %3761 = vmatprep.subr.bf16.mxu1 %v4172_v9  ;;  %v4188_v28 = vld [vmem:[%s5462_s1 + $0xc8] sm:$0xff]   ;;  %v4192_v34 = vld [vmem:[%s5462_s1 + $0xc0] sm:$0xff]   ;;  %v4197_v42 = vld [vmem:[%s5462_s1 + $0x1f8] sm:$0xff]  }
   0xb   :  { %v4189_v31 = vld [vmem:[%s5462_s1 + $0x8] sm:$0xff]   ;;  %v4193_v36 = vld [vmem:[%s5462_s1] sm:$0xff]   ;;  %v4198_v46 = vld [vmem:[%s5462_s1 + $0x138] sm:$0xff]  }
   0xc   :  { %3740 = vmatpush3.bf16.msra.mxu0 %v4173_v10  ;;  %v4190_v32 = vld [vmem:[%s5462_s1 + $0x88] sm:$0xff]   ;;  %v4194_v37 = vld [vmem:[%s5462_s1 + $0x80] sm:$0xff]   ;;  %v4199_v48 = vld [vmem:[%s5462_s1 + $0x1b8] sm:$0xff]  }
   0xd   :  { %3762 = vmatpush3.bf16.msra.mxu1 %v4174_v11  ;;  %3741 = vmatprep.subr.bf16.mxu0 %v4175_v12  ;;  %v21_v38 = vld [vmem:[%s5463_s0] sm:$0xff]  ;;  %v4200_v51 = vld [vmem:[%s5462_s1 + $0x170] sm:$0xff]   ;;  %v4204_v58 = vld [vmem:[%s5462_s1 + $0x168] sm:$0xff]  }
   0xe   :  { %3763 = vmatprep.subr.bf16.mxu1 %v4176_v13  ;;  %v614_v39 = vcombine.high %v21_v38, %v21_v38  ;;  %v621_v40 = vrot.slane %v21_v38, %v4586_v35  ;;  %v4201_v53 = vld [vmem:[%s5462_s1 + $0x1f0] sm:$0xff]   ;;  %v4205_v59 = vld [vmem:[%s5462_s1 + $0x1e8] sm:$0xff]   ;;  %v4208_v62 = vld [vmem:[%s5462_s1 + $0x160] sm:$0xff]  }
   0xf   :  { %v4202_v55 = vld [vmem:[%s5462_s1 + $0x130] sm:$0xff]   ;;  %v4206_v60 = vld [vmem:[%s5462_s1 + $0x128] sm:$0xff]   ;;  %v4209_v63 = vld [vmem:[%s5462_s1 + $0x1e0] sm:$0xff]  }
  0x10   :  { %3742 = vmatpush3.bf16.msra.mxu0 %v4177_v14  ;;  %v629_v43 = vcombine.high %v621_v40, %v621_v40  ;;  %v637_v44 = vrot.slane %v621_v40, %v4586_v35  ;;  %v4606_v45 = vrot.slane %v614_v39, %v4586_v35  ;;  %v4203_v56 = vld [vmem:[%s5462_s1 + $0x1b0] sm:$0xff]   ;;  %v4207_v61 = vld [vmem:[%s5462_s1 + $0x1a8] sm:$0xff]   ;;  %v4210_v0 = vld [vmem:[%s5462_s1 + $0x120] sm:$0xff]  }
  0x11   :  { %3764 = vmatpush3.bf16.msra.mxu1 %v4178_v15  ;;  %3743 = vmatprep.subr.bf16.mxu0 %v4179_v16  ;;  %v4211_v1 = vld [vmem:[%s5462_s1 + $0x1a0] sm:$0xff]   ;;  %v4212_v2 = vld [vmem:[%s5462_s1 + $0x158] sm:$0xff]   ;;  %v4216_v6 = vld [vmem:[%s5462_s1 + $0x150] sm:$0xff]  }
  0x12   :  { %3765 = vmatprep.subr.bf16.mxu1 %v4180_v17  ;;  %v651_v47 = vrot.slane %v629_v43, %v4586_v35  ;;  %v630_v49 = vcombine.high %v4606_v45, %v4606_v45  ;;  %v659_v50 = vcombine.high %v637_v44, %v637_v44  ;;  %v4213_v3 = vld [vmem:[%s5462_s1 + $0x1d8] sm:$0xff]   ;;  %v4217_v7 = vld [vmem:[%s5462_s1 + $0x1d0] sm:$0xff]   ;;  %v4220_v10 = vld [vmem:[%s5462_s1 + $0x148] sm:$0xff]  }
  0x13   :  { %v4214_v4 = vld [vmem:[%s5462_s1 + $0x118] sm:$0xff]   ;;  %v4218_v8 = vld [vmem:[%s5462_s1 + $0x110] sm:$0xff]   ;;  %v4221_v11 = vld [vmem:[%s5462_s1 + $0x1c8] sm:$0xff]  }
  0x14   :  { %3744 = vmatpush3.bf16.msra.mxu0 %v4181_v18  ;;  %2630 = vmatprep.mubr.bf16.mxu0 %v651_v47  ;;  %v661_v52 = vcombine.high %v651_v47, %v651_v47  ;;  %v658_v54 = vrot.slane %v630_v49, %v4586_v35  ;;  %v4215_v5 = vld [vmem:[%s5462_s1 + $0x198] sm:$0xff]   ;;  %v4219_v9 = vld [vmem:[%s5462_s1 + $0x190] sm:$0xff]   ;;  %v4222_v12 = vld [vmem:[%s5462_s1 + $0x108] sm:$0xff]   ;;  %v644_v18 = vrot.slane %v4606_v45, %v4586_v35 }
  0x15   :  { %3766 = vmatpush3.bf16.msra.mxu1 %v4182_v19  ;;  %3745 = vmatprep.subr.bf16.mxu0 %v4183_v20  ;;  %v4223_v13 = vld [vmem:[%s5462_s1 + $0x188] sm:$0xff]   ;;  %v4224_v14 = vld [vmem:[%s5462_s1 + $0x140] sm:$0xff]   ;;  %v4228_v19 = vld [vmem:[%s5462_s1 + $0x278] sm:$0xff]  }
  0x16   :  { %3767 = vmatprep.subr.bf16.mxu1 %v4184_v21  ;;  %2670 = vmatprep.mubr.bf16.mxu1 %v661_v52  ;;  %v662_v57 = vcombine.high %v658_v54, %v658_v54  ;;  %v4225_v15 = vld [vmem:[%s5462_s1 + $0x1c0] sm:$0xff]   ;;  %v4229_v20 = vld [vmem:[%s5462_s1 + $0x2f8] sm:$0xff]   ;;  %v660_v23 = vcombine.high %v644_v18, %v644_v18  ;;  %v4232_v24 = vld [vmem:[%s5462_s1 + $0x270] sm:$0xff]  }
  0x17   :  { %v4226_v16 = vld [vmem:[%s5462_s1 + $0x100] sm:$0xff]   ;;  %v4230_v21 = vld [vmem:[%s5462_s1 + $0x238] sm:$0xff]   ;;  %v4237_v29 = vld [vmem:[%s5462_s1 + $0x2e8] sm:$0xff]  }
  0x18   :  { %3746 = vmatpush3.bf16.msra.mxu0 %v4185_v25  ;;  %v4227_v17 = vld [vmem:[%s5462_s1 + $0x180] sm:$0xff]   ;;  %v4231_v22 = vld [vmem:[%s5462_s1 + $0x2b8] sm:$0xff]   ;;  %v4233_v25 = vld [vmem:[%s5462_s1 + $0x2f0] sm:$0xff]  }
  0x19   :  { %3768 = vmatpush3.bf16.msra.mxu1 %v4186_v26  ;;  %3747 = vmatprep.subr.bf16.mxu0 %v4187_v27  ;;  %v4234_v26 = vld [vmem:[%s5462_s1 + $0x230] sm:$0xff]   ;;  %v4238_v30 = vld [vmem:[%s5462_s1 + $0x228] sm:$0xff]   ;;  %v4245_v38 = vld [vmem:[%s5462_s1 + $0x2d8] sm:$0xff]  }
  0x1a   :  { %3769 = vmatprep.subr.bf16.mxu1 %v4188_v28  ;;  %v4235_v27 = vld [vmem:[%s5462_s1 + $0x2b0] sm:$0xff]   ;;  %v4236_v28 = vld [vmem:[%s5462_s1 + $0x268] sm:$0xff]   ;;  %v4246_v39 = vld [vmem:[%s5462_s1 + $0x218] sm:$0xff]  }
  0x1b   :  { %v4247_v40 = vld [vmem:[%s5462_s1 + $0x298] sm:$0xff]   ;;  %v4250_v43 = vld [vmem:[%s5462_s1 + $0x210] sm:$0xff]   ;;  %v4252_v45 = vld [vmem:[%s5462_s1 + $0x248] sm:$0xff]  }
  0x1c   :  { %3748 = vmatpush3.bf16.msra.mxu0 %v4189_v31  ;;  %v4239_v31 = vld [vmem:[%s5462_s1 + $0x2a8] sm:$0xff]   ;;  %v4256_v49 = vld [vmem:[%s5462_s1 + $0x240] sm:$0xff]  }
  0x1d   :  { %3770 = vmatpush3.bf16.msra.mxu1 %v4190_v32  ;;  %3749 = vmatprep.subr.bf16.mxu0 %v4191_v33  ;;  %v4240_v32 = vld [vmem:[%s5462_s1 + $0x260] sm:$0xff]   ;;  %v4254_v47 = vld [vmem:[%s5462_s1 + $0x208] sm:$0xff]  }
  0x1e   :  { %3771 = vmatprep.subr.bf16.mxu1 %v4192_v34  ;;  %v4241_v33 = vld [vmem:[%s5462_s1 + $0x2e0] sm:$0xff]   ;;  %v22_v52 = vld [vmem:[%s5463_s0 + $0x8] sm:$0xff] }
  0x1f   :  { %v4242_v34 = vld [vmem:[%s5462_s1 + $0x220] sm:$0xff]  }
  0x20   :  { %3750 = vmatpush3.bf16.msra.mxu0 %v4193_v36  ;;  %v4243_v36 = vld [vmem:[%s5462_s1 + $0x2a0] sm:$0xff]  }
  0x21   :  { %3772 = vmatpush3.bf16.msra.mxu1 %v4194_v37  ;;  %3779 = vmatprep.subr.bf16.mxu0 %v4196_v41  ;;  %v4244_v37 = vld [vmem:[%s5462_s1 + $0x258] sm:$0xff]   ;;  %v4248_v41 = vld [vmem:[%s5462_s1 + $0x250] sm:$0xff]  }
  0x22   :  { %3801 = vmatprep.subr.bf16.mxu1 %v4197_v42  ;;  %v4249_v42 = vld [vmem:[%s5462_s1 + $0x2d0] sm:$0xff]  }
  0x23   :  { %2631 = vmatmul.mubr.bf16.vlgmr.msra.gmra.mxu0 %v637_v44  ;;  %v4251_v44 = vld [vmem:[%s5462_s1 + $0x290] sm:$0xff]  }
  0x24   :  { %3780 = vmatpush3.bf16.msra.mxu0 %v4198_v46  ;;  %2671 = vmatmul.mubr.bf16.vlgmr.msra.gmra.mxu1 %v659_v50  ;;  %v4253_v46 = vld [vmem:[%s5462_s1 + $0x2c8] sm:$0xff]   ;;  %v4257_v50 = vld [vmem:[%s5462_s1 + $0x2c0] sm:$0xff]  }
  0x25   :  { %3781 = vmatprep.subr.bf16.mxu0 %v4200_v51  ;;  %3802 = vmatpush3.bf16.msra.mxu1 %v4199_v48  ;;  %v4255_v48 = vld [vmem:[%s5462_s1 + $0x288] sm:$0xff]   ;;  %v4258_v51 = vld [vmem:[%s5462_s1 + $0x200] sm:$0xff]  }
  0x26   :  { %2710 = vmatprep.mubr.bf16.mxu0 %v658_v54  ;;  %3803 = vmatprep.subr.bf16.mxu1 %v4201_v53  ;;  %v4259_v53 = vld [vmem:[%s5462_s1 + $0x280] sm:$0xff]   ;;  %v670_v54 = vrot.slane %v22_v52, %v4586_v35 }
  0x27   :  { %2750 = vmatprep.mubr.bf16.mxu1 %v662_v57 }
  0x28   :  { %3782 = vmatpush3.bf16.msra.mxu0 %v4202_v55  ;;  %v663_v55 = vcombine.high %v22_v52, %v22_v52  ;;  %v678_v57 = vcombine.high %v670_v54, %v670_v54  ;;  %v4309_v52 = vld [vmem:[%s5462_s1 + $0x458] sm:$0xff]  }
  0x29   :  { %3783 = vmatprep.subr.bf16.mxu0 %v4204_v58  ;;  %3804 = vmatpush3.bf16.msra.mxu1 %v4203_v56  ;;  %v4260_v56 = vld [vmem:[%s5462_s1 + $0x378] sm:$0xff]   ;;  %v686_v58 = vrot.slane %v670_v54, %v4586_v35 }
  0x2a   :  { %3805 = vmatprep.subr.bf16.mxu1 %v4205_v59  ;;  %v4261_v59 = vld [vmem:[%s5462_s1 + $0x3f8] sm:$0xff]  }
  0x2b   :  { %v4311_v54 = vld [vmem:[%s5462_s1 + $0x418] sm:$0xff]  }
  0x2c   :  { %3784 = vmatpush3.bf16.msra.mxu0 %v4206_v60  ;;  %v4812_v60 = vrot.slane %v663_v55, %v4586_v35  ;;  %v4312_v55 = vld [vmem:[%s5462_s1 + $0x498] sm:$0xff]  }
  0x2d   :  { %3785 = vmatprep.subr.bf16.mxu0 %v4208_v62  ;;  %3806 = vmatpush3.bf16.msra.mxu1 %v4207_v61  ;;  %v4262_v61 = vld [vmem:[%s5462_s1 + $0x338] sm:$0xff]   ;;  %v700_v62 = vrot.slane %v678_v57, %v4586_v35  ;;  %v4314_v57 = vld [vmem:[%s5462_s1 + $0x4d0] sm:$0xff]  }
  0x2e   :  { %3807 = vmatprep.subr.bf16.mxu1 %v4209_v63  ;;  %v4263_v63 = vld [vmem:[%s5462_s1 + $0x3b8] sm:$0xff]  }
  0x30   :  { %3786 = vmatpush3.bf16.msra.mxu0 %v4210_v0  ;;  %v679_v0 = vcombine.high %v4812_v60, %v4812_v60 }
  0x31   :  { %3787 = vmatprep.subr.bf16.mxu0 %v4212_v2  ;;  %3808 = vmatpush3.bf16.msra.mxu1 %v4211_v1  ;;  %v708_v1 = vcombine.high %v686_v58, %v686_v58  ;;  %v4264_v2 = vld [vmem:[%s5462_s1 + $0x370] sm:$0xff]  }
  0x32   :  { %3809 = vmatprep.subr.bf16.mxu1 %v4213_v3  ;;  %v710_v3 = vcombine.high %v700_v62, %v700_v62 }
  0x34   :  { %3788 = vmatpush3.bf16.msra.mxu0 %v4214_v4  ;;  %v4265_v4 = vld [vmem:[%s5462_s1 + $0x3f0] sm:$0xff]  }
  0x35   :  { %3789 = vmatprep.subr.bf16.mxu0 %v4216_v6  ;;  %3810 = vmatpush3.bf16.msra.mxu1 %v4215_v5  ;;  %v707_v5 = vrot.slane %v679_v0, %v4586_v35  ;;  %v4266_v6 = vld [vmem:[%s5462_s1 + $0x330] sm:$0xff]   ;;  %v4321_v0 = vld [vmem:[%s5462_s1 + $0x440] sm:$0xff]  }
  0x36   :  { %3811 = vmatprep.subr.bf16.mxu1 %v4217_v7  ;;  %v4267_v7 = vld [vmem:[%s5462_s1 + $0x3b0] sm:$0xff]  }
  0x38   :  { %3790 = vmatpush3.bf16.msra.mxu0 %v4218_v8  ;;  %v711_v8 = vcombine.high %v707_v5, %v707_v5 }
  0x39   :  { %3791 = vmatprep.subr.bf16.mxu0 %v4220_v10  ;;  %3812 = vmatpush3.bf16.msra.mxu1 %v4219_v9  ;;  %v4268_v9 = vld [vmem:[%s5462_s1 + $0x368] sm:$0xff]  }
  0x3a   :  { %3813 = vmatprep.subr.bf16.mxu1 %v4221_v11  ;;  %v4269_v10 = vld [vmem:[%s5462_s1 + $0x3e8] sm:$0xff]  }
  0x3b   :  { %v4270_v11 = vld [vmem:[%s5462_s1 + $0x328] sm:$0xff]  }
  0x3c   :  { %3792 = vmatpush3.bf16.msra.mxu0 %v4222_v12  ;;  %v4271_v12 = vld [vmem:[%s5462_s1 + $0x3a8] sm:$0xff]  }
  0x3d   :  { %3793 = vmatprep.subr.bf16.mxu0 %v4224_v14  ;;  %3814 = vmatpush3.bf16.msra.mxu1 %v4223_v13  ;;  %v4272_v13 = vld [vmem:[%s5462_s1 + $0x360] sm:$0xff]  }
  0x3e   :  { %3815 = vmatprep.subr.bf16.mxu1 %v4225_v15  ;;  %v4273_v14 = vld [vmem:[%s5462_s1 + $0x3e0] sm:$0xff]  }
  0x3f   :  { %v4274_v15 = vld [vmem:[%s5462_s1 + $0x320] sm:$0xff]  }
  0x40   :  { %3794 = vmatpush3.bf16.msra.mxu0 %v4226_v16  ;;  %v4275_v16 = vld [vmem:[%s5462_s1 + $0x3a0] sm:$0xff]  }
  0x41   :  { %3823 = vmatprep.subr.bf16.mxu0 %v4228_v19  ;;  %3816 = vmatpush3.bf16.msra.mxu1 %v4227_v17  ;;  %v4276_v17 = vld [vmem:[%s5462_s1 + $0x358] sm:$0xff]  }
  0x42   :  { %3845 = vmatprep.subr.bf16.mxu1 %v4229_v20  ;;  %v4278_v19 = vld [vmem:[%s5462_s1 + $0x318] sm:$0xff]  }
  0x43   :  { %2711 = vmatmul.mubr.bf16.vlgmr.msra.gmra.mxu0 %v644_v18  ;;  %v4277_v18 = vld [vmem:[%s5462_s1 + $0x3d8] sm:$0xff]  }
  0x44   :  { %3824 = vmatpush3.bf16.msra.mxu0 %v4230_v21  ;;  %2751 = vmatmul.mubr.bf16.vlgmr.msra.gmra.mxu1 %v660_v23  ;;  %v4279_v20 = vld [vmem:[%s5462_s1 + $0x398] sm:$0xff]   ;;  %v4280_v21 = vld [vmem:[%s5462_s1 + $0x350] sm:$0xff]  }
  0x45   :  { %3825 = vmatprep.subr.bf16.mxu0 %v4232_v24  ;;  %3846 = vmatpush3.bf16.msra.mxu1 %v4231_v22  ;;  %v4281_v22 = vld [vmem:[%s5462_s1 + $0x3d0] sm:$0xff]  }
  0x46   :  { %3847 = vmatprep.subr.bf16.mxu1 %v4233_v25  ;;  %2790 = vmatprep.mubr.bf16.mxu0 %v700_v62  ;;  %v4282_v23 = vld [vmem:[%s5462_s1 + $0x310] sm:$0xff]   ;;  %v4284_v25 = vld [vmem:[%s5462_s1 + $0x348] sm:$0xff]  }
  0x47   :  { %2830 = vmatprep.mubr.bf16.mxu1 %v710_v3  ;;  %v4283_v24 = vld [vmem:[%s5462_s1 + $0x390] sm:$0xff]   ;;  %v4319_v62 = vld [vmem:[%s5462_s1 + $0x408] sm:$0xff]  }
  0x48   :  { %3826 = vmatpush3.bf16.msra.mxu0 %v4234_v26  ;;  %v4285_v26 = vld [vmem:[%s5462_s1 + $0x3c8] sm:$0xff]   ;;  %v23_v3 = vld [vmem:[%s5463_s0 + $0x10] sm:$0xff] }
  0x49   :  { %3827 = vmatprep.subr.bf16.mxu0 %v4236_v28  ;;  %3848 = vmatpush3.bf16.msra.mxu1 %v4235_v27  ;;  %v4286_v27 = vld [vmem:[%s5462_s1 + $0x308] sm:$0xff]  }
  0x4a   :  { %3849 = vmatprep.subr.bf16.mxu1 %v4237_v29  ;;  %v4287_v28 = vld [vmem:[%s5462_s1 + $0x388] sm:$0xff]   ;;  %v4288_v29 = vld [vmem:[%s5462_s1 + $0x340] sm:$0xff]  }
  0x4c   :  { %3828 = vmatpush3.bf16.msra.mxu0 %v4238_v30  ;;  %v4289_v30 = vld [vmem:[%s5462_s1 + $0x3c0] sm:$0xff]  }
  0x4d   :  { %3829 = vmatprep.subr.bf16.mxu0 %v4240_v32  ;;  %3850 = vmatpush3.bf16.msra.mxu1 %v4239_v31  ;;  %v4290_v31 = vld [vmem:[%s5462_s1 + $0x300] sm:$0xff]  }
  0x4e   :  { %3851 = vmatprep.subr.bf16.mxu1 %v4241_v33  ;;  %v4291_v32 = vld [vmem:[%s5462_s1 + $0x380] sm:$0xff]   ;;  %v693_v33 = vrot.slane %v4812_v60, %v4586_v35  ;;  %v4317_v60 = vld [vmem:[%s5462_s1 + $0x448] sm:$0xff]  }
  0x50   :  { %3830 = vmatpush3.bf16.msra.mxu0 %v4242_v34  ;;  %v4293_v34 = vld [vmem:[%s5462_s1 + $0x478] sm:$0xff]  }
  0x51   :  { %3831 = vmatprep.subr.bf16.mxu0 %v4244_v37  ;;  %3852 = vmatpush3.bf16.msra.mxu1 %v4243_v36  ;;  %v4294_v36 = vld [vmem:[%s5462_s1 + $0x4f8] sm:$0xff]  }
  0x52   :  { %3853 = vmatprep.subr.bf16.mxu1 %v4245_v38  ;;  %v4295_v37 = vld [vmem:[%s5462_s1 + $0x438] sm:$0xff]  }
  0x53   :  { %v4296_v38 = vld [vmem:[%s5462_s1 + $0x4b8] sm:$0xff]  }
  0x54   :  { %3832 = vmatpush3.bf16.msra.mxu0 %v4246_v39  ;;  %v709_v39 = vcombine.high %v693_v33, %v693_v33 }
  0x55   :  { %3833 = vmatprep.subr.bf16.mxu0 %v4248_v41  ;;  %3854 = vmatpush3.bf16.msra.mxu1 %v4247_v40  ;;  %v4297_v40 = vld [vmem:[%s5462_s1 + $0x470] sm:$0xff]  }
  0x56   :  { %3855 = vmatprep.subr.bf16.mxu1 %v4249_v42  ;;  %v4298_v41 = vld [vmem:[%s5462_s1 + $0x4f0] sm:$0xff]  }
  0x57   :  { %v4299_v42 = vld [vmem:[%s5462_s1 + $0x430] sm:$0xff]  }
  0x58   :  { %3834 = vmatpush3.bf16.msra.mxu0 %v4250_v43  ;;  %v4300_v43 = vld [vmem:[%s5462_s1 + $0x4b0] sm:$0xff]  }
  0x59   :  { %3835 = vmatprep.subr.bf16.mxu0 %v4252_v45  ;;  %3856 = vmatpush3.bf16.msra.mxu1 %v4251_v44  ;;  %v4301_v44 = vld [vmem:[%s5462_s1 + $0x468] sm:$0xff]  }
  0x5a   :  { %3857 = vmatprep.subr.bf16.mxu1 %v4253_v46  ;;  %v4302_v45 = vld [vmem:[%s5462_s1 + $0x4e8] sm:$0xff]  }
  0x5b   :  { %v4303_v46 = vld [vmem:[%s5462_s1 + $0x428] sm:$0xff]  }
  0x5c   :  { %3836 = vmatpush3.bf16.msra.mxu0 %v4254_v47  ;;  %v4304_v47 = vld [vmem:[%s5462_s1 + $0x4a8] sm:$0xff]  }
  0x5d   :  { %3837 = vmatprep.subr.bf16.mxu0 %v4256_v49  ;;  %3858 = vmatpush3.bf16.msra.mxu1 %v4255_v48  ;;  %v4305_v48 = vld [vmem:[%s5462_s1 + $0x460] sm:$0xff]  }
  0x5e   :  { %3859 = vmatprep.subr.bf16.mxu1 %v4257_v50  ;;  %v4306_v49 = vld [vmem:[%s5462_s1 + $0x4e0] sm:$0xff]  }
  0x5f   :  { %v4307_v50 = vld [vmem:[%s5462_s1 + $0x420] sm:$0xff]  }
  0x60   :  { %3838 = vmatpush3.bf16.msra.mxu0 %v4258_v51  ;;  %v4308_v51 = vld [vmem:[%s5462_s1 + $0x4a0] sm:$0xff]  }
  0x61   :  { %3867 = vmatprep.subr.bf16.mxu0 %v4260_v56  ;;  %3860 = vmatpush3.bf16.msra.mxu1 %v4259_v53  ;;  %v4310_v53 = vld [vmem:[%s5462_s1 + $0x4d8] sm:$0xff]   ;;  %v4313_v56 = vld [vmem:[%s5462_s1 + $0x450] sm:$0xff]  }
  0x62   :  { %3889 = vmatprep.subr.bf16.mxu1 %v4261_v59  ;;  %v4316_v59 = vld [vmem:[%s5462_s1 + $0x490] sm:$0xff]  }
  0x63   :  { %2791 = vmatmul.mubr.bf16.vlgmr.msra.gmra.mxu0 %v686_v58  ;;  %v4315_v58 = vld [vmem:[%s5462_s1 + $0x410] sm:$0xff]  }
  0x64   :  { %3868 = vmatpush3.bf16.msra.mxu0 %v4262_v61  ;;  %2831 = vmatmul.mubr.bf16.vlgmr.msra.gmra.mxu1 %v708_v1  ;;  %v4318_v61 = vld [vmem:[%s5462_s1 + $0x4c8] sm:$0xff]   ;;  %v4322_v1 = vld [vmem:[%s5462_s1 + $0x4c0] sm:$0xff]  }
  0x65   :  { %3869 = vmatprep.subr.bf16.mxu0 %v4264_v2  ;;  %3890 = vmatpush3.bf16.msra.mxu1 %v4263_v63  ;;  %v4320_v63 = vld [vmem:[%s5462_s1 + $0x488] sm:$0xff]   ;;  %v4323_v2 = vld [vmem:[%s5462_s1 + $0x400] sm:$0xff]  }
  0x66   :  { %2870 = vmatprep.mubr.bf16.mxu0 %v707_v5  ;;  %3891 = vmatprep.subr.bf16.mxu1 %v4265_v4  ;;  %v4324_v4 = vld [vmem:[%s5462_s1 + $0x480] sm:$0xff]   ;;  %v719_v5 = vrot.slane %v23_v3, %v4586_v35 }
  0x67   :  { %2910 = vmatprep.mubr.bf16.mxu1 %v711_v8 }
  0x68   :  { %3870 = vmatpush3.bf16.msra.mxu0 %v4266_v6  ;;  %v712_v6 = vcombine.high %v23_v3, %v23_v3  ;;  %v727_v8 = vcombine.high %v719_v5, %v719_v5  ;;  %v4374_v3 = vld [vmem:[%s5462_s1 + $0x658] sm:$0xff]  }
  0x69   :  { %3871 = vmatprep.subr.bf16.mxu0 %v4268_v9  ;;  %3892 = vmatpush3.bf16.msra.mxu1 %v4267_v7  ;;  %v4325_v7 = vld [vmem:[%s5462_s1 + $0x578] sm:$0xff]   ;;  %v735_v9 = vrot.slane %v719_v5, %v4586_v35 }
  0x6a   :  { %3893 = vmatprep.subr.bf16.mxu1 %v4269_v10  ;;  %v4326_v10 = vld [vmem:[%s5462_s1 + $0x5f8] sm:$0xff]  }
  0x6b   :  { %v4376_v5 = vld [vmem:[%s5462_s1 + $0x618] sm:$0xff]  }
  0x6c   :  { %3872 = vmatpush3.bf16.msra.mxu0 %v4270_v11  ;;  %v5018_v11 = vrot.slane %v712_v6, %v4586_v35  ;;  %v4377_v6 = vld [vmem:[%s5462_s1 + $0x698] sm:$0xff]  }
  0x6d   :  { %3873 = vmatprep.subr.bf16.mxu0 %v4272_v13  ;;  %3894 = vmatpush3.bf16.msra.mxu1 %v4271_v12  ;;  %v4327_v12 = vld [vmem:[%s5462_s1 + $0x538] sm:$0xff]   ;;  %v749_v13 = vrot.slane %v727_v8, %v4586_v35  ;;  %v4379_v8 = vld [vmem:[%s5462_s1 + $0x6d0] sm:$0xff]  }
  0x6e   :  { %3895 = vmatprep.subr.bf16.mxu1 %v4273_v14  ;;  %v4328_v14 = vld [vmem:[%s5462_s1 + $0x5b8] sm:$0xff]  }
  0x70   :  { %3874 = vmatpush3.bf16.msra.mxu0 %v4274_v15  ;;  %v728_v15 = vcombine.high %v5018_v11, %v5018_v11 }
  0x71   :  { %3875 = vmatprep.subr.bf16.mxu0 %v4276_v17  ;;  %3896 = vmatpush3.bf16.msra.mxu1 %v4275_v16  ;;  %v757_v16 = vcombine.high %v735_v9, %v735_v9  ;;  %v4329_v17 = vld [vmem:[%s5462_s1 + $0x570] sm:$0xff]  }
  0x72   :  { %3897 = vmatprep.subr.bf16.mxu1 %v4277_v18  ;;  %v759_v18 = vcombine.high %v749_v13, %v749_v13 }
  0x74   :  { %3876 = vmatpush3.bf16.msra.mxu0 %v4278_v19  ;;  %v4330_v19 = vld [vmem:[%s5462_s1 + $0x5f0] sm:$0xff]  }
  0x75   :  { %3877 = vmatprep.subr.bf16.mxu0 %v4280_v21  ;;  %3898 = vmatpush3.bf16.msra.mxu1 %v4279_v20  ;;  %v756_v20 = vrot.slane %v728_v15, %v4586_v35  ;;  %v4331_v21 = vld [vmem:[%s5462_s1 + $0x530] sm:$0xff]   ;;  %v4386_v15 = vld [vmem:[%s5462_s1 + $0x640] sm:$0xff]  }
  0x76   :  { %3899 = vmatprep.subr.bf16.mxu1 %v4281_v22  ;;  %v4332_v22 = vld [vmem:[%s5462_s1 + $0x5b0] sm:$0xff]  }
  0x78   :  { %3878 = vmatpush3.bf16.msra.mxu0 %v4282_v23  ;;  %v760_v23 = vcombine.high %v756_v20, %v756_v20 }
  0x79   :  { %3879 = vmatprep.subr.bf16.mxu0 %v4284_v25  ;;  %3900 = vmatpush3.bf16.msra.mxu1 %v4283_v24  ;;  %v4333_v24 = vld [vmem:[%s5462_s1 + $0x568] sm:$0xff]  }
  0x7a   :  { %3901 = vmatprep.subr.bf16.mxu1 %v4285_v26  ;;  %v4334_v25 = vld [vmem:[%s5462_s1 + $0x5e8] sm:$0xff]  }
  0x7b   :  { %v4335_v26 = vld [vmem:[%s5462_s1 + $0x528] sm:$0xff]  }
  0x7c   :  { %3880 = vmatpush3.bf16.msra.mxu0 %v4286_v27  ;;  %v4336_v27 = vld [vmem:[%s5462_s1 + $0x5a8] sm:$0xff]  }
  0x7d   :  { %3881 = vmatprep.subr.bf16.mxu0 %v4288_v29  ;;  %3902 = vmatpush3.bf16.msra.mxu1 %v4287_v28  ;;  %v4337_v28 = vld [vmem:[%s5462_s1 + $0x560] sm:$0xff]  }
  0x7e   :  { %3903 = vmatprep.subr.bf16.mxu1 %v4289_v30  ;;  %v4338_v29 = vld [vmem:[%s5462_s1 + $0x5e0] sm:$0xff]  }
  0x7f   :  { %v4339_v30 = vld [vmem:[%s5462_s1 + $0x520] sm:$0xff]  }
  0x80   :  { %3882 = vmatpush3.bf16.msra.mxu0 %v4290_v31  ;;  %v4340_v31 = vld [vmem:[%s5462_s1 + $0x5a0] sm:$0xff]  }
  0x81   :  { %3911 = vmatprep.subr.bf16.mxu0 %v4293_v34  ;;  %3904 = vmatpush3.bf16.msra.mxu1 %v4291_v32  ;;  %v4341_v32 = vld [vmem:[%s5462_s1 + $0x558] sm:$0xff]  }
  0x82   :  { %3933 = vmatprep.subr.bf16.mxu1 %v4294_v36  ;;  %v4343_v34 = vld [vmem:[%s5462_s1 + $0x518] sm:$0xff]  }
  0x83   :  { %2871 = vmatmul.mubr.bf16.vlgmr.msra.gmra.mxu0 %v693_v33  ;;  %v4342_v33 = vld [vmem:[%s5462_s1 + $0x5d8] sm:$0xff]  }
  0x84   :  { %3912 = vmatpush3.bf16.msra.mxu0 %v4295_v37  ;;  %2911 = vmatmul.mubr.bf16.vlgmr.msra.gmra.mxu1 %v709_v39  ;;  %v4344_v36 = vld [vmem:[%s5462_s1 + $0x598] sm:$0xff]   ;;  %v4345_v37 = vld [vmem:[%s5462_s1 + $0x550] sm:$0xff]  }
  0x85   :  { %3913 = vmatprep.subr.bf16.mxu0 %v4297_v40  ;;  %3934 = vmatpush3.bf16.msra.mxu1 %v4296_v38  ;;  %v4346_v38 = vld [vmem:[%s5462_s1 + $0x5d0] sm:$0xff]  }
  0x86   :  { %3935 = vmatprep.subr.bf16.mxu1 %v4298_v41  ;;  %2950 = vmatprep.mubr.bf16.mxu0 %v749_v13  ;;  %v4347_v39 = vld [vmem:[%s5462_s1 + $0x510] sm:$0xff]   ;;  %v4349_v41 = vld [vmem:[%s5462_s1 + $0x548] sm:$0xff]  }
  0x87   :  { %2990 = vmatprep.mubr.bf16.mxu1 %v759_v18  ;;  %v4348_v40 = vld [vmem:[%s5462_s1 + $0x590] sm:$0xff]   ;;  %v4384_v13 = vld [vmem:[%s5462_s1 + $0x608] sm:$0xff]   ;;  %v24_v18 = vld [vmem:[%s5463_s0 + $0x18] sm:$0xff] }
  0x88   :  { %3914 = vmatpush3.bf16.msra.mxu0 %v4299_v42  ;;  %v4350_v42 = vld [vmem:[%s5462_s1 + $0x5c8] sm:$0xff]  }
  0x89   :  { %3915 = vmatprep.subr.bf16.mxu0 %v4301_v44  ;;  %3936 = vmatpush3.bf16.msra.mxu1 %v4300_v43  ;;  %v4351_v43 = vld [vmem:[%s5462_s1 + $0x508] sm:$0xff]  }
  0x8a   :  { %3937 = vmatprep.subr.bf16.mxu1 %v4302_v45  ;;  %v4352_v44 = vld [vmem:[%s5462_s1 + $0x588] sm:$0xff]   ;;  %v4353_v45 = vld [vmem:[%s5462_s1 + $0x540] sm:$0xff]  }
  0x8c   :  { %3916 = vmatpush3.bf16.msra.mxu0 %v4303_v46  ;;  %v4354_v46 = vld [vmem:[%s5462_s1 + $0x5c0] sm:$0xff]  }
  0x8d   :  { %3917 = vmatprep.subr.bf16.mxu0 %v4305_v48  ;;  %3938 = vmatpush3.bf16.msra.mxu1 %v4304_v47  ;;  %v4355_v47 = vld [vmem:[%s5462_s1 + $0x500] sm:$0xff]  }
  0x8e   :  { %3939 = vmatprep.subr.bf16.mxu1 %v4306_v49  ;;  %v4356_v48 = vld [vmem:[%s5462_s1 + $0x580] sm:$0xff]   ;;  %v742_v49 = vrot.slane %v5018_v11, %v4586_v35  ;;  %v4382_v11 = vld [vmem:[%s5462_s1 + $0x648] sm:$0xff]  }
  0x90   :  { %3918 = vmatpush3.bf16.msra.mxu0 %v4307_v50  ;;  %v4358_v50 = vld [vmem:[%s5462_s1 + $0x678] sm:$0xff]  }
  0x91   :  { %3919 = vmatprep.subr.bf16.mxu0 %v4309_v52  ;;  %3940 = vmatpush3.bf16.msra.mxu1 %v4308_v51  ;;  %v4359_v51 = vld [vmem:[%s5462_s1 + $0x6f8] sm:$0xff]  }
  0x92   :  { %3941 = vmatprep.subr.bf16.mxu1 %v4310_v53  ;;  %v4360_v52 = vld [vmem:[%s5462_s1 + $0x638] sm:$0xff]  }
  0x93   :  { %v4361_v53 = vld [vmem:[%s5462_s1 + $0x6b8] sm:$0xff]  }
  0x94   :  { %3920 = vmatpush3.bf16.msra.mxu0 %v4311_v54  ;;  %v758_v54 = vcombine.high %v742_v49, %v742_v49 }
  0x95   :  { %3921 = vmatprep.subr.bf16.mxu0 %v4313_v56  ;;  %3942 = vmatpush3.bf16.msra.mxu1 %v4312_v55  ;;  %v4362_v55 = vld [vmem:[%s5462_s1 + $0x670] sm:$0xff]  }
  0x96   :  { %3943 = vmatprep.subr.bf16.mxu1 %v4314_v57  ;;  %v4363_v56 = vld [vmem:[%s5462_s1 + $0x6f0] sm:$0xff]  }
  0x97   :  { %v4364_v57 = vld [vmem:[%s5462_s1 + $0x630] sm:$0xff]  }
  0x98   :  { %3922 = vmatpush3.bf16.msra.mxu0 %v4315_v58  ;;  %v4365_v58 = vld [vmem:[%s5462_s1 + $0x6b0] sm:$0xff]  }
  0x99   :  { %3923 = vmatprep.subr.bf16.mxu0 %v4317_v60  ;;  %3944 = vmatpush3.bf16.msra.mxu1 %v4316_v59  ;;  %v4366_v59 = vld [vmem:[%s5462_s1 + $0x668] sm:$0xff]  }
  0x9a   :  { %3945 = vmatprep.subr.bf16.mxu1 %v4318_v61  ;;  %v4367_v60 = vld [vmem:[%s5462_s1 + $0x6e8] sm:$0xff]  }
  0x9b   :  { %v4368_v61 = vld [vmem:[%s5462_s1 + $0x628] sm:$0xff]  }
  0x9c   :  { %3924 = vmatpush3.bf16.msra.mxu0 %v4319_v62  ;;  %v4369_v62 = vld [vmem:[%s5462_s1 + $0x6a8] sm:$0xff]  }
  0x9d   :  { %3925 = vmatprep.subr.bf16.mxu0 %v4321_v0  ;;  %3946 = vmatpush3.bf16.msra.mxu1 %v4320_v63  ;;  %v4370_v63 = vld [vmem:[%s5462_s1 + $0x660] sm:$0xff]  }
  0x9e   :  { %3947 = vmatprep.subr.bf16.mxu1 %v4322_v1  ;;  %v4371_v0 = vld [vmem:[%s5462_s1 + $0x6e0] sm:$0xff]  }
  0x9f   :  { %v4372_v1 = vld [vmem:[%s5462_s1 + $0x620] sm:$0xff]  }
  0xa0   :  { %3926 = vmatpush3.bf16.msra.mxu0 %v4323_v2  ;;  %v4373_v2 = vld [vmem:[%s5462_s1 + $0x6a0] sm:$0xff]  }
  0xa1   :  { %3955 = vmatprep.subr.bf16.mxu0 %v4325_v7  ;;  %3948 = vmatpush3.bf16.msra.mxu1 %v4324_v4  ;;  %v4375_v4 = vld [vmem:[%s5462_s1 + $0x6d8] sm:$0xff]   ;;  %v4378_v7 = vld [vmem:[%s5462_s1 + $0x650] sm:$0xff]  }
  0xa2   :  { %3977 = vmatprep.subr.bf16.mxu1 %v4326_v10  ;;  %v4381_v10 = vld [vmem:[%s5462_s1 + $0x690] sm:$0xff]  }
  0xa3   :  { %2951 = vmatmul.mubr.bf16.vlgmr.msra.gmra.mxu0 %v735_v9  ;;  %v4380_v9 = vld [vmem:[%s5462_s1 + $0x610] sm:$0xff]  }
  0xa4   :  { %3956 = vmatpush3.bf16.msra.mxu0 %v4327_v12  ;;  %2991 = vmatmul.mubr.bf16.vlgmr.msra.gmra.mxu1 %v757_v16  ;;  %v4383_v12 = vld [vmem:[%s5462_s1 + $0x6c8] sm:$0xff]   ;;  %v4387_v16 = vld [vmem:[%s5462_s1 + $0x6c0] sm:$0xff]  }
  0xa5   :  { %3957 = vmatprep.subr.bf16.mxu0 %v4329_v17  ;;  %3978 = vmatpush3.bf16.msra.mxu1 %v4328_v14  ;;  %v4385_v14 = vld [vmem:[%s5462_s1 + $0x688] sm:$0xff]   ;;  %v4388_v17 = vld [vmem:[%s5462_s1 + $0x600] sm:$0xff]  }
  0xa6   :  { %3030 = vmatprep.mubr.bf16.mxu0 %v756_v20  ;;  %3979 = vmatprep.subr.bf16.mxu1 %v4330_v19  ;;  %v768_v19 = vrot.slane %v24_v18, %v4586_v35  ;;  %v4390_v20 = vld [vmem:[%s5462_s1 + $0x778] sm:$0xff]  }
  0xa7   :  { %3070 = vmatprep.mubr.bf16.mxu1 %v760_v23 }
  0xa8   :  { %3958 = vmatpush3.bf16.msra.mxu0 %v4331_v21  ;;  %v761_v21 = vcombine.high %v24_v18, %v24_v18  ;;  %v776_v23 = vcombine.high %v768_v19, %v768_v19  ;;  %v4427_v18 = vld [vmem:[%s5462_s1 + $0x870] sm:$0xff]  }
  0xa9   :  { %3959 = vmatprep.subr.bf16.mxu0 %v4333_v24  ;;  %3980 = vmatpush3.bf16.msra.mxu1 %v4332_v22  ;;  %v4389_v22 = vld [vmem:[%s5462_s1 + $0x680] sm:$0xff]   ;;  %v784_v24 = vrot.slane %v768_v19, %v4586_v35 }
  0xaa   :  { %3981 = vmatprep.subr.bf16.mxu1 %v4334_v25  ;;  %v4391_v25 = vld [vmem:[%s5462_s1 + $0x7f8] sm:$0xff]  }
  0xac   :  { %3960 = vmatpush3.bf16.msra.mxu0 %v4335_v26  ;;  %v5224_v26 = vrot.slane %v761_v21, %v4586_v35  ;;  %v4428_v21 = vld [vmem:[%s5462_s1 + $0x8f0] sm:$0xff]  }
  0xad   :  { %3961 = vmatprep.subr.bf16.mxu0 %v4337_v28  ;;  %3982 = vmatpush3.bf16.msra.mxu1 %v4336_v27  ;;  %v4392_v27 = vld [vmem:[%s5462_s1 + $0x738] sm:$0xff]   ;;  %v798_v28 = vrot.slane %v776_v23, %v4586_v35 }
  0xae   :  { %3983 = vmatprep.subr.bf16.mxu1 %v4338_v29  ;;  %v4393_v29 = vld [vmem:[%s5462_s1 + $0x7b8] sm:$0xff]  }
  0xb0   :  { %3962 = vmatpush3.bf16.msra.mxu0 %v4339_v30  ;;  %v777_v30 = vcombine.high %v5224_v26, %v5224_v26 }
  0xb1   :  { %3963 = vmatprep.subr.bf16.mxu0 %v4341_v32  ;;  %3984 = vmatpush3.bf16.msra.mxu1 %v4340_v31  ;;  %v806_v31 = vcombine.high %v784_v24, %v784_v24  ;;  %v4394_v32 = vld [vmem:[%s5462_s1 + $0x770] sm:$0xff]  }
  0xb2   :  { %3985 = vmatprep.subr.bf16.mxu1 %v4342_v33  ;;  %v808_v33 = vcombine.high %v798_v28, %v798_v28 }
  0xb4   :  { %3964 = vmatpush3.bf16.msra.mxu0 %v4343_v34 }
  0xb5   :  { %3965 = vmatprep.subr.bf16.mxu0 %v4345_v37  ;;  %3986 = vmatpush3.bf16.msra.mxu1 %v4344_v36  ;;  %v3436_v36 = vld [vmem:[%s5464_s2] ss:$0 sm:$0xff]  ;;  %v805_v37 = vrot.slane %v777_v30, %v4586_v35 }
  0xb6   :  { %3987 = vmatprep.subr.bf16.mxu1 %v4346_v38  ;;  %v4395_v38 = vld [vmem:[%s5462_s1 + $0x7f0] sm:$0xff]  }
  0xb8   :  { %3966 = vmatpush3.bf16.msra.mxu0 %v4347_v39 }
  0xb9   :  { %3967 = vmatprep.subr.bf16.mxu0 %v4349_v41  ;;  %3988 = vmatpush3.bf16.msra.mxu1 %v4348_v40  ;;  %v4396_v41 = vld [vmem:[%s5462_s1 + $0x730] sm:$0xff]  }
  0xba   :  { %3989 = vmatprep.subr.bf16.mxu1 %v4350_v42  ;;  %v809_v42 = vcombine.high %v805_v37, %v805_v37 }
  0xbc   :  { %3968 = vmatpush3.bf16.msra.mxu0 %v4351_v43 }
  0xbd   :  { %3969 = vmatprep.subr.bf16.mxu0 %v4353_v45  ;;  %3990 = vmatpush3.bf16.msra.mxu1 %v4352_v44  ;;  %v4398_v44 = vld [vmem:[%s5462_s1 + $0x768] sm:$0xff]  }
  0xbe   :  { %3991 = vmatprep.subr.bf16.mxu1 %v4354_v46 }
  0xc0   :  { %3970 = vmatpush3.bf16.msra.mxu0 %v4355_v47  ;;  %v4397_v47 = vld [vmem:[%s5462_s1 + $0x7b0] sm:$0xff]  }
  0xc1   :  { %3999 = vmatprep.subr.bf16.mxu0 %v4358_v50  ;;  %3992 = vmatpush3.bf16.msra.mxu1 %v4356_v48  ;;  %v4399_v50 = vld [vmem:[%s5462_s1 + $0x7e8] sm:$0xff]  }
  0xc2   :  { %4021 = vmatprep.subr.bf16.mxu1 %v4359_v51 }
  0xc3   :  { %3031 = vmatmul.mubr.bf16.vlgmr.msra.gmra.mxu0 %v742_v49 }
  0xc4   :  { %4000 = vmatpush3.bf16.msra.mxu0 %v4360_v52  ;;  %3071 = vmatmul.mubr.bf16.vlgmr.msra.gmra.mxu1 %v758_v54 }
  0xc5   :  { %4001 = vmatprep.subr.bf16.mxu0 %v4362_v55  ;;  %4022 = vmatpush3.bf16.msra.mxu1 %v4361_v53  ;;  %v4400_v53 = vld [vmem:[%s5462_s1 + $0x728] sm:$0xff]   ;;  %v4402_v55 = vld [vmem:[%s5462_s1 + $0x760] sm:$0xff]  }
  0xc6   :  { %4023 = vmatprep.subr.bf16.mxu1 %v4363_v56  ;;  %3110 = vmatprep.mubr.bf16.mxu0 %v798_v28 }
  0xc7   :  { %3150 = vmatprep.mubr.bf16.mxu1 %v808_v33 }
  0xc8   :  { %4002 = vmatpush3.bf16.msra.mxu0 %v4364_v57  ;;  %v4401_v57 = vld [vmem:[%s5462_s1 + $0x7a8] sm:$0xff]  }
  0xc9   :  { %4003 = vmatprep.subr.bf16.mxu0 %v4366_v59  ;;  %4024 = vmatpush3.bf16.msra.mxu1 %v4365_v58  ;;  %v4403_v58 = vld [vmem:[%s5462_s1 + $0x7e0] sm:$0xff]  }
  0xca   :  { %4025 = vmatprep.subr.bf16.mxu1 %v4367_v60  ;;  %v4404_v59 = vld [vmem:[%s5462_s1 + $0x720] sm:$0xff]   ;;  %v4406_v60 = vld [vmem:[%s5462_s1 + $0x758] sm:$0xff]  }
  0xcc   :  { %4004 = vmatpush3.bf16.msra.mxu0 %v4368_v61  ;;  %v4405_v61 = vld [vmem:[%s5462_s1 + $0x7a0] sm:$0xff]  }
  0xcd   :  { %4005 = vmatprep.subr.bf16.mxu0 %v4370_v63  ;;  %4026 = vmatpush3.bf16.msra.mxu1 %v4369_v62  ;;  %v4407_v62 = vld [vmem:[%s5462_s1 + $0x7d8] sm:$0xff]  }
  0xce   :  { %4027 = vmatprep.subr.bf16.mxu1 %v4371_v0  ;;  %v4408_v63 = vld [vmem:[%s5462_s1 + $0x718] sm:$0xff]   ;;  %v4410_v0 = vld [vmem:[%s5462_s1 + $0x750] sm:$0xff]  }
  0xd0   :  { %4006 = vmatpush3.bf16.msra.mxu0 %v4372_v1  ;;  %v4409_v1 = vld [vmem:[%s5462_s1 + $0x798] sm:$0xff]  }
  0xd1   :  { %4007 = vmatprep.subr.bf16.mxu0 %v4374_v3  ;;  %4028 = vmatpush3.bf16.msra.mxu1 %v4373_v2  ;;  %v4411_v2 = vld [vmem:[%s5462_s1 + $0x7d0] sm:$0xff]  }
  0xd2   :  { %4029 = vmatprep.subr.bf16.mxu1 %v4375_v4  ;;  %v4412_v3 = vld [vmem:[%s5462_s1 + $0x710] sm:$0xff]   ;;  %v4414_v4 = vld [vmem:[%s5462_s1 + $0x748] sm:$0xff]  }
  0xd4   :  { %4008 = vmatpush3.bf16.msra.mxu0 %v4376_v5  ;;  %v4413_v5 = vld [vmem:[%s5462_s1 + $0x790] sm:$0xff]  }
  0xd5   :  { %4009 = vmatprep.subr.bf16.mxu0 %v4378_v7  ;;  %4030 = vmatpush3.bf16.msra.mxu1 %v4377_v6  ;;  %v4415_v6 = vld [vmem:[%s5462_s1 + $0x7c8] sm:$0xff]  }
  0xd6   :  { %4031 = vmatprep.subr.bf16.mxu1 %v4379_v8  ;;  %v4416_v7 = vld [vmem:[%s5462_s1 + $0x708] sm:$0xff]   ;;  %v4418_v8 = vld [vmem:[%s5462_s1 + $0x740] sm:$0xff]  }
  0xd8   :  { %4010 = vmatpush3.bf16.msra.mxu0 %v4380_v9  ;;  %v4417_v9 = vld [vmem:[%s5462_s1 + $0x788] sm:$0xff]  }
  0xd9   :  { %4011 = vmatprep.subr.bf16.mxu0 %v4382_v11  ;;  %4032 = vmatpush3.bf16.msra.mxu1 %v4381_v10  ;;  %v4419_v10 = vld [vmem:[%s5462_s1 + $0x7c0] sm:$0xff]  }
  0xda   :  { %4033 = vmatprep.subr.bf16.mxu1 %v4383_v12  ;;  %v4420_v11 = vld [vmem:[%s5462_s1 + $0x700] sm:$0xff]   ;;  %v791_v12 = vrot.slane %v5224_v26, %v4586_v35  ;;  %v4431_v26 = vld [vmem:[%s5462_s1 + $0x868] sm:$0xff]  }
  0xdc   :  { %4012 = vmatpush3.bf16.msra.mxu0 %v4384_v13  ;;  %v4423_v13 = vld [vmem:[%s5462_s1 + $0x878] sm:$0xff]  }
  0xdd   :  { %4013 = vmatprep.subr.bf16.mxu0 %v4386_v15  ;;  %4034 = vmatpush3.bf16.msra.mxu1 %v4385_v14  ;;  %v4421_v14 = vld [vmem:[%s5462_s1 + $0x780] sm:$0xff]   ;;  %v4424_v15 = vld [vmem:[%s5462_s1 + $0x8f8] sm:$0xff]  }
  0xde   :  { %4035 = vmatprep.subr.bf16.mxu1 %v4387_v16  ;;  %v4425_v16 = vld [vmem:[%s5462_s1 + $0x838] sm:$0xff]  }
  0xe0   :  { %4014 = vmatpush3.bf16.msra.mxu0 %v4388_v17  ;;  %v807_v17 = vcombine.high %v791_v12, %v791_v12 }
  0xe1   :  { %4043 = vmatprep.subr.bf16.mxu0 %v4390_v20  ;;  %4036 = vmatpush3.bf16.msra.mxu1 %v4389_v22  ;;  %v4426_v20 = vld [vmem:[%s5462_s1 + $0x8b8] sm:$0xff]  }
  0xe2   :  { %4065 = vmatprep.subr.bf16.mxu1 %v4391_v25 }
  0xe3   :  { %v3751_v34 = vpop.f32.mrf.mxu0  ;;  %3111 = vmatmul.mubr.bf16.vlgmr.msra.gmra.mxu0 %v784_v24  ;;  %v4429_v24 = vld [vmem:[%s5462_s1 + $0x830] sm:$0xff]  }
  0xe4   :  { %v3773_v39 = vpop.f32.mrf.mxu1  ;;  %4044 = vmatpush3.bf16.msra.mxu0 %v4392_v27  ;;  %3151 = vmatmul.mubr.bf16.vlgmr.msra.gmra.mxu1 %v806_v31 }
  0xe5   :  { %v3752_v40 = vpop.f32.mrf.mxu0  ;;  %4045 = vmatprep.subr.bf16.mxu0 %v4394_v32  ;;  %4066 = vmatpush3.bf16.msra.mxu1 %v4393_v29  ;;  %v4430_v29 = vld [vmem:[%s5462_s1 + $0x8b0] sm:$0xff]   ;;  %v4432_v32 = vld [vmem:[%s5462_s1 + $0x8e8] sm:$0xff]  }
  0xe6   :  { %v3753_v43 = vadd.f32 %v3752_v40, %v3751_v34  ;;  %v3774_v45 = vpop.f32.mrf.mxu1  ;;  %3190 = vmatprep.mubr.bf16.mxu0 %v805_v37  ;;  %4067 = vmatprep.subr.bf16.mxu1 %v4395_v38  ;;  %v4435_v38 = vld [vmem:[%s5462_s1 + $0x860] sm:$0xff]   ;;  %v4434_v40 = vld [vmem:[%s5462_s1 + $0x8a8] sm:$0xff]  }
  0xe7   :  { %v3754_v46 = vpop.f32.mrf.mxu0  ;;  %v3775_v49 = vadd.f32 %v3774_v45, %v3773_v39  ;;  %3230 = vmatprep.mubr.bf16.mxu1 %v809_v42  ;;  %v4437_v42 = vld [vmem:[%s5462_s1 + $0x820] sm:$0xff]   ;;  %v4440_v45 = vld [vmem:[%s5462_s1 + $0x8d8] sm:$0xff]  }
  0xe8   :  { %v2633_v48 = vadd.f32 %v3753_v43, %v3436_v36  ;;  %v3776_v51 = vpop.f32.mrf.mxu1  ;;  %4046 = vmatpush3.bf16.msra.mxu0 %v4396_v41  ;;  %v4433_v36 = vld [vmem:[%s5462_s1 + $0x828] sm:$0xff]   ;;  %v4436_v41 = vld [vmem:[%s5462_s1 + $0x8e0] sm:$0xff]   ;;  %v4439_v43 = vld [vmem:[%s5462_s1 + $0x858] sm:$0xff]  }
  0xe9   :  { %v3755_v52 = vpop.f32.mrf.mxu0  ;;  %4047 = vmatprep.subr.bf16.mxu0 %v4398_v44  ;;  %4068 = vmatpush3.bf16.msra.mxu1 %v4397_v47  ;;  %v4438_v44 = vld [vmem:[%s5462_s1 + $0x8a0] sm:$0xff]   ;;  %v4441_v46 = vld [vmem:[%s5462_s1 + $0x818] sm:$0xff]   ;;  %v4443_v47 = vld [vmem:[%s5462_s1 + $0x850] sm:$0xff]  }
  0xea   :  { %v5260_v54 = vadd.f32 %v3775_v49, %v2633_v48  ;;  %v3777_v56 = vpop.f32.mrf.mxu1  ;;  %4069 = vmatprep.subr.bf16.mxu1 %v4399_v50  ;;  %v4442_v48 = vld [vmem:[%s5462_s1 + $0x898] sm:$0xff]   ;;  %v4444_v49 = vld [vmem:[%s5462_s1 + $0x8d0] sm:$0xff]   ;;  %v4447_v51 = vld [vmem:[%s5462_s1 + $0x848] sm:$0xff]  }
  0xeb   :  { %v4445_v50 = vld [vmem:[%s5462_s1 + $0x810] sm:$0xff]   ;;  %v4450_v56 = vld [vmem:[%s5462_s1 + $0x888] sm:$0xff]  }
  0xec   :  { %4048 = vmatpush3.bf16.msra.mxu0 %v4400_v53  ;;  %v4446_v52 = vld [vmem:[%s5462_s1 + $0x890] sm:$0xff]   ;;  %v4448_v53 = vld [vmem:[%s5462_s1 + $0x8c8] sm:$0xff]  }
  0xed   :  { %4049 = vmatprep.subr.bf16.mxu0 %v4402_v55  ;;  %4070 = vmatpush3.bf16.msra.mxu1 %v4401_v57  ;;  %v4451_v55 = vld [vmem:[%s5462_s1 + $0x840] sm:$0xff]  }
  0xee   :  { %4071 = vmatprep.subr.bf16.mxu1 %v4403_v58  ;;  %v4452_v57 = vld [vmem:[%s5462_s1 + $0x8c0] sm:$0xff]  }
  0xef   :  { %v4453_v58 = vld [vmem:[%s5462_s1 + $0x800] sm:$0xff]  }
  0xf0   :  { %4050 = vmatpush3.bf16.msra.mxu0 %v4404_v59  ;;  %v3437_v59 = vld.sshfl [vmem:[%s5463_s0 + $0x20] sm:$0x33 pattern:$0x75316420] }
  0xf1   :  { %4051 = vmatprep.subr.bf16.mxu0 %v4406_v60  ;;  %4072 = vmatpush3.bf16.msra.mxu1 %v4405_v61  ;;  %v817_v60 = vcombine.high %v3437_v59, %v3437_v59  ;;  %v824_v61 = vrot.slane %v3437_v59, %v4586_v35 }
  0xf2   :  { %4073 = vmatprep.subr.bf16.mxu1 %v4407_v62  ;;  %v4454_v62 = vld [vmem:[%s5462_s1 + $0x880] sm:$0xff]  }
  0xf4   :  { %4052 = vmatpush3.bf16.msra.mxu0 %v4408_v63  ;;  %v831_v63 = vrot.slane %v817_v60, %v4586_v35 }
  0xf5   :  { %4053 = vmatprep.subr.bf16.mxu0 %v4410_v0  ;;  %4074 = vmatpush3.bf16.msra.mxu1 %v4409_v1  ;;  %v832_v1 = vcombine.high %v824_v61, %v824_v61 }
  0xf6   :  { %4075 = vmatprep.subr.bf16.mxu1 %v4411_v2  ;;  %v833_v0 = vcombine.high %v831_v63, %v831_v63 }
  0xf8   :  { %4054 = vmatpush3.bf16.msra.mxu0 %v4412_v3 }
  0xf9   :  { %4055 = vmatprep.subr.bf16.mxu0 %v4414_v4  ;;  %4076 = vmatpush3.bf16.msra.mxu1 %v4413_v5 }
  0xfa   :  { %4077 = vmatprep.subr.bf16.mxu1 %v4415_v6 }
  0xfc   :  { %4056 = vmatpush3.bf16.msra.mxu0 %v4416_v7 }
  0xfd   :  { %4057 = vmatprep.subr.bf16.mxu0 %v4418_v8  ;;  %4078 = vmatpush3.bf16.msra.mxu1 %v4417_v9 }
  0xfe   :  { %4079 = vmatprep.subr.bf16.mxu1 %v4419_v10 }
 0x100   :  { %4058 = vmatpush3.bf16.msra.mxu0 %v4420_v11 }
 0x101   :  { %4087 = vmatprep.subr.bf16.mxu0 %v4423_v13  ;;  %4080 = vmatpush3.bf16.msra.mxu1 %v4421_v14 }
 0x102   :  { %4109 = vmatprep.subr.bf16.mxu1 %v4424_v15 }
 0x103   :  { %v3795_v19 = vpop.f32.mrf.mxu0  ;;  %3191 = vmatmul.mubr.bf16.vlgmr.msra.gmra.mxu0 %v791_v12 }
 0x104   :  { %v3817_v22 = vpop.f32.mrf.mxu1  ;;  %4088 = vmatpush3.bf16.msra.mxu0 %v4425_v16  ;;  %3231 = vmatmul.mubr.bf16.vlgmr.msra.gmra.mxu1 %v807_v17 }
 0x105   :  { %v3796_v23 = vpop.f32.mrf.mxu0  ;;  %4089 = vmatprep.subr.bf16.mxu0 %v4427_v18  ;;  %4110 = vmatpush3.bf16.msra.mxu1 %v4426_v20 }
 0x106   :  { %v3797_v25 = vadd.f32 %v3796_v23, %v3795_v19  ;;  %v3818_v27 = vpop.f32.mrf.mxu1  ;;  %4111 = vmatprep.subr.bf16.mxu1 %v4428_v21  ;;  %3270 = vmatprep.mubr.bf16.mxu0 %v831_v63 }
 0x107   :  { %v3798_v28 = vpop.f32.mrf.mxu0  ;;  %v3819_v31 = vadd.f32 %v3818_v27, %v3817_v22  ;;  %3310 = vmatprep.mubr.bf16.mxu1 %v833_v0  ;;  %v4456_v27 = vld [vmem:[%s5465_s3 + $0x30] sm:$0xff]  }
 0x108   :  { %v2713_v30 = vadd.f32 %v3797_v25, %v5260_v54  ;;  %v3820_v33 = vpop.f32.mrf.mxu1  ;;  %4090 = vmatpush3.bf16.msra.mxu0 %v4429_v24  ;;  %v4449_v54 = vld [vmem:[%s5462_s1 + $0x808] sm:$0xff]   ;;  %v4464_v25 = vmov 0.0  }
 0x109   :  { %v3799_v34 = vpop.f32.mrf.mxu0  ;;  %4091 = vmatprep.subr.bf16.mxu0 %v4431_v26  ;;  %4112 = vmatpush3.bf16.msra.mxu1 %v4430_v29  ;;  %v4455_v26 = vld [vmem:[%s5465_s3 + $0x38] sm:$0xff]   ;;  %v4457_v28 = vld [vmem:[%s5465_s3 + $0x28] sm:$0xff]   ;;  %v4458_v29 = vld [vmem:[%s5465_s3 + $0x20] sm:$0xff]  }
 0x10a   :  { %v5361_v37 = vadd.f32 %v3819_v31, %v2713_v30  ;;  %v3821_v39 = vpop.f32.mrf.mxu1  ;;  %4113 = vmatprep.subr.bf16.mxu1 %v4432_v32  ;;  %v4459_v30 = vld [vmem:[%s5465_s3 + $0x18] sm:$0xff]  }
 0x10c   :  { %4092 = vmatpush3.bf16.msra.mxu0 %v4433_v36  ;;  %v4460_v36 = vld [vmem:[%s5465_s3 + $0x10] sm:$0xff]  }
 0x10d   :  { %4093 = vmatprep.subr.bf16.mxu0 %v4435_v38  ;;  %4114 = vmatpush3.bf16.msra.mxu1 %v4434_v40 }
 0x10e   :  { %4115 = vmatprep.subr.bf16.mxu1 %v4436_v41 }
 0x110   :  { %4094 = vmatpush3.bf16.msra.mxu0 %v4437_v42 }
 0x111   :  { %4095 = vmatprep.subr.bf16.mxu0 %v4439_v43  ;;  %4116 = vmatpush3.bf16.msra.mxu1 %v4438_v44  ;;  %v4461_v44 = vld [vmem:[%s5465_s3 + $0x8] sm:$0xff]  }
 0x112   :  { %4117 = vmatprep.subr.bf16.mxu1 %v4440_v45 }
 0x114   :  { %4096 = vmatpush3.bf16.msra.mxu0 %v4441_v46  ;;  %v4462_v46 = vld [vmem:[%s5465_s3] sm:$0xff]  }
 0x115   :  { %4097 = vmatprep.subr.bf16.mxu0 %v4443_v47  ;;  %4118 = vmatpush3.bf16.msra.mxu1 %v4442_v48 }
 0x116   :  { %4119 = vmatprep.subr.bf16.mxu1 %v4444_v49 }
 0x118   :  { %4098 = vmatpush3.bf16.msra.mxu0 %v4445_v50 }
 0x119   :  { %4099 = vmatprep.subr.bf16.mxu0 %v4447_v51  ;;  %4120 = vmatpush3.bf16.msra.mxu1 %v4446_v52 }
 0x11a   :  { %4121 = vmatprep.subr.bf16.mxu1 %v4448_v53 }
 0x11c   :  { %4100 = vmatpush3.bf16.msra.mxu0 %v4449_v54 }
 0x11d   :  { %4101 = vmatprep.subr.bf16.mxu0 %v4451_v55  ;;  %4122 = vmatpush3.bf16.msra.mxu1 %v4450_v56 }
 0x11e   :  { %4123 = vmatprep.subr.bf16.mxu1 %v4452_v57 }
 0x120   :  { %4102 = vmatpush3.bf16.msra.mxu0 %v4453_v58 }
 0x121   :  { %4124 = vmatpush3.bf16.msra.mxu1 %v4454_v62  ;;  %4140 = vmatprep.subr.bf16.mxu0 %v4464_v25 }
 0x123   :  { %v3839_v2 = vpop.f32.mrf.mxu0  ;;  %3271 = vmatmul.mubr.bf16.vlgmr.msra.gmra.mxu0 %v824_v61 }
 0x124   :  { %v3861_v3 = vpop.f32.mrf.mxu1  ;;  %3311 = vmatmul.mubr.bf16.vlgmr.msra.gmra.mxu1 %v832_v1  ;;  %4141 = vmatpush3.bf16.msra.mxu0 %v4455_v26 }
 0x125   :  { %v3840_v4 = vpop.f32.mrf.mxu0  ;;  %4142 = vmatprep.subr.bf16.mxu0 %v4464_v25  ;;  %4156 = vmatprep.mubr.msk.bf16.mxu0 %vm4465_vm0, %v4464_v25 }
 0x126   :  { %v3841_v5 = vadd.f32 %v3840_v4, %v3839_v2  ;;  %v3862_v6 = vpop.f32.mrf.mxu1 }
 0x127   :  { %v3842_v7 = vpop.f32.mrf.mxu0  ;;  %v3863_v9 = vadd.f32 %v3862_v6, %v3861_v3 }
 0x128   :  { %v2793_v8 = vadd.f32 %v3841_v5, %v5361_v37  ;;  %v3864_v10 = vpop.f32.mrf.mxu1  ;;  %4143 = vmatpush3.bf16.msra.mxu0 %v4456_v27 }
 0x129   :  { %v3843_v11 = vpop.f32.mrf.mxu0  ;;  %4144 = vmatprep.subr.bf16.mxu0 %v4464_v25 }
 0x12a   :  { %v2833_v35 = vadd.f32 %v3863_v9, %v2793_v8  ;;  %v3865_v12 = vpop.f32.mrf.mxu1 }
 0x12c   :  { %4145 = vmatpush3.bf16.msra.mxu0 %v4457_v28 }
 0x12d   :  { %4146 = vmatprep.subr.bf16.mxu0 %v4464_v25 }
 0x130   :  { %4147 = vmatpush3.bf16.msra.mxu0 %v4458_v29 }
 0x131   :  { %4148 = vmatprep.subr.bf16.mxu0 %v4464_v25 }
 0x134   :  { %4149 = vmatpush3.bf16.msra.mxu0 %v4459_v30 }
 0x135   :  { %4150 = vmatprep.subr.bf16.mxu0 %v4464_v25 }
 0x138   :  { %4151 = vmatpush3.bf16.msra.mxu0 %v4460_v36 }
 0x139   :  { %4152 = vmatprep.subr.bf16.mxu0 %v4464_v25 }
 0x13c   :  { %4153 = vmatpush3.bf16.msra.mxu0 %v4461_v44 }
 0x13d   :  { %4154 = vmatprep.subr.bf16.mxu0 %v4464_v25 }
 0x140   :  { %4155 = vmatpush3.bf16.msra.mxu0 %v4462_v46 }
 0x143   :  { %v3883_v13 = vpop.f32.mrf.mxu0 }
 0x144   :  { %v3905_v14 = vpop.f32.mrf.mxu1 }
 0x145   :  { %v3884_v15 = vpop.f32.mrf.mxu0 }
 0x146   :  { %v3885_v16 = vadd.f32 %v3884_v15, %v3883_v13  ;;  %v3906_v17 = vpop.f32.mrf.mxu1 }
 0x147   :  { %v3886_v18 = vpop.f32.mrf.mxu0  ;;  %v3907_v20 = vadd.f32 %v3906_v17, %v3905_v14 }
 0x148   :  { %v2873_v19 = vadd.f32 %v3885_v16, %v2833_v35  ;;  %v3908_v21 = vpop.f32.mrf.mxu1 }
 0x149   :  { %v3887_v22 = vpop.f32.mrf.mxu0 }
 0x14a   :  { %v2913_v23 = vadd.f32 %v3907_v20, %v2873_v19  ;;  %v3909_v24 = vpop.f32.mrf.mxu1 }
 0x163   :  { %v3927_v31 = vpop.f32.mrf.mxu0 }
 0x164   :  { %v3949_v32 = vpop.f32.mrf.mxu1 }
 0x165   :  { %v3928_v33 = vpop.f32.mrf.mxu0 }
 0x166   :  { %v3929_v34 = vadd.f32 %v3928_v33, %v3927_v31  ;;  %v3950_v37 = vpop.f32.mrf.mxu1 }
 0x167   :  { %v3930_v38 = vpop.f32.mrf.mxu0  ;;  %v3951_v40 = vadd.f32 %v3950_v37, %v3949_v32  ;;  %v3726_v32 = vld [vmem:[%s5466_s4] ss:$0 sm:$0xff] }
 0x168   :  { %v2953_v39 = vadd.f32 %v3929_v34, %v2913_v23  ;;  %v3952_v41 = vpop.f32.mrf.mxu1 }
 0x169   :  { %v3931_v42 = vpop.f32.mrf.mxu0 }
 0x16a   :  { %v2993_v43 = vadd.f32 %v3951_v40, %v2953_v39  ;;  %v3953_v45 = vpop.f32.mrf.mxu1 }
 0x183   :  { %v3971_v47 = vpop.f32.mrf.mxu0 }
 0x184   :  { %v3993_v48 = vpop.f32.mrf.mxu1 }
 0x185   :  { %v3972_v49 = vpop.f32.mrf.mxu0 }
 0x186   :  { %v3973_v50 = vadd.f32 %v3972_v49, %v3971_v47  ;;  %v3994_v51 = vpop.f32.mrf.mxu1 }
 0x187   :  { %v3974_v52 = vpop.f32.mrf.mxu0  ;;  %v3995_v54 = vadd.f32 %v3994_v51, %v3993_v48 }
 0x188   :  { %v3033_v53 = vadd.f32 %v3973_v50, %v2993_v43  ;;  %v3996_v55 = vpop.f32.mrf.mxu1 }
 0x189   :  { %v3975_v56 = vpop.f32.mrf.mxu0 }
 0x18a   :  { %v3073_v57 = vadd.f32 %v3995_v54, %v3033_v53  ;;  %v3997_v58 = vpop.f32.mrf.mxu1 }
 0x1a3   :  { %v4015_v59 = vpop.f32.mrf.mxu0 }
 0x1a4   :  { %v4037_v60 = vpop.f32.mrf.mxu1 }
 0x1a5   :  { %v4016_v61 = vpop.f32.mrf.mxu0 }
 0x1a6   :  { %v4038_v62 = vpop.f32.mrf.mxu1  ;;  %v4017_v11 = vadd.f32 %v4016_v61, %v4015_v59 }
 0x1a7   :  { %v4018_v63 = vpop.f32.mrf.mxu0  ;;  %v4039_v12 = vadd.f32 %v4038_v62, %v4037_v60 }
 0x1a8   :  { %v4040_v0 = vpop.f32.mrf.mxu1  ;;  %v3113_v35 = vadd.f32 %v4017_v11, %v3073_v57 }
 0x1a9   :  { %v4019_v1 = vpop.f32.mrf.mxu0 }
 0x1aa   :  { %v4041_v2 = vpop.f32.mrf.mxu1  ;;  %v3153_v14 = vadd.f32 %v4039_v12, %v3113_v35 }
 0x1c3   :  { %v4059_v3 = vpop.f32.mrf.mxu0 }
 0x1c4   :  { %v4081_v4 = vpop.f32.mrf.mxu1 }
 0x1c5   :  { %v4060_v5 = vpop.f32.mrf.mxu0 }
 0x1c6   :  { %v4082_v6 = vpop.f32.mrf.mxu1  ;;  %v4061_v13 = vadd.f32 %v4060_v5, %v4059_v3 }
 0x1c7   :  { %v4062_v7 = vpop.f32.mrf.mxu0  ;;  %v4083_v16 = vadd.f32 %v4082_v6, %v4081_v4 }
 0x1c8   :  { %v4084_v8 = vpop.f32.mrf.mxu1  ;;  %v3193_v15 = vadd.f32 %v4061_v13, %v3153_v14 }
 0x1c9   :  { %v4063_v9 = vpop.f32.mrf.mxu0 }
 0x1ca   :  { %v4085_v10 = vpop.f32.mrf.mxu1  ;;  %v3233_v20 = vadd.f32 %v4083_v16, %v3193_v15 }
 0x1e3   :  { %v4103_v17 = vpop.f32.mrf.mxu0 }
 0x1e4   :  { %v4125_v18 = vpop.f32.mrf.mxu1 }
 0x1e5   :  { %v4104_v19 = vpop.f32.mrf.mxu0 }
 0x1e6   :  { %v4105_v21 = vadd.f32 %v4104_v19, %v4103_v17  ;;  %v4126_v22 = vpop.f32.mrf.mxu1 }
 0x1e7   :  { %v4106_v23 = vpop.f32.mrf.mxu0  ;;  %v4127_v25 = vadd.f32 %v4126_v22, %v4125_v18 }
 0x1e8   :  { %v3273_v24 = vadd.f32 %v4105_v21, %v3233_v20  ;;  %v4128_v26 = vpop.f32.mrf.mxu1 }
 0x1e9   :  { %v4107_v27 = vpop.f32.mrf.mxu0 }
 0x1ea   :  { %v3313_v28 = vadd.f32 %v4127_v25, %v3273_v24  ;;  %v4129_v29 = vpop.f32.mrf.mxu1 }
 0x1ec   :  { %v3318_v30 = vmax.f32 %v3313_v28, 0.0 }
 0x1ee   :  { %v3319_v31 = vpack.c.bf16 %v3318_v30, %v3318_v30 }
 0x1f0   :  { %4157 = vmatmul.mubr.bf16.vlgmr.msra.gmra.mxu0 %v3319_v31 }
 0x2b0   :  { %v3425_v33 = vpop.f32.mrf.mxu0 }
 0x2b1   :  { %v3426_v34 = vadd.f32 %v3726_v32, %v3425_v33 }
 0x2b2   :  { %v4158_v36 = vpop.f32.mrf.mxu0 }
 0x2b3   :  { %3431 = vst [vmem:[%s5467_s5] sm:$0x3] %v3426_v34 }
 0x2b4   :  { %v3428_v37 = vpop.f32.mrf.mxu0 }
 0x2b6   :  { %v4159_v38 = vpop.f32.mrf.mxu0 }

// kernel: transformer_forward.7
= control target key start
LH: loop header
LB: loop body
LE: loop exit
PB: predicated region body
PF: predicated region fallthrough
CT: control target
= control target key end

     0   :  { %9 = vsyncpa [#allocation3], 0  ;;  %s1018_s15 = smov 0   ;;  %s1469_s0 = inlined_call_operand.vmem [shape: f32[2,128], index: 0, kind: input, shape index: {}]   ;;  %s1470_s1 = inlined_call_operand.vmem [shape: f32[2,18,8,128], index: 1, kind: input, shape index: {}]   ;;  %s1471_s2 = inlined_call_operand.vmem [shape: f32[2,8,128], index: 2, kind: input, shape index: {}]   ;;  %s1472_s3 = inlined_call_operand.vmem [shape: f32[2,3,8,128], index: 3, kind: input, shape index: {}]   ;;  %s1473_s4 = inlined_call_operand.vmem [shape: f32[2,3,8,128], index: 4, kind: output, shape index: {}]  }
   0x1 LB: > { %s906_s16 = sadd.s32 4294967295, %s990_s15   ;;  %p908_p0 = scmp.ge.s32.totalorder %s990_s15, 1  ;;  %s990_s15 = sphi %s1018_s15, %s15_s15  }
   0x2   : > { %p145_p1 = scmp.lt.s32.totalorder %s990_s15, 3  ;;  %s158_s19 = sshll.u32 %s1469_s0, 4  ;;  %s159_s19 = int_to_ptr.vmem [resolvable:$true] %s158_s19 }
   0x3   : > { %p954_p3 = scmp.eq.s32.totalorder %s906_s16, 0  ;;  %s965_s21 = scalar_lea.vmem %s159_s19, 32 }
   0x4   : > { %p1029_p2 = pnand %p908_p0, %p145_p1  ;;  %p966_p6 = scmp.ne.s32.totalorder %s159_s19, %s965_s21 }
   0x5   : > { %p973_p10 = scmp.lt.s32.totalorder %s159_s19, %s159_s19  ;;  %p974_p11 = scmp.lt.s32.totalorder %s965_s21, %s965_s21 }
   0x6   : > { %p950_p4 = pneg %p1029_p2 }
   0x7   : > { %p975_p12 = por %p974_p11, %p973_p10 }
   0x8   : > { %p951_p5 = pnand %p954_p3, %p950_p4 }
   0xa   : > { %p967_p7 = pneg %p951_p5 }
   0xc   : > { %p968_p8 = pnand %p967_p7, %p966_p6 }
   0xe   : > { %p969_p9 = pneg %p968_p8 }
  0x10   : > { %p976_p13 = pnand %p975_p12, %p969_p9 }
  0x12   : > { %979 = shalt.err (!%p976_p13)
}
  0x13   : > { %s992_s22 = smov [#allocation2]   ;;  %194 = sbr.rel (%p1029_p2) target bundleno = 143 (0x8f), region = 36 }
  0x14   : > { %953 = dma.vmem_to_smem (!%p951_p5), %s159_s19, 32, %s992_s22, [#allocation3]  }
  0x18   : > { %985 = dma.done.wait (%p954_p3), [#allocation3], 32  }
  0x19   : > { %987 = vsyncadd (%p954_p3), [#allocation3], 4294967264 }
  0x1a   : > { %200 = sfence }
  0x1b   : > { %p230_p0 = scmp.lt.s32.totalorder %s906_s16, 1  ;;  %s1040_s23 = sshll.u32 %s906_s16, 7 }
  0x1c   : > { %s256_s24 = sld [smem:[#allocation2 + %s1040_s23]]  ;;  %s260_s25 = sadd.s32 1, %s1040_s23 }
  0x1d   : > { %s1476_s16 = smov (!%p230_p0, %s906_s16), 1  ;;  %s261_s26 = sld [smem:[#allocation2 + %s260_s25]] }
  0x1e   : > { %s265_s27 = sadd.s32 2, %s1040_s23  ;;  %s944_s28 = smul.u32 144, %s1476_s16 }
  0x1f   : > { %s914_s29 = sshll.u32 %s1476_s16, 3  ;;  %s266_s7 = sld [smem:[#allocation2 + %s265_s27]] }
  0x20   : > { %s1052_s6 = scalar_lea.vmem %s1470_s1, %s944_s28  ;;  %s1057_s10 = scalar_lea.vmem %s1471_s2, %s914_s29 }
  0x21   : > { %v249_v0 = vld [vmem:[%s1052_s6] sm:$0xff]  ;;  %s270_s11 = sadd.s32 3, %s1040_s23  ;;  %s275_s12 = sadd.s32 4, %s1040_s23  ;;  %v917_v2 = vld [vmem:[%s1052_s6 + $0x8] sm:$0xff]  ;;  %v919_v26 = vld [vmem:[%s1052_s6 + $0x10] sm:$0xff] }
  0x22   : > { %v257_v1 = vstv %s256_s24  ;;  %s271_s13 = sld [smem:[#allocation2 + %s270_s11]]  ;;  %s280_s14 = sadd.s32 5, %s1040_s23  ;;  %v252_v6 = vmul.f32 %v249_v0, %v249_v0  ;;  %v253_v9 = vmul.f32 %v917_v2, %v917_v2  ;;  %v254_v14 = vmul.f32 %v917_v2, %v249_v0  ;;  %v920_v32 = vld [vmem:[%s1052_s6 + $0x18] sm:$0xff]  ;;  %v921_v61 = vld [vmem:[%s1052_s6 + $0x20] sm:$0xff] }
  0x23   : > { %s276_s17 = sld [smem:[#allocation2 + %s275_s12]]  ;;  %s285_s18 = sadd.s32 6, %s1040_s23  ;;  %v258_v3 = vmul.f32 %v257_v1, %v249_v0  ;;  %v262_v4 = vstv %s261_s26  ;;  %v309_v35 = vmul.f32 %v919_v26, %v919_v26  ;;  %v310_v41 = vmul.f32 %v920_v32, %v920_v32 }
  0x24   : > { %s281_s19 = sld [smem:[#allocation2 + %s280_s14]]  ;;  %s290_s20 = sadd.s32 7, %s1040_s23  ;;  %v263_v8 = vmul.f32 %v262_v4, %v249_v0  ;;  %v311_v48 = vmul.f32 %v920_v32, %v919_v26 }
  0x25   : > { %v267_v5 = vstv %s266_s7  ;;  %s286_s21 = sld [smem:[#allocation2 + %s285_s18]]  ;;  %s295_s22 = sadd.s32 8, %s1040_s23 }
  0x26   : > { %v268_v7 = vmul.f32 %v917_v2, %v267_v5  ;;  %s291_s24 = sld [smem:[#allocation2 + %s290_s20]]  ;;  %s300_s25 = sadd.s32 9, %s1040_s23 }
  0x27   : > { %s1068_s27 = sld [smem:[#allocation2 + %s295_s22]]  ;;  %s312_s28 = sadd.s32 10, %s1040_s23 }
  0x28   : > { %v269_v10 = vadd.f32 %v268_v7, %v258_v3  ;;  %v272_v11 = vstv %s271_s13  ;;  %s1071_s26 = sld [smem:[#allocation2 + %s300_s25]]  ;;  %s317_s29 = sadd.s32 11, %s1040_s23  ;;  %v922_v3 = vld [vmem:[%s1052_s6 + $0x28] sm:$0xff] }
  0x29   : > { %v273_v12 = vmul.f32 %v917_v2, %v272_v11  ;;  %v277_v13 = vstv %s276_s17  ;;  %s1074_s30 = sld [smem:[#allocation2 + %s312_s28]]  ;;  %s322_s5 = sadd.s32 12, %s1040_s23 }
  0x2a   : > { %v278_v15 = vmul.f32 %v277_v13, %v252_v6  ;;  %v282_v16 = vstv %s281_s19  ;;  %s1077_s7 = sld [smem:[#allocation2 + %s317_s29]]  ;;  %s327_s8 = sadd.s32 13, %s1040_s23 }
  0x2b   : > { %v274_v17 = vadd.f32 %v273_v12, %v263_v8  ;;  %v283_v18 = vmul.f32 %v282_v16, %v252_v6  ;;  %v287_v19 = vstv %s286_s21  ;;  %s1080_s9 = sld [smem:[#allocation2 + %s322_s5]]  ;;  %s332_s11 = sadd.s32 14, %s1040_s23  ;;  %v366_v6 = vmul.f32 %v921_v61, %v921_v61 }
  0x2c   : > { %v279_v20 = vadd.f32 %v278_v15, %v269_v10  ;;  %v288_v21 = vmul.f32 %v287_v19, %v253_v9  ;;  %v292_v22 = vstv %s291_s24  ;;  %s1083_s12 = sld [smem:[#allocation2 + %s327_s8]]  ;;  %s337_s13 = sadd.s32 15, %s1040_s23  ;;  %v367_v12 = vmul.f32 %v922_v3, %v922_v3 }
  0x2d   : > { %v284_v23 = vadd.f32 %v283_v18, %v274_v17  ;;  %v293_v24 = vmul.f32 %v292_v22, %v253_v9  ;;  %v297_v25 = vstv %s1068_s27  ;;  %s1088_s14 = sld [smem:[#allocation2 + %s332_s11]]  ;;  %s342_s17 = sadd.s32 16, %s1040_s23  ;;  %v368_v19 = vmul.f32 %v922_v3, %v921_v61 }
  0x2e   : > { %v289_v27 = vadd.f32 %v288_v21, %v279_v20  ;;  %v298_v28 = vmul.f32 %v297_v25, %v254_v14  ;;  %v302_v29 = vstv %s1071_s26  ;;  %s1092_s18 = sld [smem:[#allocation2 + %s337_s13]]  ;;  %s347_s19 = sadd.s32 17, %s1040_s23 }
  0x2f   : > { %v294_v30 = vadd.f32 %v293_v24, %v284_v23  ;;  %v303_v31 = vmul.f32 %v302_v29, %v254_v14  ;;  %v314_v33 = vstv %s1074_s30  ;;  %s1097_s20 = sld [smem:[#allocation2 + %s342_s17]]  ;;  %s352_s21 = sadd.s32 18, %s1040_s23 }
  0x30   : > { %v299_v34 = vadd.f32 %v298_v28, %v289_v27  ;;  %v315_v36 = vmul.f32 %v919_v26, %v314_v33  ;;  %v319_v37 = vstv %s1077_s7  ;;  %s1101_s22 = sld [smem:[#allocation2 + %s347_s19]]  ;;  %s357_s24 = sadd.s32 19, %s1040_s23 }
  0x31   : > { %v304_v38 = vadd.f32 %v303_v31, %v294_v30  ;;  %v320_v39 = vmul.f32 %v919_v26, %v319_v37  ;;  %v324_v40 = vstv %s1080_s9  ;;  %s1105_s25 = sld [smem:[#allocation2 + %s352_s21]]  ;;  %s369_s27 = sadd.s32 20, %s1040_s23 }
  0x32   : > { %v316_v42 = vadd.f32 %v315_v36, %v299_v34  ;;  %v325_v43 = vmul.f32 %v920_v32, %v324_v40  ;;  %v329_v44 = vstv %s1083_s12  ;;  %s1109_s28 = sld [smem:[#allocation2 + %s357_s24]]  ;;  %s374_s26 = sadd.s32 21, %s1040_s23 }
  0x33   : > { %v321_v45 = vadd.f32 %v320_v39, %v304_v38  ;;  %v330_v46 = vmul.f32 %v920_v32, %v329_v44  ;;  %v334_v47 = vstv %s1088_s14  ;;  %s1113_s29 = sld [smem:[#allocation2 + %s369_s27]]  ;;  %s379_s30 = sadd.s32 22, %s1040_s23  ;;  %v923_v32 = vld [vmem:[%s1052_s6 + $0x30] sm:$0xff]  ;;  %v924_v38 = vld [vmem:[%s1052_s6 + $0x38] sm:$0xff] }
  0x34   : > { %v326_v49 = vadd.f32 %v325_v43, %v316_v42  ;;  %v335_v50 = vmul.f32 %v334_v47, %v309_v35  ;;  %v339_v51 = vstv %s1092_s18  ;;  %s1117_s5 = sld [smem:[#allocation2 + %s374_s26]]  ;;  %s384_s7 = sadd.s32 23, %s1040_s23  ;;  %v424_v47 = vmul.f32 %v924_v38, %v924_v38 }
  0x35   : > { %v331_v52 = vadd.f32 %v330_v46, %v321_v45  ;;  %v340_v53 = vmul.f32 %v339_v51, %v309_v35  ;;  %v344_v54 = vstv %s1097_s20  ;;  %s1121_s8 = sld [smem:[#allocation2 + %s379_s30]]  ;;  %s389_s9 = sadd.s32 24, %s1040_s23 }
  0x36   : > { %v336_v55 = vadd.f32 %v335_v50, %v326_v49  ;;  %v345_v56 = vmul.f32 %v344_v54, %v310_v41  ;;  %v349_v57 = vstv %s1101_s22  ;;  %s1125_s11 = sld [smem:[#allocation2 + %s384_s7]]  ;;  %s394_s12 = sadd.s32 25, %s1040_s23  ;;  %v425_v54 = vmul.f32 %v924_v38, %v923_v32 }
  0x37   : > { %v341_v58 = vadd.f32 %v340_v53, %v331_v52  ;;  %v350_v59 = vmul.f32 %v349_v57, %v310_v41  ;;  %v354_v60 = vstv %s1105_s25  ;;  %s1130_s13 = sld [smem:[#allocation2 + %s389_s9]]  ;;  %s399_s14 = sadd.s32 26, %s1040_s23  ;;  %v423_v41 = vmul.f32 %v923_v32, %v923_v32 }
  0x38   : > { %v346_v62 = vadd.f32 %v345_v56, %v336_v55  ;;  %v355_v63 = vmul.f32 %v354_v60, %v311_v48  ;;  %v359_v0 = vstv %s1109_s28  ;;  %s1134_s17 = sld [smem:[#allocation2 + %s394_s12]]  ;;  %s404_s18 = sadd.s32 27, %s1040_s23 }
  0x39   : > { %v351_v1 = vadd.f32 %v350_v59, %v341_v58  ;;  %v360_v2 = vmul.f32 %v359_v0, %v311_v48  ;;  %v371_v4 = vstv %s1113_s29  ;;  %s1139_s19 = sld [smem:[#allocation2 + %s399_s14]]  ;;  %s409_s20 = sadd.s32 28, %s1040_s23 }
  0x3a   : > { %v356_v5 = vadd.f32 %v355_v63, %v346_v62  ;;  %v372_v7 = vmul.f32 %v921_v61, %v371_v4  ;;  %v376_v8 = vstv %s1117_s5  ;;  %s1143_s21 = sld [smem:[#allocation2 + %s404_s18]]  ;;  %s414_s22 = sadd.s32 29, %s1040_s23 }
  0x3b   : > { %v361_v9 = vadd.f32 %v360_v2, %v351_v1  ;;  %v377_v10 = vmul.f32 %v921_v61, %v376_v8  ;;  %v381_v11 = vstv %s1121_s8  ;;  %s1147_s24 = sld [smem:[#allocation2 + %s409_s20]]  ;;  %s426_s25 = sadd.s32 30, %s1040_s23 }
  0x3c   : > { %v373_v13 = vadd.f32 %v372_v7, %v356_v5  ;;  %v382_v14 = vmul.f32 %v922_v3, %v381_v11  ;;  %v386_v15 = vstv %s1125_s11  ;;  %s1151_s27 = sld [smem:[#allocation2 + %s414_s22]]  ;;  %s431_s28 = sadd.s32 31, %s1040_s23 }
  0x3d   : > { %v378_v16 = vadd.f32 %v377_v10, %v361_v9  ;;  %v387_v17 = vmul.f32 %v922_v3, %v386_v15  ;;  %v391_v18 = vstv %s1130_s13  ;;  %s1155_s26 = sld [smem:[#allocation2 + %s426_s25]]  ;;  %s436_s29 = sadd.s32 32, %s1040_s23  ;;  %v925_v3 = vld [vmem:[%s1052_s6 + $0x40] sm:$0xff]  ;;  %v926_v9 = vld [vmem:[%s1052_s6 + $0x48] sm:$0xff] }
  0x3e   : > { %v383_v20 = vadd.f32 %v382_v14, %v373_v13  ;;  %v392_v21 = vmul.f32 %v391_v18, %v366_v6  ;;  %v396_v22 = vstv %s1134_s17  ;;  %s1159_s30 = sld [smem:[#allocation2 + %s431_s28]]  ;;  %s441_s5 = sadd.s32 33, %s1040_s23  ;;  %v481_v18 = vmul.f32 %v926_v9, %v926_v9 }
  0x3f   : > { %v388_v23 = vadd.f32 %v387_v17, %v378_v16  ;;  %v397_v24 = vmul.f32 %v396_v22, %v366_v6  ;;  %v401_v25 = vstv %s1139_s19  ;;  %s1163_s7 = sld [smem:[#allocation2 + %s436_s29]]  ;;  %s446_s8 = sadd.s32 34, %s1040_s23 }
  0x40   : > { %v393_v26 = vadd.f32 %v392_v21, %v383_v20  ;;  %v402_v27 = vmul.f32 %v401_v25, %v367_v12  ;;  %v406_v28 = vstv %s1143_s21  ;;  %s1167_s9 = sld [smem:[#allocation2 + %s441_s5]]  ;;  %s451_s11 = sadd.s32 35, %s1040_s23  ;;  %v482_v25 = vmul.f32 %v926_v9, %v925_v3 }
  0x41   : > { %v398_v29 = vadd.f32 %v397_v24, %v388_v23  ;;  %v407_v30 = vmul.f32 %v406_v28, %v367_v12  ;;  %v411_v31 = vstv %s1147_s24  ;;  %s1172_s12 = sld [smem:[#allocation2 + %s446_s8]]  ;;  %s456_s13 = sadd.s32 36, %s1040_s23  ;;  %v480_v12 = vmul.f32 %v925_v3, %v925_v3 }
  0x42   : > { %v403_v33 = vadd.f32 %v402_v27, %v393_v26  ;;  %v412_v34 = vmul.f32 %v411_v31, %v368_v19  ;;  %v416_v35 = vstv %s1151_s27  ;;  %s1176_s14 = sld [smem:[#allocation2 + %s451_s11]]  ;;  %s461_s17 = sadd.s32 37, %s1040_s23 }
  0x43   : > { %v408_v36 = vadd.f32 %v407_v30, %v398_v29  ;;  %v417_v37 = vmul.f32 %v416_v35, %v368_v19  ;;  %v428_v39 = vstv %s1155_s26  ;;  %s1181_s18 = sld [smem:[#allocation2 + %s456_s13]]  ;;  %s466_s19 = sadd.s32 38, %s1040_s23 }
  0x44   : > { %v413_v40 = vadd.f32 %v412_v34, %v403_v33  ;;  %v429_v42 = vmul.f32 %v923_v32, %v428_v39  ;;  %v433_v43 = vstv %s1159_s30  ;;  %s1185_s20 = sld [smem:[#allocation2 + %s461_s17]]  ;;  %s471_s21 = sadd.s32 39, %s1040_s23 }
  0x45   : > { %v418_v44 = vadd.f32 %v417_v37, %v408_v36  ;;  %v434_v45 = vmul.f32 %v923_v32, %v433_v43  ;;  %v438_v46 = vstv %s1163_s7  ;;  %s1189_s22 = sld [smem:[#allocation2 + %s466_s19]]  ;;  %s483_s24 = sadd.s32 40, %s1040_s23 }
  0x46   : > { %v430_v48 = vadd.f32 %v429_v42, %v413_v40  ;;  %v439_v49 = vmul.f32 %v924_v38, %v438_v46  ;;  %v443_v50 = vstv %s1167_s9  ;;  %s1193_s25 = sld [smem:[#allocation2 + %s471_s21]]  ;;  %s488_s27 = sadd.s32 41, %s1040_s23 }
  0x47   : > { %v435_v51 = vadd.f32 %v434_v45, %v418_v44  ;;  %v444_v52 = vmul.f32 %v924_v38, %v443_v50  ;;  %v448_v53 = vstv %s1172_s12  ;;  %s1197_s28 = sld [smem:[#allocation2 + %s483_s24]]  ;;  %s493_s26 = sadd.s32 42, %s1040_s23  ;;  %v927_v38 = vld [vmem:[%s1052_s6 + $0x50] sm:$0xff]  ;;  %v928_v44 = vld [vmem:[%s1052_s6 + $0x58] sm:$0xff] }
  0x48   : > { %v440_v55 = vadd.f32 %v439_v49, %v430_v48  ;;  %v449_v56 = vmul.f32 %v448_v53, %v423_v41  ;;  %v453_v57 = vstv %s1176_s14  ;;  %s1201_s29 = sld [smem:[#allocation2 + %s488_s27]]  ;;  %s498_s30 = sadd.s32 43, %s1040_s23  ;;  %v538_v53 = vmul.f32 %v928_v44, %v928_v44 }
  0x49   : > { %v445_v58 = vadd.f32 %v444_v52, %v435_v51  ;;  %v454_v59 = vmul.f32 %v453_v57, %v423_v41  ;;  %v458_v60 = vstv %s1181_s18  ;;  %s1205_s5 = sld [smem:[#allocation2 + %s493_s26]]  ;;  %s503_s7 = sadd.s32 44, %s1040_s23 }
  0x4a   : > { %v450_v61 = vadd.f32 %v449_v56, %v440_v55  ;;  %v459_v62 = vmul.f32 %v458_v60, %v424_v47  ;;  %v463_v63 = vstv %s1185_s20  ;;  %s1209_s8 = sld [smem:[#allocation2 + %s498_s30]]  ;;  %s508_s9 = sadd.s32 45, %s1040_s23  ;;  %v539_v60 = vmul.f32 %v928_v44, %v927_v38 }
  0x4b   : > { %v455_v0 = vadd.f32 %v454_v59, %v445_v58  ;;  %v464_v1 = vmul.f32 %v463_v63, %v424_v47  ;;  %v468_v2 = vstv %s1189_s22  ;;  %s1214_s11 = sld [smem:[#allocation2 + %s503_s7]]  ;;  %s513_s12 = sadd.s32 46, %s1040_s23  ;;  %v537_v47 = vmul.f32 %v927_v38, %v927_v38 }
  0x4c   : > { %v460_v4 = vadd.f32 %v459_v62, %v450_v61  ;;  %v469_v5 = vmul.f32 %v468_v2, %v425_v54  ;;  %v473_v6 = vstv %s1193_s25  ;;  %s1218_s13 = sld [smem:[#allocation2 + %s508_s9]]  ;;  %s518_s14 = sadd.s32 47, %s1040_s23 }
  0x4d   : > { %v465_v7 = vadd.f32 %v464_v1, %v455_v0  ;;  %v474_v8 = vmul.f32 %v473_v6, %v425_v54  ;;  %v485_v10 = vstv %s1197_s28  ;;  %s1223_s17 = sld [smem:[#allocation2 + %s513_s12]]  ;;  %s523_s18 = sadd.s32 48, %s1040_s23 }
  0x4e   : > { %v470_v11 = vadd.f32 %v469_v5, %v460_v4  ;;  %v486_v13 = vmul.f32 %v925_v3, %v485_v10  ;;  %v490_v14 = vstv %s1201_s29  ;;  %s1227_s19 = sld [smem:[#allocation2 + %s518_s14]]  ;;  %s528_s20 = sadd.s32 49, %s1040_s23  ;;  %v929_v10 = vld [vmem:[%s1052_s6 + $0x60] sm:$0xff] }
  0x4f   : > { %v475_v15 = vadd.f32 %v474_v8, %v465_v7  ;;  %v491_v16 = vmul.f32 %v925_v3, %v490_v14  ;;  %v495_v17 = vstv %s1205_s5  ;;  %s1231_s21 = sld [smem:[#allocation2 + %s523_s18]]  ;;  %s540_s22 = sadd.s32 50, %s1040_s23  ;;  %v769_v3 = vld [vmem:[%s1057_s10] sm:$0xff] }
  0x50   : > { %v487_v19 = vadd.f32 %v486_v13, %v470_v11  ;;  %v496_v20 = vmul.f32 %v926_v9, %v495_v17  ;;  %v500_v21 = vstv %s1209_s8  ;;  %s1235_s24 = sld [smem:[#allocation2 + %s528_s20]]  ;;  %s545_s25 = sadd.s32 51, %s1040_s23  ;;  %v1306_v14 = vmul.f32 0.95492965, %v769_v3  ;;  %v930_v17 = vld [vmem:[%s1052_s6 + $0x68] sm:$0xff] }
  0x51   : > { %v492_v22 = vadd.f32 %v491_v16, %v475_v15  ;;  %v501_v23 = vmul.f32 %v926_v9, %v500_v21  ;;  %v505_v24 = vstv %s1214_s11  ;;  %s1239_s27 = sld [smem:[#allocation2 + %s540_s22]]  ;;  %s550_s28 = sadd.s32 52, %s1040_s23  ;;  %v595_v21 = vmul.f32 %v930_v17, %v930_v17 }
  0x52   : > { %v497_v26 = vadd.f32 %v496_v20, %v487_v19  ;;  %v506_v27 = vmul.f32 %v505_v24, %v480_v12  ;;  %v510_v28 = vstv %s1218_s13  ;;  %s1243_s26 = sld [smem:[#allocation2 + %s545_s25]]  ;;  %s555_s29 = sadd.s32 53, %s1040_s23 }
  0x53   : > { %v502_v29 = vadd.f32 %v501_v23, %v492_v22  ;;  %v511_v30 = vmul.f32 %v510_v28, %v480_v12  ;;  %v515_v31 = vstv %s1223_s17  ;;  %s1247_s30 = sld [smem:[#allocation2 + %s550_s28]]  ;;  %s560_s5 = sadd.s32 54, %s1040_s23  ;;  %v931_v28 = vld [vmem:[%s1052_s6 + $0x70] sm:$0xff] }
  0x54   : > { %v507_v32 = vadd.f32 %v506_v27, %v497_v26  ;;  %v516_v33 = vmul.f32 %v515_v31, %v481_v18  ;;  %v520_v34 = vstv %s1227_s19  ;;  %s1251_s7 = sld [smem:[#allocation2 + %s555_s29]]  ;;  %s565_s8 = sadd.s32 55, %s1040_s23 }
  0x55   : > { %v512_v35 = vadd.f32 %v511_v30, %v502_v29  ;;  %v521_v36 = vmul.f32 %v520_v34, %v481_v18  ;;  %v525_v37 = vstv %s1231_s21  ;;  %s1256_s9 = sld [smem:[#allocation2 + %s560_s5]]  ;;  %s570_s11 = sadd.s32 56, %s1040_s23  ;;  %v594_v18 = vmul.f32 %v929_v10, %v929_v10 }
  0x56   : > { %v517_v39 = vadd.f32 %v516_v33, %v507_v32  ;;  %v526_v40 = vmul.f32 %v525_v37, %v482_v25  ;;  %v530_v41 = vstv %s1235_s24  ;;  %s1260_s12 = sld [smem:[#allocation2 + %s565_s8]]  ;;  %s575_s13 = sadd.s32 57, %s1040_s23  ;;  %v1326_v32 = vld [vmem:[%s1052_s6 + $0x78] sm:$0xff]  ;;  %v1328_v33 = vmul.f32 %v931_v28, %v931_v28 }
  0x57   : > { %v522_v42 = vadd.f32 %v521_v36, %v512_v35  ;;  %v531_v43 = vmul.f32 %v530_v41, %v482_v25  ;;  %v542_v45 = vstv %s1239_s27  ;;  %s1265_s14 = sld [smem:[#allocation2 + %s570_s11]]  ;;  %s580_s17 = sadd.s32 58, %s1040_s23  ;;  %v596_v25 = vmul.f32 %v930_v17, %v929_v10 }
  0x58   : > { %v527_v46 = vadd.f32 %v526_v40, %v517_v39  ;;  %v543_v48 = vmul.f32 %v927_v38, %v542_v45  ;;  %v547_v49 = vstv %s1243_s26  ;;  %s1269_s18 = sld [smem:[#allocation2 + %s575_s13]]  ;;  %s585_s19 = sadd.s32 59, %s1040_s23  ;;  %v1334_v37 = vmul.f32 %v1326_v32, %v1326_v32 }
  0x59   : > { %v532_v50 = vadd.f32 %v531_v43, %v522_v42  ;;  %v548_v51 = vmul.f32 %v927_v38, %v547_v49  ;;  %v552_v52 = vstv %s1247_s30  ;;  %s1273_s20 = sld [smem:[#allocation2 + %s580_s17]]  ;;  %s597_s21 = sadd.s32 60, %s1040_s23  ;;  %v1341_v41 = vmul.f32 %v1326_v32, %v931_v28  ;;  %v1347_v42 = vld [vmem:[%s1052_s6 + $0x80] sm:$0xff] }
  0x5a   : > { %v544_v54 = vadd.f32 %v543_v48, %v527_v46  ;;  %v553_v55 = vmul.f32 %v928_v44, %v552_v52  ;;  %v557_v56 = vstv %s1251_s7  ;;  %s1277_s22 = sld [smem:[#allocation2 + %s585_s19]]  ;;  %s602_s24 = sadd.s32 61, %s1040_s23  ;;  %v1355_v46 = vmul.f32 %v1347_v42, %v1347_v42 }
  0x5b   : > { %v549_v57 = vadd.f32 %v548_v51, %v532_v50  ;;  %v558_v58 = vmul.f32 %v928_v44, %v557_v56  ;;  %v562_v59 = vstv %s1256_s9  ;;  %s1281_s25 = sld [smem:[#allocation2 + %s597_s21]]  ;;  %s607_s27 = sadd.s32 62, %s1040_s23  ;;  %v1362_v50 = vld [vmem:[%s1052_s6 + $0x88] sm:$0xff]  ;;  %v772_v51 = vadd.f32 5.0, %v1306_v14 }
  0x5c   : > { %v554_v61 = vadd.f32 %v553_v55, %v544_v54  ;;  %v563_v62 = vmul.f32 %v562_v59, %v537_v47  ;;  %v567_v63 = vstv %s1260_s12  ;;  %s1285_s28 = sld [smem:[#allocation2 + %s602_s24]]  ;;  %s612_s26 = sadd.s32 63, %s1040_s23  ;;  %v1371_v55 = vmul.f32 %v1362_v50, %v1362_v50 }
  0x5d   : > { %v559_v0 = vadd.f32 %v558_v58, %v549_v57  ;;  %v568_v1 = vmul.f32 %v567_v63, %v537_v47  ;;  %v572_v2 = vstv %s1265_s14  ;;  %s1289_s29 = sld [smem:[#allocation2 + %s607_s27]]  ;;  %s617_s30 = sadd.s32 64, %s1040_s23  ;;  %v785_v59 = vadd.f32 3.0, %v1306_v14 }
  0x5e   : > { %v564_v4 = vadd.f32 %v563_v62, %v554_v61  ;;  %v573_v5 = vmul.f32 %v572_v2, %v538_v53  ;;  %v577_v6 = vstv %s1269_s18  ;;  %s1294_s5 = sld [smem:[#allocation2 + %s612_s26]]  ;;  %s622_s7 = sadd.s32 65, %s1040_s23  ;;  %v800_v63 = vadd.f32 1.0, %v1306_v14 }
  0x5f   : > { %v569_v7 = vadd.f32 %v568_v1, %v559_v0  ;;  %v578_v8 = vmul.f32 %v577_v6, %v538_v53  ;;  %v582_v9 = vstv %s1273_s20  ;;  %s1299_s8 = sld [smem:[#allocation2 + %s617_s30]]  ;;  %s627_s9 = sadd.s32 66, %s1040_s23  ;;  %vm773_vm0 = vcmp.ge.f32.partialorder %v772_v51, 6.0 }
  0x60   : > { %v574_v11 = vadd.f32 %v573_v5, %v564_v4  ;;  %v583_v12 = vmul.f32 %v582_v9, %v539_v60  ;;  %v587_v13 = vstv %s1277_s22  ;;  %s1303_s10 = sld [smem:[#allocation2 + %s622_s7]]  ;;  %s632_s11 = sadd.s32 67, %s1040_s23  ;;  %v935_v6 = vadd.f32 -6.0, %v772_v51 }
  0x61   : > { %v579_v15 = vadd.f32 %v578_v8, %v569_v7  ;;  %v588_v16 = vmul.f32 %v587_v13, %v539_v60  ;;  %v599_v19 = vstv %s1281_s25  ;;  %s1310_s12 = sld [smem:[#allocation2 + %s627_s9]]  ;;  %s637_s13 = sadd.s32 68, %s1040_s23  ;;  %vm786_vm1 = vcmp.ge.f32.partialorder %v785_v59, 6.0 }
  0x62   : > { %v584_v20 = vadd.f32 %v583_v12, %v574_v11  ;;  %v600_v22 = vmul.f32 %v929_v10, %v599_v19  ;;  %v604_v23 = vstv %s1285_s28  ;;  %s1314_s14 = sld [smem:[#allocation2 + %s632_s11]]  ;;  %s642_s17 = sadd.s32 69, %s1040_s23  ;;  %v936_v13 = vadd.f32 -6.0, %v785_v59 }
  0x63   : > { %v589_v24 = vadd.f32 %v588_v16, %v579_v15  ;;  %v605_v26 = vmul.f32 %v929_v10, %v604_v23  ;;  %v609_v27 = vstv %s1289_s29  ;;  %s1318_s18 = sld [smem:[#allocation2 + %s637_s13]]  ;;  %s654_s19 = sadd.s32 70, %s1040_s23  ;;  %vm801_vm2 = vcmp.ge.f32.partialorder %v800_v63, 6.0 }
  0x64   : > { %v601_v29 = vadd.f32 %v600_v22, %v584_v20  ;;  %v610_v30 = vmul.f32 %v930_v17, %v609_v27  ;;  %v614_v31 = vstv %s1294_s5  ;;  %s1323_s20 = sld [smem:[#allocation2 + %s642_s17]]  ;;  %s659_s21 = sadd.s32 71, %s1040_s23 }
  0x65   : > { %v606_v34 = vadd.f32 %v605_v26, %v589_v24  ;;  %v615_v35 = vmul.f32 %v930_v17, %v614_v31  ;;  %v619_v36 = vstv %s1299_s8  ;;  %s1336_s22 = sld [smem:[#allocation2 + %s654_s19]]  ;;  %s664_s24 = sadd.s32 72, %s1040_s23  ;;  %v939_v17 = vadd.f32 -6.0, %v800_v63 }
  0x66   : > { %v611_v38 = vadd.f32 %v610_v30, %v601_v29  ;;  %v620_v39 = vmul.f32 %v619_v36, %v594_v18  ;;  %v624_v40 = vstv %s1303_s10  ;;  %s1343_s25 = sld [smem:[#allocation2 + %s659_s21]]  ;;  %s669_s27 = sadd.s32 73, %s1040_s23  ;;  %v775_v24 = vsel %vm773_vm0, %v935_v6, %v772_v51 }
  0x67   : > { %v616_v43 = vadd.f32 %v615_v35, %v606_v34  ;;  %v625_v44 = vmul.f32 %v624_v40, %v594_v18  ;;  %v629_v45 = vstv %s1310_s12  ;;  %s1350_s28 = sld [smem:[#allocation2 + %s664_s24]]  ;;  %s674_s26 = sadd.s32 74, %s1040_s23  ;;  %v776_v36 = vsub.f32 4.0, %v775_v24 }
  0x68   : > { %v621_v47 = vadd.f32 %v620_v39, %v611_v38  ;;  %v630_v48 = vmul.f32 %v629_v45, %v595_v21  ;;  %v634_v49 = vstv %s1314_s14  ;;  %s1358_s29 = sld [smem:[#allocation2 + %s669_s27]]  ;;  %s679_s30 = sadd.s32 75, %s1040_s23 }
  0x69   : > { %v626_v52 = vadd.f32 %v625_v44, %v616_v43  ;;  %v635_v53 = vmul.f32 %v634_v49, %v595_v21  ;;  %v639_v54 = vstv %s1318_s18  ;;  %s1366_s5 = sld [smem:[#allocation2 + %s674_s26]]  ;;  %s684_s7 = sadd.s32 76, %s1040_s23 }
  0x6a   : > { %v631_v56 = vadd.f32 %v630_v48, %v621_v47  ;;  %v640_v57 = vmul.f32 %v639_v54, %v596_v25  ;;  %v644_v58 = vstv %s1323_s20  ;;  %s1374_s6 = sld [smem:[#allocation2 + %s679_s30]]  ;;  %s689_s8 = sadd.s32 77, %s1040_s23  ;;  %v710_v47 = vmul.f32 %v1362_v50, %v1347_v42 }
  0x6b   : > { %v636_v60 = vadd.f32 %v635_v53, %v626_v52  ;;  %v645_v61 = vmul.f32 %v644_v58, %v596_v25  ;;  %v656_v62 = vstv %s1336_s22  ;;  %s1379_s9 = sld [smem:[#allocation2 + %s684_s7]]  ;;  %s694_s10 = sadd.s32 78, %s1040_s23 }
  0x6c   : > { %v641_v0 = vadd.f32 %v640_v57, %v631_v56  ;;  %v657_v1 = vmul.f32 %v931_v28, %v656_v62  ;;  %v661_v2 = vstv %s1343_s25  ;;  %s1384_s11 = sld [smem:[#allocation2 + %s689_s8]]  ;;  %s699_s12 = sadd.s32 79, %s1040_s23  ;;  %v777_v56 = vmin.f32 %v775_v24, %v776_v36 }
  0x6d   : > { %v646_v3 = vadd.f32 %v645_v61, %v636_v60  ;;  %v662_v4 = vmul.f32 %v931_v28, %v661_v2  ;;  %v666_v5 = vstv %s1350_s28  ;;  %s1388_s13 = sld [smem:[#allocation2 + %s694_s10]]  ;;  %s711_s14 = sadd.s32 80, %s1040_s23  ;;  %v788_v28 = vsel %vm786_vm1, %v936_v13, %v785_v59 }
  0x6e   : > { %v658_v7 = vadd.f32 %v657_v1, %v641_v0  ;;  %v667_v8 = vmul.f32 %v1326_v32, %v666_v5  ;;  %v671_v9 = vstv %s1358_s29  ;;  %s1393_s17 = sld [smem:[#allocation2 + %s699_s12]]  ;;  %s716_s18 = sadd.s32 81, %s1040_s23  ;;  %v789_v40 = vsub.f32 4.0, %v788_v28 }
  0x6f   : > { %v663_v10 = vadd.f32 %v662_v4, %v646_v3  ;;  %v672_v11 = vmul.f32 %v1326_v32, %v671_v9  ;;  %v676_v12 = vstv %s1366_s5  ;;  %s1398_s19 = sld [smem:[#allocation2 + %s711_s14]]  ;;  %s721_s20 = sadd.s32 82, %s1040_s23  ;;  %v803_v32 = vsel %vm801_vm2, %v939_v17, %v800_v63 }
  0x70   : > { %v668_v14 = vadd.f32 %v667_v8, %v658_v7  ;;  %v677_v15 = vmul.f32 %v676_v12, %v1328_v33  ;;  %v681_v16 = vstv %s1374_s6  ;;  %s1403_s21 = sld [smem:[#allocation2 + %s716_s18]]  ;;  %s726_s22 = sadd.s32 83, %s1040_s23  ;;  %v804_v45 = vsub.f32 4.0, %v803_v32 }
  0x71   : > { %v673_v18 = vadd.f32 %v672_v11, %v663_v10  ;;  %v682_v19 = vmul.f32 %v681_v16, %v1328_v33  ;;  %v686_v20 = vstv %s1379_s9  ;;  %s1408_s24 = sld [smem:[#allocation2 + %s721_s20]]  ;;  %s731_s25 = sadd.s32 84, %s1040_s23  ;;  %v778_v5 = vmax.f32 %v777_v56, 0.0 }
  0x72   : > { %v678_v21 = vadd.f32 %v677_v15, %v668_v14  ;;  %v687_v22 = vmul.f32 %v686_v20, %v1334_v37  ;;  %v691_v23 = vstv %s1384_s11  ;;  %s1413_s27 = sld [smem:[#allocation2 + %s726_s22]]  ;;  %s736_s28 = sadd.s32 85, %s1040_s23  ;;  %v805_v63 = vmin.f32 %v803_v32, %v804_v45 }
  0x73   : > { %v683_v25 = vadd.f32 %v682_v19, %v673_v18  ;;  %v692_v26 = vmul.f32 %v691_v23, %v1334_v37  ;;  %v696_v27 = vstv %s1388_s13  ;;  %s1419_s26 = sld [smem:[#allocation2 + %s731_s25]]  ;;  %s741_s29 = sadd.s32 86, %s1040_s23  ;;  %v779_v18 = vmin.f32 %v778_v5, 1.0 }
  0x74   : > { %v688_v29 = vadd.f32 %v687_v22, %v678_v21  ;;  %v697_v30 = vmul.f32 %v696_v27, %v1341_v41  ;;  %v701_v31 = vstv %s1393_s17  ;;  %s1425_s30 = sld [smem:[#allocation2 + %s736_s28]]  ;;  %s746_s5 = sadd.s32 87, %s1040_s23 }
  0x75   : > { %v693_v33 = vadd.f32 %v692_v26, %v683_v25  ;;  %v702_v34 = vmul.f32 %v701_v31, %v1341_v41  ;;  %v713_v35 = vstv %s1398_s19  ;;  %s1431_s7 = sld [smem:[#allocation2 + %s741_s29]]  ;;  %s751_s6 = sadd.s32 88, %s1040_s23 }
  0x76   : > { %v698_v37 = vadd.f32 %v697_v30, %v688_v29  ;;  %v714_v38 = vmul.f32 %v1347_v42, %v713_v35  ;;  %v718_v39 = vstv %s1403_s21  ;;  %s1436_s8 = sld [smem:[#allocation2 + %s746_s5]]  ;;  %s756_s9 = sadd.s32 89, %s1040_s23 }
  0x77   : > { %v703_v43 = vadd.f32 %v702_v34, %v693_v33  ;;  %v719_v44 = vmul.f32 %v1347_v42, %v718_v39  ;;  %v723_v41 = vstv %s1408_s24  ;;  %s1441_s10 = sld [smem:[#allocation2 + %s751_s6]]  ;;  %s761_s11 = sadd.s32 90, %s1040_s23  ;;  %v790_v42 = vmin.f32 %v788_v28, %v789_v40 }
  0x78   : > { %v715_v48 = vadd.f32 %v714_v38, %v698_v37  ;;  %v724_v49 = vmul.f32 %v1362_v50, %v723_v41  ;;  %v728_v51 = vstv %s1413_s27  ;;  %s757_s12 = sld [smem:[#allocation2 + %s756_s9]]  ;;  %s765_s13 = sadd.s32 91, %s1040_s23 }
  0x79   : > { %v720_v52 = vadd.f32 %v719_v44, %v703_v43  ;;  %v729_v53 = vmul.f32 %v1362_v50, %v728_v51  ;;  %v733_v54 = vstv %s1419_s26  ;;  %s762_s14 = sld [smem:[#allocation2 + %s761_s11]]  ;;  %v791_v9 = vmax.f32 %v790_v42, 0.0  ;;  %s945_s23 = smul.u32 24, %s1476_s16 }
  0x7a   : > { %v725_v57 = vadd.f32 %v724_v49, %v715_v48  ;;  %v734_v58 = vmul.f32 %v733_v54, %v1355_v46  ;;  %v738_v59 = vstv %s1425_s30  ;;  %s766_s17 = sld [smem:[#allocation2 + %s765_s13]] }
  0x7b   : > { %v730_v60 = vadd.f32 %v729_v53, %v720_v52  ;;  %v739_v61 = vmul.f32 %v738_v59, %v1355_v46  ;;  %v743_v62 = vstv %s1431_s7  ;;  %v806_v46 = vmax.f32 %v805_v63, 0.0  ;;  %s243_s20 = scalar_lea.vmem %s1472_s3, %s945_s23  ;;  %s248_s22 = scalar_lea.vmem %s1473_s4, %s945_s23 }
  0x7c   : > { %v735_v0 = vadd.f32 %v734_v58, %v725_v57  ;;  %v744_v1 = vmul.f32 %v743_v62, %v1371_v55  ;;  %v748_v50 = vstv %s1436_s8  ;;  %v792_v19 = vmin.f32 %v791_v9, 1.0  ;;  %v782_v24 = vld [vmem:[%s243_s20] sm:$0xff]  ;;  %v937_v25 = vld [vmem:[%s243_s20 + $0x8] sm:$0xff]  ;;  %v940_v26 = vld [vmem:[%s243_s20 + $0x10] sm:$0xff] }
  0x7d   : > { %v740_v2 = vadd.f32 %v739_v61, %v730_v60  ;;  %v749_v3 = vmul.f32 %v748_v50, %v1371_v55  ;;  %v753_v4 = vstv %s1441_s10  ;;  %v807_v20 = vmin.f32 %v806_v46, 1.0 }
  0x7e   : > { %v745_v6 = vadd.f32 %v744_v1, %v735_v0  ;;  %v754_v7 = vmul.f32 %v753_v4, %v710_v47  ;;  %v758_v8 = vstv %s757_s12 }
  0x7f   : > { %v750_v10 = vadd.f32 %v749_v3, %v740_v2  ;;  %v759_v11 = vmul.f32 %v758_v8, %v710_v47  ;;  %v763_v12 = vstv %s762_s14 }
  0x80   : > { %v755_v13 = vadd.f32 %v754_v7, %v745_v6  ;;  %v767_v14 = vstv %s766_s17 }
  0x81   : > { %v760_v15 = vadd.f32 %v759_v11, %v750_v10 }
  0x82   : > { %v764_v16 = vadd.f32 %v763_v12, %v755_v13 }
  0x83   : > { %v768_v17 = vadd.f32 %v767_v14, %v760_v15 }
  0x85   : > { %v771_v55 = vmul.f32 %v768_v17, %v764_v16 }
  0x87   : > { %v780_v21 = vmul.f32 %v779_v18, %v771_v55  ;;  %v793_v22 = vmul.f32 %v792_v19, %v771_v55  ;;  %v808_v23 = vmul.f32 %v807_v20, %v771_v55 }
  0x89   : > { %v781_v27 = vsub.f32 %v768_v17, %v780_v21  ;;  %v794_v28 = vsub.f32 %v768_v17, %v793_v22  ;;  %v809_v29 = vsub.f32 %v768_v17, %v808_v23 }
  0x8b   : > { %v783_v30 = vadd.f32 %v782_v24, %v781_v27  ;;  %v797_v31 = vadd.f32 %v937_v25, %v794_v28  ;;  %v812_v32 = vadd.f32 %v940_v26, %v809_v29 }
  0x8d   : > { %784 = vst [vmem:[%s248_s22] sm:$0xff] %v783_v30  ;;  %938 = vst [vmem:[%s248_s22 + $0x8] sm:$0xff] %v797_v31 }
  0x8e   : > { %941 = vst [vmem:[%s248_s22 + $0x10] sm:$0xff] %v812_v32 }
  0x8f PF: > { %s15_s15 = sadd.s32 1, %s990_s15  }
  0x90   : > { %p12_p1 = scmp.ge.s32.totalorder %s15_s15, 4  }
  0x92   :  { %14 = sbr.rel (!%p12_p1) target bundleno = 1 (0x1), region = 98 }
  0x97   :  { %836 = vsyncpa [#allocation3], 1 }
  0x98   :  { %838 = vsyncpa [#allocation3 + $0x1], 1 }

</bundles_post_ra>
